<compile_context>
chip_gen: v7x
topology: tpu7x:2x2x1
jax: 0.10.0
libtpu: 0.0.40
codegen_flags: <defaults>
</compile_context>

<pallas_src>
import functools

import jax
import jax.numpy as jnp
from jax import lax
from jax.experimental import pallas as pl
from jax.experimental.pallas import tpu as pltpu

# ----- static network geometry (implied by Linear(120, 84): 25x25x1 input) ---
H0, W0 = 25, 25            # input spatial
K = 4                      # all convs are 4x4, stride 1, VALID
H1, W1 = 22, 22            # conv1 out
P1H, P1W = 11, 11          # pool1 out
NP1 = P1H * P1W            # 121 pool1 pixels / image
H2, W2 = 8, 8              # conv2 out
P2H, P2W = 4, 4            # pool2 out
NP2 = P2H * P2W            # 16 pool2 pixels / image
C1, C2, C3 = 6, 16, 120    # conv output channels
C1P = 8                    # conv2 per-tap input channels padded to sublane tile
F1, F2 = 84, 10            # fc sizes
LANES = 128                # channel padding -> lane-dense stores / MXU tiles


# ------------------------------ fused kernel --------------------------------
def _lnet_kernel(im_ref, w1_ref, b1_ref, w2_ref, b2_ref, w3_ref, b3_ref,
                 wf1_ref, bf1_ref, wf2_ref, bf2_ref,
                 out_ref, p1_ref, a2_ref, p2_ref, *, batch):
    f32 = jnp.float32

    # ---- conv1 (4 displacement matmuls) fused with the 2x2/2 max-pool ------
    # im_ref[d] holds the im2col rows of conv1 output pixels (2ph+dy, 2pw+dx)
    # for displacement d=(dy,dx), rows ordered (b, ph, pw).  Pool1 is therefore
    # an elementwise max over the four planes (bias + ReLU commute with max).
    w1 = w1_ref[...]                                               # (16, 128)
    p1_ref[...] = jnp.dot(im_ref[0], w1, preferred_element_type=f32)
    for d in range(1, 4):
        p1_ref[...] = jnp.maximum(
            p1_ref[...], jnp.dot(im_ref[d], w1, preferred_element_type=f32))
    p1_ref[...] = jnp.maximum(p1_ref[...] + b1_ref[...], 0.0)      # (B*121,128)

    # ---- conv2: taps folded into the contraction dim -> ONE MXU dot --------
    # Packed LHS lane k = 8*tap + cin ; w2_ref is packed identically.
    pieces = []
    for i in range(K):
        for j in range(K):
            blocks = [p1_ref[pl.ds(b * NP1 + (oh + i) * P1W + j, W2), :]
                      for b in range(batch) for oh in range(H2)]   # 16 x (8,128)
            pieces.append(jnp.concatenate(blocks, axis=0)[:, :C1P])
    lhs2 = jnp.concatenate(pieces, axis=1)                         # (B*64, 128)
    a2 = jnp.dot(lhs2, w2_ref[...], preferred_element_type=f32)
    a2_ref[...] = jnp.maximum(a2 + b2_ref[...], 0.0)               # (B*64, 128)

    # ---- pool2: 2x2/2 max via a handful of small strided sublane reads -----
    for b in range(batch):
        for qh in range(P2H):
            r0 = b * (H2 * W2) + (2 * qh) * W2
            v00 = a2_ref[pl.ds(r0,          P2W, stride=2), :]
            v01 = a2_ref[pl.ds(r0 + 1,      P2W, stride=2), :]
            v10 = a2_ref[pl.ds(r0 + W2,     P2W, stride=2), :]
            v11 = a2_ref[pl.ds(r0 + W2 + 1, P2W, stride=2), :]
            p2_ref[pl.ds(b * NP2 + qh * P2W, P2W), :] = jnp.maximum(
                jnp.maximum(v00, v01), jnp.maximum(v10, v11))

    # ---- conv3 (no activation): taps folded -> ONE (B,256)x(256,128) dot ---
    pieces3 = []
    for i in range(K):
        for j in range(K):
            rows = [p2_ref[pl.ds(b * NP2 + i * P2W + j, 1), :]
                    for b in range(batch)]                         # B x (1,128)
            pieces3.append(jnp.concatenate(rows, axis=0)[:, :C2])  # (B, 16)
    lhs3 = jnp.concatenate(pieces3, axis=1)                        # (B, 256)
    feat = jnp.dot(lhs3, w3_ref[...], preferred_element_type=f32) + b3_ref[...]

    # ---- fc1 + ReLU, fc2 + masked softmax (exact normalization) ------------
    h = jnp.maximum(
        jnp.dot(feat, wf1_ref[...], preferred_element_type=f32) + bf1_ref[...],
        0.0)
    logits = jnp.dot(h, wf2_ref[...], preferred_element_type=f32) + bf2_ref[...]
    lane = lax.broadcasted_iota(jnp.int32, logits.shape, 1)
    logits = jnp.where(lane < F2, logits, -1e30)                   # mask pad lanes
    m = jnp.max(logits, axis=-1, keepdims=True)
    e = jnp.exp(logits - m)
    out_ref[...] = e / jnp.sum(e, axis=-1, keepdims=True)


# ------------------------- params (PyTorch layouts) --------------------------
def init_params(key):
    ks = jax.random.split(key, 10)

    def n(k, shape, scale=0.1):
        return scale * jax.random.normal(k, shape, jnp.float32)

    return dict(
        conv1_w=n(ks[0], (C1, 1, K, K)),   conv1_b=n(ks[1], (C1,)),
        conv2_w=n(ks[2], (C2, C1, K, K)),  conv2_b=n(ks[3], (C2,)),
        conv3_w=n(ks[4], (C3, C2, K, K)),  conv3_b=n(ks[5], (C3,)),
        fc1_w=n(ks[6], (F1, C3)),          fc1_b=n(ks[7], (F1,)),
        fc2_w=n(ks[8], (F2, F1)),          fc2_b=n(ks[9], (F2,)),
    )


def prepare_params(p):
    """One-time repack of PyTorch-layout params into kernel-native layouts.

    conv2/conv3 weights are tap-packed along the contraction dim (row =
    tap*Cin_pad + cin) instead of being zero-padded to 128 channels, shrinking
    total weight bytes from ~2.2 MiB to ~0.33 MiB.
    """
    def pad2(m, rows, cols):
        return jnp.zeros((rows, cols), jnp.float32).at[:m.shape[0], :m.shape[1]].set(m)

    w1 = p["conv1_w"].transpose(2, 3, 1, 0).reshape(K * K, C1)          # (16, 6)
    w2 = p["conv2_w"].transpose(2, 3, 1, 0).reshape(K * K, C1, C2)      # (16, 6, 16)
    w3 = p["conv3_w"].transpose(2, 3, 1, 0).reshape(K * K, C2, C3)      # (16, 16, 120)
    w2p = (jnp.zeros((K * K, C1P, LANES), jnp.float32)
           .at[:, :C1, :C2].set(w2).reshape(K * K * C1P, LANES))        # (128, 128)
    w3p = (jnp.zeros((K * K, C2, LANES), jnp.float32)
           .at[:, :, :C3].set(w3).reshape(K * K * C2, LANES))           # (256, 128)

    return dict(
        w1=pad2(w1, K * K, LANES),
        b1=pad2(p["conv1_b"][None, :], 1, LANES),
        w2=w2p,
        b2=pad2(p["conv2_b"][None, :], 1, LANES),
        w3=w3p,
        b3=pad2(p["conv3_b"][None, :], 1, LANES),
        wf1=pad2(p["fc1_w"].T, LANES, LANES),
        bf1=pad2(p["fc1_b"][None, :], 1, LANES),
        wf2=pad2(p["fc2_w"].T, LANES, LANES),
        bf2=pad2(p["fc2_b"][None, :], 1, LANES),
    )


# --------------------------------- forward ----------------------------------
_VMEM_SPEC = pl.BlockSpec(memory_space=pltpu.MemorySpace.VMEM)


def _conv1_im2col(x_nchw):
    """(B,1,25,25) -> (4, B*121, 16) f32.  Pure layout plumbing (no arithmetic).

    Plane d=(dy,dx) holds, for every pool1 output pixel (b,ph,pw), the 16 conv1
    taps of conv-output pixel (2ph+dy, 2pw+dx):
        im[d, b*121 + ph*11 + pw, i*4 + j] == x[b, 2ph+dy+i, 2pw+dx+j]
    """
    B = x_nchw.shape[0]
    x = x_nchw.reshape(B, H0, W0).astype(jnp.float32)
    planes = []
    for dy in range(2):
        for dx in range(2):
            taps = [x[:, dy + i: dy + i + 2 * P1H: 2,
                        dx + j: dx + j + 2 * P1W: 2].reshape(B * NP1)
                    for i in range(K) for j in range(K)]
            planes.append(jnp.stack(taps, axis=-1))                # (B*121, 16)
    return jnp.stack(planes, axis=0)                               # (4, B*121, 16)


@jax.jit
def lnet_forward(x_nchw, kp):
    B = x_nchw.shape[0]
    im = _conv1_im2col(x_nchw)
    out = pl.pallas_call(
        functools.partial(_lnet_kernel, batch=B),
        out_shape=jax.ShapeDtypeStruct((B, LANES), jnp.float32),
        in_specs=[_VMEM_SPEC] * 11,
        out_specs=_VMEM_SPEC,
        scratch_shapes=[
            pltpu.VMEM((B * NP1, LANES), jnp.float32),       # pool1 output
            pltpu.VMEM((B * H2 * W2, LANES), jnp.float32),   # conv2 output
            pltpu.VMEM((B * NP2, LANES), jnp.float32),       # pool2 output
        ],
    )(im, kp["w1"], kp["b1"], kp["w2"], kp["b2"], kp["w3"], kp["b3"],
      kp["wf1"], kp["bf1"], kp["wf2"], kp["bf2"])
    return out[:, :F2]


# --------------------------- pure-JAX reference ------------------------------
@jax.jit
def _ref_forward(x_nchw, params):
    hi = lax.Precision.HIGHEST
    x = jnp.transpose(x_nchw, (0, 2, 3, 1))

    def conv(v, w, b):
        y = lax.conv_general_dilated(
            v, jnp.transpose(w, (2, 3, 1, 0)), (1, 1), "VALID",
            dimension_numbers=("NHWC", "HWIO", "NHWC"), precision=hi)
        return y + b

    def pool(v):
        return lax.reduce_window(v, -jnp.inf, lax.max,
                                 (1, 2, 2, 1), (1, 2, 2, 1), "VALID")

    y = jax.nn.relu(conv(x, params["conv1_w"], params["conv1_b"]))
    y = pool(y)
    y = jax.nn.relu(conv(y, params["conv2_w"], params["conv2_b"]))
    y = pool(y)
    y = conv(y, params["conv3_w"], params["conv3_b"])
    feat = y.reshape(x.shape[0], -1)
    h = jax.nn.relu(jnp.dot(feat, params["fc1_w"].T, precision=hi) + params["fc1_b"])
    logits = jnp.dot(h, params["fc2_w"].T, precision=hi) + params["fc2_b"]
    return jax.nn.softmax(logits, axis=-1)


if __name__ == "__main__":
    key = jax.random.PRNGKey(0)
    kx, kparam = jax.random.split(key)
    # 25x25 single-channel input: the conv/pool pipeline ends at 1x1x120,
    # matching the flatten into Linear(120, 84) in the PyTorch module.
    x = jax.random.normal(kx, (2, 1, H0, W0), jnp.float32)
    params = init_params(kparam)
    kparams = prepare_params(params)                 # one-time weight repack

    out = jax.block_until_ready(lnet_forward(x, kparams))
    ref = jax.block_until_ready(_ref_forward(x, params))

    assert out.shape == (2, F2)
    assert bool(jnp.all(jnp.isfinite(out)))
    assert bool(jnp.allclose(out, ref, atol=5e-3)), float(jnp.max(jnp.abs(out - ref)))
    print("KERNEL_OK")
</pallas_src>

<mosaic_0001>
module attributes {stable_mosaic.version = 11 : i64} {
  func.func @_lnet_kernel(%arg0: memref<4x242x16xf32, #tpu.memory_space<vmem>>, %arg1: memref<16x128xf32, #tpu.memory_space<vmem>>, %arg2: memref<1x128xf32, #tpu.memory_space<vmem>>, %arg3: memref<128x128xf32, #tpu.memory_space<vmem>>, %arg4: memref<1x128xf32, #tpu.memory_space<vmem>>, %arg5: memref<256x128xf32, #tpu.memory_space<vmem>>, %arg6: memref<1x128xf32, #tpu.memory_space<vmem>>, %arg7: memref<128x128xf32, #tpu.memory_space<vmem>>, %arg8: memref<1x128xf32, #tpu.memory_space<vmem>>, %arg9: memref<128x128xf32, #tpu.memory_space<vmem>>, %arg10: memref<1x128xf32, #tpu.memory_space<vmem>>, %arg11: memref<2x128xf32, #tpu.memory_space<vmem>>, %arg12: memref<242x128xf32, #tpu.memory_space<vmem>>, %arg13: memref<128x128xf32, #tpu.memory_space<vmem>>, %arg14: memref<32x128xf32, #tpu.memory_space<vmem>>) attributes {dimension_semantics = [], scalar_prefetch = 0 : i64, scratch_operands = 3 : i64, tpu.core_type = #tpu.core_type<tc>} {
    %c0 = arith.constant 0 : index
    %c0_0 = arith.constant 0 : index
    %0 = vector.load %arg1[%c0, %c0_0] : memref<16x128xf32, #tpu.memory_space<vmem>>, vector<16x128xf32>
    %c0_1 = arith.constant 0 : index
    %c0_2 = arith.constant 0 : index
    %c0_3 = arith.constant 0 : index
    %1 = vector.load %arg0[%c0_1, %c0_2, %c0_3] : memref<4x242x16xf32, #tpu.memory_space<vmem>>, vector<1x242x16xf32>
    %2 = vector.shape_cast %1 : vector<1x242x16xf32> to vector<242x16xf32>
    %cst = arith.constant dense<0.000000e+00> : vector<242x128xf32>
    %3 = tpu.matmul %2, %0, %cst {dimension_numbers = #tpu.dot_dimension_numbers<[1], [0], [0], [1], [0, 0, 1, 1], [], []>} : vector<242x16xf32>, vector<16x128xf32>, vector<242x128xf32> -> vector<242x128xf32>
    %c0_4 = arith.constant 0 : index
    %c0_5 = arith.constant 0 : index
    %4 = vector.load %arg12[%c0_4, %c0_5] : memref<242x128xf32, #tpu.memory_space<vmem>>, vector<242x128xf32>
    tpu.vector_store %arg12[%c0_4, %c0_5], %3 {strides = array<i32>} : memref<242x128xf32, #tpu.memory_space<vmem>>, vector<242x128xf32>,
    %c0_6 = arith.constant 0 : index
    %c0_7 = arith.constant 0 : index
    %5 = vector.load %arg12[%c0_6, %c0_7] : memref<242x128xf32, #tpu.memory_space<vmem>>, vector<242x128xf32>
    %c1 = arith.constant 1 : index
    %c0_8 = arith.constant 0 : index
    %c0_9 = arith.constant 0 : index
    %6 = vector.load %arg0[%c1, %c0_8, %c0_9] : memref<4x242x16xf32, #tpu.memory_space<vmem>>, vector<1x242x16xf32>
    %7 = vector.shape_cast %6 : vector<1x242x16xf32> to vector<242x16xf32>
    %cst_10 = arith.constant dense<0.000000e+00> : vector<242x128xf32>
    %8 = tpu.matmul %7, %0, %cst_10 {dimension_numbers = #tpu.dot_dimension_numbers<[1], [0], [0], [1], [0, 0, 1, 1], [], []>} : vector<242x16xf32>, vector<16x128xf32>, vector<242x128xf32> -> vector<242x128xf32>
    %9 = arith.maximumf %5, %8 : vector<242x128xf32>
    %c0_11 = arith.constant 0 : index
    %c0_12 = arith.constant 0 : index
    %10 = vector.load %arg12[%c0_11, %c0_12] : memref<242x128xf32, #tpu.memory_space<vmem>>, vector<242x128xf32>
    tpu.vector_store %arg12[%c0_11, %c0_12], %9 {strides = array<i32>} : memref<242x128xf32, #tpu.memory_space<vmem>>, vector<242x128xf32>,
    %c0_13 = arith.constant 0 : index
    %c0_14 = arith.constant 0 : index
    %11 = vector.load %arg12[%c0_13, %c0_14] : memref<242x128xf32, #tpu.memory_space<vmem>>, vector<242x128xf32>
    %c2 = arith.constant 2 : index
    %c0_15 = arith.constant 0 : index
    %c0_16 = arith.constant 0 : index
    %12 = vector.load %arg0[%c2, %c0_15, %c0_16] : memref<4x242x16xf32, #tpu.memory_space<vmem>>, vector<1x242x16xf32>
    %13 = vector.shape_cast %12 : vector<1x242x16xf32> to vector<242x16xf32>
    %cst_17 = arith.constant dense<0.000000e+00> : vector<242x128xf32>
    %14 = tpu.matmul %13, %0, %cst_17 {dimension_numbers = #tpu.dot_dimension_numbers<[1], [0], [0], [1], [0, 0, 1, 1], [], []>} : vector<242x16xf32>, vector<16x128xf32>, vector<242x128xf32> -> vector<242x128xf32>
    %15 = arith.maximumf %11, %14 : vector<242x128xf32>
    %c0_18 = arith.constant 0 : index
    %c0_19 = arith.constant 0 : index
    %16 = vector.load %arg12[%c0_18, %c0_19] : memref<242x128xf32, #tpu.memory_space<vmem>>, vector<242x128xf32>
    tpu.vector_store %arg12[%c0_18, %c0_19], %15 {strides = array<i32>} : memref<242x128xf32, #tpu.memory_space<vmem>>, vector<242x128xf32>,
    %c0_20 = arith.constant 0 : index
    %c0_21 = arith.constant 0 : index
    %17 = vector.load %arg12[%c0_20, %c0_21] : memref<242x128xf32, #tpu.memory_space<vmem>>, vector<242x128xf32>
    %c3 = arith.constant 3 : index
    %c0_22 = arith.constant 0 : index
    %c0_23 = arith.constant 0 : index
    %18 = vector.load %arg0[%c3, %c0_22, %c0_23] : memref<4x242x16xf32, #tpu.memory_space<vmem>>, vector<1x242x16xf32>
    %19 = vector.shape_cast %18 : vector<1x242x16xf32> to vector<242x16xf32>
    %cst_24 = arith.constant dense<0.000000e+00> : vector<242x128xf32>
    %20 = tpu.matmul %19, %0, %cst_24 {dimension_numbers = #tpu.dot_dimension_numbers<[1], [0], [0], [1], [0, 0, 1, 1], [], []>} : vector<242x16xf32>, vector<16x128xf32>, vector<242x128xf32> -> vector<242x128xf32>
    %21 = arith.maximumf %17, %20 : vector<242x128xf32>
    %c0_25 = arith.constant 0 : index
    %c0_26 = arith.constant 0 : index
    %22 = vector.load %arg12[%c0_25, %c0_26] : memref<242x128xf32, #tpu.memory_space<vmem>>, vector<242x128xf32>
    tpu.vector_store %arg12[%c0_25, %c0_26], %21 {strides = array<i32>} : memref<242x128xf32, #tpu.memory_space<vmem>>, vector<242x128xf32>,
    %c0_27 = arith.constant 0 : index
    %c0_28 = arith.constant 0 : index
    %23 = vector.load %arg12[%c0_27, %c0_28] : memref<242x128xf32, #tpu.memory_space<vmem>>, vector<242x128xf32>
    %c0_29 = arith.constant 0 : index
    %c0_30 = arith.constant 0 : index
    %24 = vector.load %arg2[%c0_29, %c0_30] : memref<1x128xf32, #tpu.memory_space<vmem>>, vector<1x128xf32>
    %25 = vector.broadcast %24 : vector<1x128xf32> to vector<242x128xf32>
    %26 = arith.addf %23, %25 : vector<242x128xf32>
    %cst_31 = arith.constant 0.000000e+00 : f32
    %27 = vector.broadcast %cst_31 : f32 to vector<242x128xf32>
    %28 = arith.maximumf %26, %27 : vector<242x128xf32>
    %c0_32 = arith.constant 0 : index
    %c0_33 = arith.constant 0 : index
    %29 = vector.load %arg12[%c0_32, %c0_33] : memref<242x128xf32, #tpu.memory_space<vmem>>, vector<242x128xf32>
    tpu.vector_store %arg12[%c0_32, %c0_33], %28 {strides = array<i32>} : memref<242x128xf32, #tpu.memory_space<vmem>>, vector<242x128xf32>,
    %c0_34 = arith.constant 0 : index
    %c0_35 = arith.constant 0 : index
    %30 = vector.load %arg12[%c0_34, %c0_35] : memref<242x128xf32, #tpu.memory_space<vmem>>, vector<8x128xf32>
    %c11 = arith.constant 11 : index
    %c0_36 = arith.constant 0 : index
    %31 = vector.load %arg12[%c11, %c0_36] : memref<242x128xf32, #tpu.memory_space<vmem>>, vector<8x128xf32>
    %c22 = arith.constant 22 : index
    %c0_37 = arith.constant 0 : index
    %32 = vector.load %arg12[%c22, %c0_37] : memref<242x128xf32, #tpu.memory_space<vmem>>, vector<8x128xf32>
    %c33 = arith.constant 33 : index
    %c0_38 = arith.constant 0 : index
    %33 = vector.load %arg12[%c33, %c0_38] : memref<242x128xf32, #tpu.memory_space<vmem>>, vector<8x128xf32>
    %c44 = arith.constant 44 : index
    %c0_39 = arith.constant 0 : index
    %34 = vector.load %arg12[%c44, %c0_39] : memref<242x128xf32, #tpu.memory_space<vmem>>, vector<8x128xf32>
    %c55 = arith.constant 55 : index
    %c0_40 = arith.constant 0 : index
    %35 = vector.load %arg12[%c55, %c0_40] : memref<242x128xf32, #tpu.memory_space<vmem>>, vector<8x128xf32>
    %c66 = arith.constant 66 : index
    %c0_41 = arith.constant 0 : index
    %36 = vector.load %arg12[%c66, %c0_41] : memref<242x128xf32, #tpu.memory_space<vmem>>, vector<8x128xf32>
    %c77 = arith.constant 77 : index
    %c0_42 = arith.constant 0 : index
    %37 = vector.load %arg12[%c77, %c0_42] : memref<242x128xf32, #tpu.memory_space<vmem>>, vector<8x128xf32>
    %c121 = arith.constant 121 : index
    %c0_43 = arith.constant 0 : index
    %38 = vector.load %arg12[%c121, %c0_43] : memref<242x128xf32, #tpu.memory_space<vmem>>, vector<8x128xf32>
    %c132 = arith.constant 132 : index
    %c0_44 = arith.constant 0 : index
    %39 = vector.load %arg12[%c132, %c0_44] : memref<242x128xf32, #tpu.memory_space<vmem>>, vector<8x128xf32>
    %c143 = arith.constant 143 : index
    %c0_45 = arith.constant 0 : index
    %40 = vector.load %arg12[%c143, %c0_45] : memref<242x128xf32, #tpu.memory_space<vmem>>, vector<8x128xf32>
    %c154 = arith.constant 154 : index
    %c0_46 = arith.constant 0 : index
    %41 = vector.load %arg12[%c154, %c0_46] : memref<242x128xf32, #tpu.memory_space<vmem>>, vector<8x128xf32>
    %c165 = arith.constant 165 : index
    %c0_47 = arith.constant 0 : index
    %42 = vector.load %arg12[%c165, %c0_47] : memref<242x128xf32, #tpu.memory_space<vmem>>, vector<8x128xf32>
    %c176 = arith.constant 176 : index
    %c0_48 = arith.constant 0 : index
    %43 = vector.load %arg12[%c176, %c0_48] : memref<242x128xf32, #tpu.memory_space<vmem>>, vector<8x128xf32>
    %c187 = arith.constant 187 : index
    %c0_49 = arith.constant 0 : index
    %44 = vector.load %arg12[%c187, %c0_49] : memref<242x128xf32, #tpu.memory_space<vmem>>, vector<8x128xf32>
    %c198 = arith.constant 198 : index
    %c0_50 = arith.constant 0 : index
    %45 = vector.load %arg12[%c198, %c0_50] : memref<242x128xf32, #tpu.memory_space<vmem>>, vector<8x128xf32>
    %46 = tpu.concatenate %30, %31, %32, %33, %34, %35, %36, %37, %38, %39, %40, %41, %42, %43, %44, %45 in 0 : vector<8x128xf32>, vector<8x128xf32>, vector<8x128xf32>, vector<8x128xf32>, vector<8x128xf32>, vector<8x128xf32>, vector<8x128xf32>, vector<8x128xf32>, vector<8x128xf32>, vector<8x128xf32>, vector<8x128xf32>, vector<8x128xf32>, vector<8x128xf32>, vector<8x128xf32>, vector<8x128xf32>, vector<8x128xf32> -> vector<128x128xf32>
    %47 = vector.extract_strided_slice %46 {offsets = [0, 0], sizes = [128, 8], strides = [1, 1]} : vector<128x128xf32> to vector<128x8xf32>
    %c1_51 = arith.constant 1 : index
    %c0_52 = arith.constant 0 : index
    %48 = vector.load %arg12[%c1_51, %c0_52] : memref<242x128xf32, #tpu.memory_space<vmem>>, vector<8x128xf32>
    %c12 = arith.constant 12 : index
    %c0_53 = arith.constant 0 : index
    %49 = vector.load %arg12[%c12, %c0_53] : memref<242x128xf32, #tpu.memory_space<vmem>>, vector<8x128xf32>
    %c23 = arith.constant 23 : index
    %c0_54 = arith.constant 0 : index
    %50 = vector.load %arg12[%c23, %c0_54] : memref<242x128xf32, #tpu.memory_space<vmem>>, vector<8x128xf32>
    %c34 = arith.constant 34 : index
    %c0_55 = arith.constant 0 : index
    %51 = vector.load %arg12[%c34, %c0_55] : memref<242x128xf32, #tpu.memory_space<vmem>>, vector<8x128xf32>
    %c45 = arith.constant 45 : index
    %c0_56 = arith.constant 0 : index
    %52 = vector.load %arg12[%c45, %c0_56] : memref<242x128xf32, #tpu.memory_space<vmem>>, vector<8x128xf32>
    %c56 = arith.constant 56 : index
    %c0_57 = arith.constant 0 : index
    %53 = vector.load %arg12[%c56, %c0_57] : memref<242x128xf32, #tpu.memory_space<vmem>>, vector<8x128xf32>
    %c67 = arith.constant 67 : index
    %c0_58 = arith.constant 0 : index
    %54 = vector.load %arg12[%c67, %c0_58] : memref<242x128xf32, #tpu.memory_space<vmem>>, vector<8x128xf32>
    %c78 = arith.constant 78 : index
    %c0_59 = arith.constant 0 : index
    %55 = vector.load %arg12[%c78, %c0_59] : memref<242x128xf32, #tpu.memory_space<vmem>>, vector<8x128xf32>
    %c122 = arith.constant 122 : index
    %c0_60 = arith.constant 0 : index
    %56 = vector.load %arg12[%c122, %c0_60] : memref<242x128xf32, #tpu.memory_space<vmem>>, vector<8x128xf32>
    %c133 = arith.constant 133 : index
    %c0_61 = arith.constant 0 : index
    %57 = vector.load %arg12[%c133, %c0_61] : memref<242x128xf32, #tpu.memory_space<vmem>>, vector<8x128xf32>
    %c144 = arith.constant 144 : index
    %c0_62 = arith.constant 0 : index
    %58 = vector.load %arg12[%c144, %c0_62] : memref<242x128xf32, #tpu.memory_space<vmem>>, vector<8x128xf32>
    %c155 = arith.constant 155 : index
    %c0_63 = arith.constant 0 : index
    %59 = vector.load %arg12[%c155, %c0_63] : memref<242x128xf32, #tpu.memory_space<vmem>>, vector<8x128xf32>
    %c166 = arith.constant 166 : index
    %c0_64 = arith.constant 0 : index
    %60 = vector.load %arg12[%c166, %c0_64] : memref<242x128xf32, #tpu.memory_space<vmem>>, vector<8x128xf32>
    %c177 = arith.constant 177 : index
    %c0_65 = arith.constant 0 : index
    %61 = vector.load %arg12[%c177, %c0_65] : memref<242x128xf32, #tpu.memory_space<vmem>>, vector<8x128xf32>
    %c188 = arith.constant 188 : index
    %c0_66 = arith.constant 0 : index
    %62 = vector.load %arg12[%c188, %c0_66] : memref<242x128xf32, #tpu.memory_space<vmem>>, vector<8x128xf32>
    %c199 = arith.constant 199 : index
    %c0_67 = arith.constant 0 : index
    %63 = vector.load %arg12[%c199, %c0_67] : memref<242x128xf32, #tpu.memory_space<vmem>>, vector<8x128xf32>
    %64 = tpu.concatenate %48, %49, %50, %51, %52, %53, %54, %55, %56, %57, %58, %59, %60, %61, %62, %63 in 0 : vector<8x128xf32>, vector<8x128xf32>, vector<8x128xf32>, vector<8x128xf32>, vector<8x128xf32>, vector<8x128xf32>, vector<8x128xf32>, vector<8x128xf32>, vector<8x128xf32>, vector<8x128xf32>, vector<8x128xf32>, vector<8x128xf32>, vector<8x128xf32>, vector<8x128xf32>, vector<8x128xf32>, vector<8x128xf32> -> vector<128x128xf32>
    %65 = vector.extract_strided_slice %64 {offsets = [0, 0], sizes = [128, 8], strides = [1, 1]} : vector<128x128xf32> to vector<128x8xf32>
    %c2_68 = arith.constant 2 : index
    %c0_69 = arith.constant 0 : index
    %66 = vector.load %arg12[%c2_68, %c0_69] : memref<242x128xf32, #tpu.memory_space<vmem>>, vector<8x128xf32>
    %c13 = arith.constant 13 : index
    %c0_70 = arith.constant 0 : index
    %67 = vector.load %arg12[%c13, %c0_70] : memref<242x128xf32, #tpu.memory_space<vmem>>, vector<8x128xf32>
    %c24 = arith.constant 24 : index
    %c0_71 = arith.constant 0 : index
    %68 = vector.load %arg12[%c24, %c0_71] : memref<242x128xf32, #tpu.memory_space<vmem>>, vector<8x128xf32>
    %c35 = arith.constant 35 : index
    %c0_72 = arith.constant 0 : index
    %69 = vector.load %arg12[%c35, %c0_72] : memref<242x128xf32, #tpu.memory_space<vmem>>, vector<8x128xf32>
    %c46 = arith.constant 46 : index
    %c0_73 = arith.constant 0 : index
    %70 = vector.load %arg12[%c46, %c0_73] : memref<242x128xf32, #tpu.memory_space<vmem>>, vector<8x128xf32>
    %c57 = arith.constant 57 : index
    %c0_74 = arith.constant 0 : index
    %71 = vector.load %arg12[%c57, %c0_74] : memref<242x128xf32, #tpu.memory_space<vmem>>, vector<8x128xf32>
    %c68 = arith.constant 68 : index
    %c0_75 = arith.constant 0 : index
    %72 = vector.load %arg12[%c68, %c0_75] : memref<242x128xf32, #tpu.memory_space<vmem>>, vector<8x128xf32>
    %c79 = arith.constant 79 : index
    %c0_76 = arith.constant 0 : index
    %73 = vector.load %arg12[%c79, %c0_76] : memref<242x128xf32, #tpu.memory_space<vmem>>, vector<8x128xf32>
    %c123 = arith.constant 123 : index
    %c0_77 = arith.constant 0 : index
    %74 = vector.load %arg12[%c123, %c0_77] : memref<242x128xf32, #tpu.memory_space<vmem>>, vector<8x128xf32>
    %c134 = arith.constant 134 : index
    %c0_78 = arith.constant 0 : index
    %75 = vector.load %arg12[%c134, %c0_78] : memref<242x128xf32, #tpu.memory_space<vmem>>, vector<8x128xf32>
    %c145 = arith.constant 145 : index
    %c0_79 = arith.constant 0 : index
    %76 = vector.load %arg12[%c145, %c0_79] : memref<242x128xf32, #tpu.memory_space<vmem>>, vector<8x128xf32>
    %c156 = arith.constant 156 : index
    %c0_80 = arith.constant 0 : index
    %77 = vector.load %arg12[%c156, %c0_80] : memref<242x128xf32, #tpu.memory_space<vmem>>, vector<8x128xf32>
    %c167 = arith.constant 167 : index
    %c0_81 = arith.constant 0 : index
    %78 = vector.load %arg12[%c167, %c0_81] : memref<242x128xf32, #tpu.memory_space<vmem>>, vector<8x128xf32>
    %c178 = arith.constant 178 : index
    %c0_82 = arith.constant 0 : index
    %79 = vector.load %arg12[%c178, %c0_82] : memref<242x128xf32, #tpu.memory_space<vmem>>, vector<8x128xf32>
    %c189 = arith.constant 189 : index
    %c0_83 = arith.constant 0 : index
    %80 = vector.load %arg12[%c189, %c0_83] : memref<242x128xf32, #tpu.memory_space<vmem>>, vector<8x128xf32>
    %c200 = arith.constant 200 : index
    %c0_84 = arith.constant 0 : index
    %81 = vector.load %arg12[%c200, %c0_84] : memref<242x128xf32, #tpu.memory_space<vmem>>, vector<8x128xf32>
    %82 = tpu.concatenate %66, %67, %68, %69, %70, %71, %72, %73, %74, %75, %76, %77, %78, %79, %80, %81 in 0 : vector<8x128xf32>, vector<8x128xf32>, vector<8x128xf32>, vector<8x128xf32>, vector<8x128xf32>, vector<8x128xf32>, vector<8x128xf32>, vector<8x128xf32>, vector<8x128xf32>, vector<8x128xf32>, vector<8x128xf32>, vector<8x128xf32>, vector<8x128xf32>, vector<8x128xf32>, vector<8x128xf32>, vector<8x128xf32> -> vector<128x128xf32>
    %83 = vector.extract_strided_slice %82 {offsets = [0, 0], sizes = [128, 8], strides = [1, 1]} : vector<128x128xf32> to vector<128x8xf32>
    %c3_85 = arith.constant 3 : index
    %c0_86 = arith.constant 0 : index
    %84 = vector.load %arg12[%c3_85, %c0_86] : memref<242x128xf32, #tpu.memory_space<vmem>>, vector<8x128xf32>
    %c14 = arith.constant 14 : index
    %c0_87 = arith.constant 0 : index
    %85 = vector.load %arg12[%c14, %c0_87] : memref<242x128xf32, #tpu.memory_space<vmem>>, vector<8x128xf32>
    %c25 = arith.constant 25 : index
    %c0_88 = arith.constant 0 : index
    %86 = vector.load %arg12[%c25, %c0_88] : memref<242x128xf32, #tpu.memory_space<vmem>>, vector<8x128xf32>
    %c36 = arith.constant 36 : index
    %c0_89 = arith.constant 0 : index
    %87 = vector.load %arg12[%c36, %c0_89] : memref<242x128xf32, #tpu.memory_space<vmem>>, vector<8x128xf32>
    %c47 = arith.constant 47 : index
    %c0_90 = arith.constant 0 : index
    %88 = vector.load %arg12[%c47, %c0_90] : memref<242x128xf32, #tpu.memory_space<vmem>>, vector<8x128xf32>
    %c58 = arith.constant 58 : index
    %c0_91 = arith.constant 0 : index
    %89 = vector.load %arg12[%c58, %c0_91] : memref<242x128xf32, #tpu.memory_space<vmem>>, vector<8x128xf32>
    %c69 = arith.constant 69 : index
    %c0_92 = arith.constant 0 : index
    %90 = vector.load %arg12[%c69, %c0_92] : memref<242x128xf32, #tpu.memory_space<vmem>>, vector<8x128xf32>
    %c80 = arith.constant 80 : index
    %c0_93 = arith.constant 0 : index
    %91 = vector.load %arg12[%c80, %c0_93] : memref<242x128xf32, #tpu.memory_space<vmem>>, vector<8x128xf32>
    %c124 = arith.constant 124 : index
    %c0_94 = arith.constant 0 : index
    %92 = vector.load %arg12[%c124, %c0_94] : memref<242x128xf32, #tpu.memory_space<vmem>>, vector<8x128xf32>
    %c135 = arith.constant 135 : index
    %c0_95 = arith.constant 0 : index
    %93 = vector.load %arg12[%c135, %c0_95] : memref<242x128xf32, #tpu.memory_space<vmem>>, vector<8x128xf32>
    %c146 = arith.constant 146 : index
    %c0_96 = arith.constant 0 : index
    %94 = vector.load %arg12[%c146, %c0_96] : memref<242x128xf32, #tpu.memory_space<vmem>>, vector<8x128xf32>
    %c157 = arith.constant 157 : index
    %c0_97 = arith.constant 0 : index
    %95 = vector.load %arg12[%c157, %c0_97] : memref<242x128xf32, #tpu.memory_space<vmem>>, vector<8x128xf32>
    %c168 = arith.constant 168 : index
    %c0_98 = arith.constant 0 : index
    %96 = vector.load %arg12[%c168, %c0_98] : memref<242x128xf32, #tpu.memory_space<vmem>>, vector<8x128xf32>
    %c179 = arith.constant 179 : index
    %c0_99 = arith.constant 0 : index
    %97 = vector.load %arg12[%c179, %c0_99] : memref<242x128xf32, #tpu.memory_space<vmem>>, vector<8x128xf32>
    %c190 = arith.constant 190 : index
    %c0_100 = arith.constant 0 : index
    %98 = vector.load %arg12[%c190, %c0_100] : memref<242x128xf32, #tpu.memory_space<vmem>>, vector<8x128xf32>
    %c201 = arith.constant 201 : index
    %c0_101 = arith.constant 0 : index
    %99 = vector.load %arg12[%c201, %c0_101] : memref<242x128xf32, #tpu.memory_space<vmem>>, vector<8x128xf32>
    %100 = tpu.concatenate %84, %85, %86, %87, %88, %89, %90, %91, %92, %93, %94, %95, %96, %97, %98, %99 in 0 : vector<8x128xf32>, vector<8x128xf32>, vector<8x128xf32>, vector<8x128xf32>, vector<8x128xf32>, vector<8x128xf32>, vector<8x128xf32>, vector<8x128xf32>, vector<8x128xf32>, vector<8x128xf32>, vector<8x128xf32>, vector<8x128xf32>, vector<8x128xf32>, vector<8x128xf32>, vector<8x128xf32>, vector<8x128xf32> -> vector<128x128xf32>
    %101 = vector.extract_strided_slice %100 {offsets = [0, 0], sizes = [128, 8], strides = [1, 1]} : vector<128x128xf32> to vector<128x8xf32>
    %c11_102 = arith.constant 11 : index
    %c0_103 = arith.constant 0 : index
    %102 = vector.load %arg12[%c11_102, %c0_103] : memref<242x128xf32, #tpu.memory_space<vmem>>, vector<8x128xf32>
    %c22_104 = arith.constant 22 : index
    %c0_105 = arith.constant 0 : index
    %103 = vector.load %arg12[%c22_104, %c0_105] : memref<242x128xf32, #tpu.memory_space<vmem>>, vector<8x128xf32>
    %c33_106 = arith.constant 33 : index
    %c0_107 = arith.constant 0 : index
    %104 = vector.load %arg12[%c33_106, %c0_107] : memref<242x128xf32, #tpu.memory_space<vmem>>, vector<8x128xf32>
    %c44_108 = arith.constant 44 : index
    %c0_109 = arith.constant 0 : index
    %105 = vector.load %arg12[%c44_108, %c0_109] : memref<242x128xf32, #tpu.memory_space<vmem>>, vector<8x128xf32>
    %c55_110 = arith.constant 55 : index
    %c0_111 = arith.constant 0 : index
    %106 = vector.load %arg12[%c55_110, %c0_111] : memref<242x128xf32, #tpu.memory_space<vmem>>, vector<8x128xf32>
    %c66_112 = arith.constant 66 : index
    %c0_113 = arith.constant 0 : index
    %107 = vector.load %arg12[%c66_112, %c0_113] : memref<242x128xf32, #tpu.memory_space<vmem>>, vector<8x128xf32>
    %c77_114 = arith.constant 77 : index
    %c0_115 = arith.constant 0 : index
    %108 = vector.load %arg12[%c77_114, %c0_115] : memref<242x128xf32, #tpu.memory_space<vmem>>, vector<8x128xf32>
    %c88 = arith.constant 88 : index
    %c0_116 = arith.constant 0 : index
    %109 = vector.load %arg12[%c88, %c0_116] : memref<242x128xf32, #tpu.memory_space<vmem>>, vector<8x128xf32>
    %c132_117 = arith.constant 132 : index
    %c0_118 = arith.constant 0 : index
    %110 = vector.load %arg12[%c132_117, %c0_118] : memref<242x128xf32, #tpu.memory_space<vmem>>, vector<8x128xf32>
    %c143_119 = arith.constant 143 : index
    %c0_120 = arith.constant 0 : index
    %111 = vector.load %arg12[%c143_119, %c0_120] : memref<242x128xf32, #tpu.memory_space<vmem>>, vector<8x128xf32>
    %c154_121 = arith.constant 154 : index
    %c0_122 = arith.constant 0 : index
    %112 = vector.load %arg12[%c154_121, %c0_122] : memref<242x128xf32, #tpu.memory_space<vmem>>, vector<8x128xf32>
    %c165_123 = arith.constant 165 : index
    %c0_124 = arith.constant 0 : index
    %113 = vector.load %arg12[%c165_123, %c0_124] : memref<242x128xf32, #tpu.memory_space<vmem>>, vector<8x128xf32>
    %c176_125 = arith.constant 176 : index
    %c0_126 = arith.constant 0 : index
    %114 = vector.load %arg12[%c176_125, %c0_126] : memref<242x128xf32, #tpu.memory_space<vmem>>, vector<8x128xf32>
    %c187_127 = arith.constant 187 : index
    %c0_128 = arith.constant 0 : index
    %115 = vector.load %arg12[%c187_127, %c0_128] : memref<242x128xf32, #tpu.memory_space<vmem>>, vector<8x128xf32>
    %c198_129 = arith.constant 198 : index
    %c0_130 = arith.constant 0 : index
    %116 = vector.load %arg12[%c198_129, %c0_130] : memref<242x128xf32, #tpu.memory_space<vmem>>, vector<8x128xf32>
    %c209 = arith.constant 209 : index
    %c0_131 = arith.constant 0 : index
    %117 = vector.load %arg12[%c209, %c0_131] : memref<242x128xf32, #tpu.memory_space<vmem>>, vector<8x128xf32>
    %118 = tpu.concatenate %102, %103, %104, %105, %106, %107, %108, %109, %110, %111, %112, %113, %114, %115, %116, %117 in 0 : vector<8x128xf32>, vector<8x128xf32>, vector<8x128xf32>, vector<8x128xf32>, vector<8x128xf32>, vector<8x128xf32>, vector<8x128xf32>, vector<8x128xf32>, vector<8x128xf32>, vector<8x128xf32>, vector<8x128xf32>, vector<8x128xf32>, vector<8x128xf32>, vector<8x128xf32>, vector<8x128xf32>, vector<8x128xf32> -> vector<128x128xf32>
    %119 = vector.extract_strided_slice %118 {offsets = [0, 0], sizes = [128, 8], strides = [1, 1]} : vector<128x128xf32> to vector<128x8xf32>
    %c12_132 = arith.constant 12 : index
    %c0_133 = arith.constant 0 : index
    %120 = vector.load %arg12[%c12_132, %c0_133] : memref<242x128xf32, #tpu.memory_space<vmem>>, vector<8x128xf32>
    %c23_134 = arith.constant 23 : index
    %c0_135 = arith.constant 0 : index
    %121 = vector.load %arg12[%c23_134, %c0_135] : memref<242x128xf32, #tpu.memory_space<vmem>>, vector<8x128xf32>
    %c34_136 = arith.constant 34 : index
    %c0_137 = arith.constant 0 : index
    %122 = vector.load %arg12[%c34_136, %c0_137] : memref<242x128xf32, #tpu.memory_space<vmem>>, vector<8x128xf32>
    %c45_138 = arith.constant 45 : index
    %c0_139 = arith.constant 0 : index
    %123 = vector.load %arg12[%c45_138, %c0_139] : memref<242x128xf32, #tpu.memory_space<vmem>>, vector<8x128xf32>
    %c56_140 = arith.constant 56 : index
    %c0_141 = arith.constant 0 : index
    %124 = vector.load %arg12[%c56_140, %c0_141] : memref<242x128xf32, #tpu.memory_space<vmem>>, vector<8x128xf32>
    %c67_142 = arith.constant 67 : index
    %c0_143 = arith.constant 0 : index
    %125 = vector.load %arg12[%c67_142, %c0_143] : memref<242x128xf32, #tpu.memory_space<vmem>>, vector<8x128xf32>
    %c78_144 = arith.constant 78 : index
    %c0_145 = arith.constant 0 : index
    %126 = vector.load %arg12[%c78_144, %c0_145] : memref<242x128xf32, #tpu.memory_space<vmem>>, vector<8x128xf32>
    %c89 = arith.constant 89 : index
    %c0_146 = arith.constant 0 : index
    %127 = vector.load %arg12[%c89, %c0_146] : memref<242x128xf32, #tpu.memory_space<vmem>>, vector<8x128xf32>
    %c133_147 = arith.constant 133 : index
    %c0_148 = arith.constant 0 : index
    %128 = vector.load %arg12[%c133_147, %c0_148] : memref<242x128xf32, #tpu.memory_space<vmem>>, vector<8x128xf32>
    %c144_149 = arith.constant 144 : index
    %c0_150 = arith.constant 0 : index
    %129 = vector.load %arg12[%c144_149, %c0_150] : memref<242x128xf32, #tpu.memory_space<vmem>>, vector<8x128xf32>
    %c155_151 = arith.constant 155 : index
    %c0_152 = arith.constant 0 : index
    %130 = vector.load %arg12[%c155_151, %c0_152] : memref<242x128xf32, #tpu.memory_space<vmem>>, vector<8x128xf32>
    %c166_153 = arith.constant 166 : index
    %c0_154 = arith.constant 0 : index
    %131 = vector.load %arg12[%c166_153, %c0_154] : memref<242x128xf32, #tpu.memory_space<vmem>>, vector<8x128xf32>
    %c177_155 = arith.constant 177 : index
    %c0_156 = arith.constant 0 : index
    %132 = vector.load %arg12[%c177_155, %c0_156] : memref<242x128xf32, #tpu.memory_space<vmem>>, vector<8x128xf32>
    %c188_157 = arith.constant 188 : index
    %c0_158 = arith.constant 0 : index
    %133 = vector.load %arg12[%c188_157, %c0_158] : memref<242x128xf32, #tpu.memory_space<vmem>>, vector<8x128xf32>
    %c199_159 = arith.constant 199 : index
    %c0_160 = arith.constant 0 : index
    %134 = vector.load %arg12[%c199_159, %c0_160] : memref<242x128xf32, #tpu.memory_space<vmem>>, vector<8x128xf32>
    %c210 = arith.constant 210 : index
    %c0_161 = arith.constant 0 : index
    %135 = vector.load %arg12[%c210, %c0_161] : memref<242x128xf32, #tpu.memory_space<vmem>>, vector<8x128xf32>
    %136 = tpu.concatenate %120, %121, %122, %123, %124, %125, %126, %127, %128, %129, %130, %131, %132, %133, %134, %135 in 0 : vector<8x128xf32>, vector<8x128xf32>, vector<8x128xf32>, vector<8x128xf32>, vector<8x128xf32>, vector<8x128xf32>, vector<8x128xf32>, vector<8x128xf32>, vector<8x128xf32>, vector<8x128xf32>, vector<8x128xf32>, vector<8x128xf32>, vector<8x128xf32>, vector<8x128xf32>, vector<8x128xf32>, vector<8x128xf32> -> vector<128x128xf32>
    %137 = vector.extract_strided_slice %136 {offsets = [0, 0], sizes = [128, 8], strides = [1, 1]} : vector<128x128xf32> to vector<128x8xf32>
    %c13_162 = arith.constant 13 : index
    %c0_163 = arith.constant 0 : index
    %138 = vector.load %arg12[%c13_162, %c0_163] : memref<242x128xf32, #tpu.memory_space<vmem>>, vector<8x128xf32>
    %c24_164 = arith.constant 24 : index
    %c0_165 = arith.constant 0 : index
    %139 = vector.load %arg12[%c24_164, %c0_165] : memref<242x128xf32, #tpu.memory_space<vmem>>, vector<8x128xf32>
    %c35_166 = arith.constant 35 : index
    %c0_167 = arith.constant 0 : index
    %140 = vector.load %arg12[%c35_166, %c0_167] : memref<242x128xf32, #tpu.memory_space<vmem>>, vector<8x128xf32>
    %c46_168 = arith.constant 46 : index
    %c0_169 = arith.constant 0 : index
    %141 = vector.load %arg12[%c46_168, %c0_169] : memref<242x128xf32, #tpu.memory_space<vmem>>, vector<8x128xf32>
    %c57_170 = arith.constant 57 : index
    %c0_171 = arith.constant 0 : index
    %142 = vector.load %arg12[%c57_170, %c0_171] : memref<242x128xf32, #tpu.memory_space<vmem>>, vector<8x128xf32>
    %c68_172 = arith.constant 68 : index
    %c0_173 = arith.constant 0 : index
    %143 = vector.load %arg12[%c68_172, %c0_173] : memref<242x128xf32, #tpu.memory_space<vmem>>, vector<8x128xf32>
    %c79_174 = arith.constant 79 : index
    %c0_175 = arith.constant 0 : index
    %144 = vector.load %arg12[%c79_174, %c0_175] : memref<242x128xf32, #tpu.memory_space<vmem>>, vector<8x128xf32>
    %c90 = arith.constant 90 : index
    %c0_176 = arith.constant 0 : index
    %145 = vector.load %arg12[%c90, %c0_176] : memref<242x128xf32, #tpu.memory_space<vmem>>, vector<8x128xf32>
    %c134_177 = arith.constant 134 : index
    %c0_178 = arith.constant 0 : index
    %146 = vector.load %arg12[%c134_177, %c0_178] : memref<242x128xf32, #tpu.memory_space<vmem>>, vector<8x128xf32>
    %c145_179 = arith.constant 145 : index
    %c0_180 = arith.constant 0 : index
    %147 = vector.load %arg12[%c145_179, %c0_180] : memref<242x128xf32, #tpu.memory_space<vmem>>, vector<8x128xf32>
    %c156_181 = arith.constant 156 : index
    %c0_182 = arith.constant 0 : index
    %148 = vector.load %arg12[%c156_181, %c0_182] : memref<242x128xf32, #tpu.memory_space<vmem>>, vector<8x128xf32>
    %c167_183 = arith.constant 167 : index
    %c0_184 = arith.constant 0 : index
    %149 = vector.load %arg12[%c167_183, %c0_184] : memref<242x128xf32, #tpu.memory_space<vmem>>, vector<8x128xf32>
    %c178_185 = arith.constant 178 : index
    %c0_186 = arith.constant 0 : index
    %150 = vector.load %arg12[%c178_185, %c0_186] : memref<242x128xf32, #tpu.memory_space<vmem>>, vector<8x128xf32>
    %c189_187 = arith.constant 189 : index
    %c0_188 = arith.constant 0 : index
    %151 = vector.load %arg12[%c189_187, %c0_188] : memref<242x128xf32, #tpu.memory_space<vmem>>, vector<8x128xf32>
    %c200_189 = arith.constant 200 : index
    %c0_190 = arith.constant 0 : index
    %152 = vector.load %arg12[%c200_189, %c0_190] : memref<242x128xf32, #tpu.memory_space<vmem>>, vector<8x128xf32>
    %c211 = arith.constant 211 : index
    %c0_191 = arith.constant 0 : index
    %153 = vector.load %arg12[%c211, %c0_191] : memref<242x128xf32, #tpu.memory_space<vmem>>, vector<8x128xf32>
    %154 = tpu.concatenate %138, %139, %140, %141, %142, %143, %144, %145, %146, %147, %148, %149, %150, %151, %152, %153 in 0 : vector<8x128xf32>, vector<8x128xf32>, vector<8x128xf32>, vector<8x128xf32>, vector<8x128xf32>, vector<8x128xf32>, vector<8x128xf32>, vector<8x128xf32>, vector<8x128xf32>, vector<8x128xf32>, vector<8x128xf32>, vector<8x128xf32>, vector<8x128xf32>, vector<8x128xf32>, vector<8x128xf32>, vector<8x128xf32> -> vector<128x128xf32>
    %155 = vector.extract_strided_slice %154 {offsets = [0, 0], sizes = [128, 8], strides = [1, 1]} : vector<128x128xf32> to vector<128x8xf32>
    %c14_192 = arith.constant 14 : index
    %c0_193 = arith.constant 0 : index
    %156 = vector.load %arg12[%c14_192, %c0_193] : memref<242x128xf32, #tpu.memory_space<vmem>>, vector<8x128xf32>
    %c25_194 = arith.constant 25 : index
    %c0_195 = arith.constant 0 : index
    %157 = vector.load %arg12[%c25_194, %c0_195] : memref<242x128xf32, #tpu.memory_space<vmem>>, vector<8x128xf32>
    %c36_196 = arith.constant 36 : index
    %c0_197 = arith.constant 0 : index
    %158 = vector.load %arg12[%c36_196, %c0_197] : memref<242x128xf32, #tpu.memory_space<vmem>>, vector<8x128xf32>
    %c47_198 = arith.constant 47 : index
    %c0_199 = arith.constant 0 : index
    %159 = vector.load %arg12[%c47_198, %c0_199] : memref<242x128xf32, #tpu.memory_space<vmem>>, vector<8x128xf32>
    %c58_200 = arith.constant 58 : index
    %c0_201 = arith.constant 0 : index
    %160 = vector.load %arg12[%c58_200, %c0_201] : memref<242x128xf32, #tpu.memory_space<vmem>>, vector<8x128xf32>
    %c69_202 = arith.constant 69 : index
    %c0_203 = arith.constant 0 : index
    %161 = vector.load %arg12[%c69_202, %c0_203] : memref<242x128xf32, #tpu.memory_space<vmem>>, vector<8x128xf32>
    %c80_204 = arith.constant 80 : index
    %c0_205 = arith.constant 0 : index
    %162 = vector.load %arg12[%c80_204, %c0_205] : memref<242x128xf32, #tpu.memory_space<vmem>>, vector<8x128xf32>
    %c91 = arith.constant 91 : index
    %c0_206 = arith.constant 0 : index
    %163 = vector.load %arg12[%c91, %c0_206] : memref<242x128xf32, #tpu.memory_space<vmem>>, vector<8x128xf32>
    %c135_207 = arith.constant 135 : index
    %c0_208 = arith.constant 0 : index
    %164 = vector.load %arg12[%c135_207, %c0_208] : memref<242x128xf32, #tpu.memory_space<vmem>>, vector<8x128xf32>
    %c146_209 = arith.constant 146 : index
    %c0_210 = arith.constant 0 : index
    %165 = vector.load %arg12[%c146_209, %c0_210] : memref<242x128xf32, #tpu.memory_space<vmem>>, vector<8x128xf32>
    %c157_211 = arith.constant 157 : index
    %c0_212 = arith.constant 0 : index
    %166 = vector.load %arg12[%c157_211, %c0_212] : memref<242x128xf32, #tpu.memory_space<vmem>>, vector<8x128xf32>
    %c168_213 = arith.constant 168 : index
    %c0_214 = arith.constant 0 : index
    %167 = vector.load %arg12[%c168_213, %c0_214] : memref<242x128xf32, #tpu.memory_space<vmem>>, vector<8x128xf32>
    %c179_215 = arith.constant 179 : index
    %c0_216 = arith.constant 0 : index
    %168 = vector.load %arg12[%c179_215, %c0_216] : memref<242x128xf32, #tpu.memory_space<vmem>>, vector<8x128xf32>
    %c190_217 = arith.constant 190 : index
    %c0_218 = arith.constant 0 : index
    %169 = vector.load %arg12[%c190_217, %c0_218] : memref<242x128xf32, #tpu.memory_space<vmem>>, vector<8x128xf32>
    %c201_219 = arith.constant 201 : index
    %c0_220 = arith.constant 0 : index
    %170 = vector.load %arg12[%c201_219, %c0_220] : memref<242x128xf32, #tpu.memory_space<vmem>>, vector<8x128xf32>
    %c212 = arith.constant 212 : index
    %c0_221 = arith.constant 0 : index
    %171 = vector.load %arg12[%c212, %c0_221] : memref<242x128xf32, #tpu.memory_space<vmem>>, vector<8x128xf32>
    %172 = tpu.concatenate %156, %157, %158, %159, %160, %161, %162, %163, %164, %165, %166, %167, %168, %169, %170, %171 in 0 : vector<8x128xf32>, vector<8x128xf32>, vector<8x128xf32>, vector<8x128xf32>, vector<8x128xf32>, vector<8x128xf32>, vector<8x128xf32>, vector<8x128xf32>, vector<8x128xf32>, vector<8x128xf32>, vector<8x128xf32>, vector<8x128xf32>, vector<8x128xf32>, vector<8x128xf32>, vector<8x128xf32>, vector<8x128xf32> -> vector<128x128xf32>
    %173 = vector.extract_strided_slice %172 {offsets = [0, 0], sizes = [128, 8], strides = [1, 1]} : vector<128x128xf32> to vector<128x8xf32>
    %c22_222 = arith.constant 22 : index
    %c0_223 = arith.constant 0 : index
    %174 = vector.load %arg12[%c22_222, %c0_223] : memref<242x128xf32, #tpu.memory_space<vmem>>, vector<8x128xf32>
    %c33_224 = arith.constant 33 : index
    %c0_225 = arith.constant 0 : index
    %175 = vector.load %arg12[%c33_224, %c0_225] : memref<242x128xf32, #tpu.memory_space<vmem>>, vector<8x128xf32>
    %c44_226 = arith.constant 44 : index
    %c0_227 = arith.constant 0 : index
    %176 = vector.load %arg12[%c44_226, %c0_227] : memref<242x128xf32, #tpu.memory_space<vmem>>, vector<8x128xf32>
    %c55_228 = arith.constant 55 : index
    %c0_229 = arith.constant 0 : index
    %177 = vector.load %arg12[%c55_228, %c0_229] : memref<242x128xf32, #tpu.memory_space<vmem>>, vector<8x128xf32>
    %c66_230 = arith.constant 66 : index
    %c0_231 = arith.constant 0 : index
    %178 = vector.load %arg12[%c66_230, %c0_231] : memref<242x128xf32, #tpu.memory_space<vmem>>, vector<8x128xf32>
    %c77_232 = arith.constant 77 : index
    %c0_233 = arith.constant 0 : index
    %179 = vector.load %arg12[%c77_232, %c0_233] : memref<242x128xf32, #tpu.memory_space<vmem>>, vector<8x128xf32>
    %c88_234 = arith.constant 88 : index
    %c0_235 = arith.constant 0 : index
    %180 = vector.load %arg12[%c88_234, %c0_235] : memref<242x128xf32, #tpu.memory_space<vmem>>, vector<8x128xf32>
    %c99 = arith.constant 99 : index
    %c0_236 = arith.constant 0 : index
    %181 = vector.load %arg12[%c99, %c0_236] : memref<242x128xf32, #tpu.memory_space<vmem>>, vector<8x128xf32>
    %c143_237 = arith.constant 143 : index
    %c0_238 = arith.constant 0 : index
    %182 = vector.load %arg12[%c143_237, %c0_238] : memref<242x128xf32, #tpu.memory_space<vmem>>, vector<8x128xf32>
    %c154_239 = arith.constant 154 : index
    %c0_240 = arith.constant 0 : index
    %183 = vector.load %arg12[%c154_239, %c0_240] : memref<242x128xf32, #tpu.memory_space<vmem>>, vector<8x128xf32>
    %c165_241 = arith.constant 165 : index
    %c0_242 = arith.constant 0 : index
    %184 = vector.load %arg12[%c165_241, %c0_242] : memref<242x128xf32, #tpu.memory_space<vmem>>, vector<8x128xf32>
    %c176_243 = arith.constant 176 : index
    %c0_244 = arith.constant 0 : index
    %185 = vector.load %arg12[%c176_243, %c0_244] : memref<242x128xf32, #tpu.memory_space<vmem>>, vector<8x128xf32>
    %c187_245 = arith.constant 187 : index
    %c0_246 = arith.constant 0 : index
    %186 = vector.load %arg12[%c187_245, %c0_246] : memref<242x128xf32, #tpu.memory_space<vmem>>, vector<8x128xf32>
    %c198_247 = arith.constant 198 : index
    %c0_248 = arith.constant 0 : index
    %187 = vector.load %arg12[%c198_247, %c0_248] : memref<242x128xf32, #tpu.memory_space<vmem>>, vector<8x128xf32>
    %c209_249 = arith.constant 209 : index
    %c0_250 = arith.constant 0 : index
    %188 = vector.load %arg12[%c209_249, %c0_250] : memref<242x128xf32, #tpu.memory_space<vmem>>, vector<8x128xf32>
    %c220 = arith.constant 220 : index
    %c0_251 = arith.constant 0 : index
    %189 = vector.load %arg12[%c220, %c0_251] : memref<242x128xf32, #tpu.memory_space<vmem>>, vector<8x128xf32>
    %190 = tpu.concatenate %174, %175, %176, %177, %178, %179, %180, %181, %182, %183, %184, %185, %186, %187, %188, %189 in 0 : vector<8x128xf32>, vector<8x128xf32>, vector<8x128xf32>, vector<8x128xf32>, vector<8x128xf32>, vector<8x128xf32>, vector<8x128xf32>, vector<8x128xf32>, vector<8x128xf32>, vector<8x128xf32>, vector<8x128xf32>, vector<8x128xf32>, vector<8x128xf32>, vector<8x128xf32>, vector<8x128xf32>, vector<8x128xf32> -> vector<128x128xf32>
    %191 = vector.extract_strided_slice %190 {offsets = [0, 0], sizes = [128, 8], strides = [1, 1]} : vector<128x128xf32> to vector<128x8xf32>
    %c23_252 = arith.constant 23 : index
    %c0_253 = arith.constant 0 : index
    %192 = vector.load %arg12[%c23_252, %c0_253] : memref<242x128xf32, #tpu.memory_space<vmem>>, vector<8x128xf32>
    %c34_254 = arith.constant 34 : index
    %c0_255 = arith.constant 0 : index
    %193 = vector.load %arg12[%c34_254, %c0_255] : memref<242x128xf32, #tpu.memory_space<vmem>>, vector<8x128xf32>
    %c45_256 = arith.constant 45 : index
    %c0_257 = arith.constant 0 : index
    %194 = vector.load %arg12[%c45_256, %c0_257] : memref<242x128xf32, #tpu.memory_space<vmem>>, vector<8x128xf32>
    %c56_258 = arith.constant 56 : index
    %c0_259 = arith.constant 0 : index
    %195 = vector.load %arg12[%c56_258, %c0_259] : memref<242x128xf32, #tpu.memory_space<vmem>>, vector<8x128xf32>
    %c67_260 = arith.constant 67 : index
    %c0_261 = arith.constant 0 : index
    %196 = vector.load %arg12[%c67_260, %c0_261] : memref<242x128xf32, #tpu.memory_space<vmem>>, vector<8x128xf32>
    %c78_262 = arith.constant 78 : index
    %c0_263 = arith.constant 0 : index
    %197 = vector.load %arg12[%c78_262, %c0_263] : memref<242x128xf32, #tpu.memory_space<vmem>>, vector<8x128xf32>
    %c89_264 = arith.constant 89 : index
    %c0_265 = arith.constant 0 : index
    %198 = vector.load %arg12[%c89_264, %c0_265] : memref<242x128xf32, #tpu.memory_space<vmem>>, vector<8x128xf32>
    %c100 = arith.constant 100 : index
    %c0_266 = arith.constant 0 : index
    %199 = vector.load %arg12[%c100, %c0_266] : memref<242x128xf32, #tpu.memory_space<vmem>>, vector<8x128xf32>
    %c144_267 = arith.constant 144 : index
    %c0_268 = arith.constant 0 : index
    %200 = vector.load %arg12[%c144_267, %c0_268] : memref<242x128xf32, #tpu.memory_space<vmem>>, vector<8x128xf32>
    %c155_269 = arith.constant 155 : index
    %c0_270 = arith.constant 0 : index
    %201 = vector.load %arg12[%c155_269, %c0_270] : memref<242x128xf32, #tpu.memory_space<vmem>>, vector<8x128xf32>
    %c166_271 = arith.constant 166 : index
    %c0_272 = arith.constant 0 : index
    %202 = vector.load %arg12[%c166_271, %c0_272] : memref<242x128xf32, #tpu.memory_space<vmem>>, vector<8x128xf32>
    %c177_273 = arith.constant 177 : index
    %c0_274 = arith.constant 0 : index
    %203 = vector.load %arg12[%c177_273, %c0_274] : memref<242x128xf32, #tpu.memory_space<vmem>>, vector<8x128xf32>
    %c188_275 = arith.constant 188 : index
    %c0_276 = arith.constant 0 : index
    %204 = vector.load %arg12[%c188_275, %c0_276] : memref<242x128xf32, #tpu.memory_space<vmem>>, vector<8x128xf32>
    %c199_277 = arith.constant 199 : index
    %c0_278 = arith.constant 0 : index
    %205 = vector.load %arg12[%c199_277, %c0_278] : memref<242x128xf32, #tpu.memory_space<vmem>>, vector<8x128xf32>
    %c210_279 = arith.constant 210 : index
    %c0_280 = arith.constant 0 : index
    %206 = vector.load %arg12[%c210_279, %c0_280] : memref<242x128xf32, #tpu.memory_space<vmem>>, vector<8x128xf32>
    %c221 = arith.constant 221 : index
    %c0_281 = arith.constant 0 : index
    %207 = vector.load %arg12[%c221, %c0_281] : memref<242x128xf32, #tpu.memory_space<vmem>>, vector<8x128xf32>
    %208 = tpu.concatenate %192, %193, %194, %195, %196, %197, %198, %199, %200, %201, %202, %203, %204, %205, %206, %207 in 0 : vector<8x128xf32>, vector<8x128xf32>, vector<8x128xf32>, vector<8x128xf32>, vector<8x128xf32>, vector<8x128xf32>, vector<8x128xf32>, vector<8x128xf32>, vector<8x128xf32>, vector<8x128xf32>, vector<8x128xf32>, vector<8x128xf32>, vector<8x128xf32>, vector<8x128xf32>, vector<8x128xf32>, vector<8x128xf32> -> vector<128x128xf32>
    %209 = vector.extract_strided_slice %208 {offsets = [0, 0], sizes = [128, 8], strides = [1, 1]} : vector<128x128xf32> to vector<128x8xf32>
    %c24_282 = arith.constant 24 : index
    %c0_283 = arith.constant 0 : index
    %210 = vector.load %arg12[%c24_282, %c0_283] : memref<242x128xf32, #tpu.memory_space<vmem>>, vector<8x128xf32>
    %c35_284 = arith.constant 35 : index
    %c0_285 = arith.constant 0 : index
    %211 = vector.load %arg12[%c35_284, %c0_285] : memref<242x128xf32, #tpu.memory_space<vmem>>, vector<8x128xf32>
    %c46_286 = arith.constant 46 : index
    %c0_287 = arith.constant 0 : index
    %212 = vector.load %arg12[%c46_286, %c0_287] : memref<242x128xf32, #tpu.memory_space<vmem>>, vector<8x128xf32>
    %c57_288 = arith.constant 57 : index
    %c0_289 = arith.constant 0 : index
    %213 = vector.load %arg12[%c57_288, %c0_289] : memref<242x128xf32, #tpu.memory_space<vmem>>, vector<8x128xf32>
    %c68_290 = arith.constant 68 : index
    %c0_291 = arith.constant 0 : index
    %214 = vector.load %arg12[%c68_290, %c0_291] : memref<242x128xf32, #tpu.memory_space<vmem>>, vector<8x128xf32>
    %c79_292 = arith.constant 79 : index
    %c0_293 = arith.constant 0 : index
    %215 = vector.load %arg12[%c79_292, %c0_293] : memref<242x128xf32, #tpu.memory_space<vmem>>, vector<8x128xf32>
    %c90_294 = arith.constant 90 : index
    %c0_295 = arith.constant 0 : index
    %216 = vector.load %arg12[%c90_294, %c0_295] : memref<242x128xf32, #tpu.memory_space<vmem>>, vector<8x128xf32>
    %c101 = arith.constant 101 : index
    %c0_296 = arith.constant 0 : index
    %217 = vector.load %arg12[%c101, %c0_296] : memref<242x128xf32, #tpu.memory_space<vmem>>, vector<8x128xf32>
    %c145_297 = arith.constant 145 : index
    %c0_298 = arith.constant 0 : index
    %218 = vector.load %arg12[%c145_297, %c0_298] : memref<242x128xf32, #tpu.memory_space<vmem>>, vector<8x128xf32>
    %c156_299 = arith.constant 156 : index
    %c0_300 = arith.constant 0 : index
    %219 = vector.load %arg12[%c156_299, %c0_300] : memref<242x128xf32, #tpu.memory_space<vmem>>, vector<8x128xf32>
    %c167_301 = arith.constant 167 : index
    %c0_302 = arith.constant 0 : index
    %220 = vector.load %arg12[%c167_301, %c0_302] : memref<242x128xf32, #tpu.memory_space<vmem>>, vector<8x128xf32>
    %c178_303 = arith.constant 178 : index
    %c0_304 = arith.constant 0 : index
    %221 = vector.load %arg12[%c178_303, %c0_304] : memref<242x128xf32, #tpu.memory_space<vmem>>, vector<8x128xf32>
    %c189_305 = arith.constant 189 : index
    %c0_306 = arith.constant 0 : index
    %222 = vector.load %arg12[%c189_305, %c0_306] : memref<242x128xf32, #tpu.memory_space<vmem>>, vector<8x128xf32>
    %c200_307 = arith.constant 200 : index
    %c0_308 = arith.constant 0 : index
    %223 = vector.load %arg12[%c200_307, %c0_308] : memref<242x128xf32, #tpu.memory_space<vmem>>, vector<8x128xf32>
    %c211_309 = arith.constant 211 : index
    %c0_310 = arith.constant 0 : index
    %224 = vector.load %arg12[%c211_309, %c0_310] : memref<242x128xf32, #tpu.memory_space<vmem>>, vector<8x128xf32>
    %c222 = arith.constant 222 : index
    %c0_311 = arith.constant 0 : index
    %225 = vector.load %arg12[%c222, %c0_311] : memref<242x128xf32, #tpu.memory_space<vmem>>, vector<8x128xf32>
    %226 = tpu.concatenate %210, %211, %212, %213, %214, %215, %216, %217, %218, %219, %220, %221, %222, %223, %224, %225 in 0 : vector<8x128xf32>, vector<8x128xf32>, vector<8x128xf32>, vector<8x128xf32>, vector<8x128xf32>, vector<8x128xf32>, vector<8x128xf32>, vector<8x128xf32>, vector<8x128xf32>, vector<8x128xf32>, vector<8x128xf32>, vector<8x128xf32>, vector<8x128xf32>, vector<8x128xf32>, vector<8x128xf32>, vector<8x128xf32> -> vector<128x128xf32>
    %227 = vector.extract_strided_slice %226 {offsets = [0, 0], sizes = [128, 8], strides = [1, 1]} : vector<128x128xf32> to vector<128x8xf32>
    %c25_312 = arith.constant 25 : index
    %c0_313 = arith.constant 0 : index
    %228 = vector.load %arg12[%c25_312, %c0_313] : memref<242x128xf32, #tpu.memory_space<vmem>>, vector<8x128xf32>
    %c36_314 = arith.constant 36 : index
    %c0_315 = arith.constant 0 : index
    %229 = vector.load %arg12[%c36_314, %c0_315] : memref<242x128xf32, #tpu.memory_space<vmem>>, vector<8x128xf32>
    %c47_316 = arith.constant 47 : index
    %c0_317 = arith.constant 0 : index
    %230 = vector.load %arg12[%c47_316, %c0_317] : memref<242x128xf32, #tpu.memory_space<vmem>>, vector<8x128xf32>
    %c58_318 = arith.constant 58 : index
    %c0_319 = arith.constant 0 : index
    %231 = vector.load %arg12[%c58_318, %c0_319] : memref<242x128xf32, #tpu.memory_space<vmem>>, vector<8x128xf32>
    %c69_320 = arith.constant 69 : index
    %c0_321 = arith.constant 0 : index
    %232 = vector.load %arg12[%c69_320, %c0_321] : memref<242x128xf32, #tpu.memory_space<vmem>>, vector<8x128xf32>
    %c80_322 = arith.constant 80 : index
    %c0_323 = arith.constant 0 : index
    %233 = vector.load %arg12[%c80_322, %c0_323] : memref<242x128xf32, #tpu.memory_space<vmem>>, vector<8x128xf32>
    %c91_324 = arith.constant 91 : index
    %c0_325 = arith.constant 0 : index
    %234 = vector.load %arg12[%c91_324, %c0_325] : memref<242x128xf32, #tpu.memory_space<vmem>>, vector<8x128xf32>
    %c102 = arith.constant 102 : index
    %c0_326 = arith.constant 0 : index
    %235 = vector.load %arg12[%c102, %c0_326] : memref<242x128xf32, #tpu.memory_space<vmem>>, vector<8x128xf32>
    %c146_327 = arith.constant 146 : index
    %c0_328 = arith.constant 0 : index
    %236 = vector.load %arg12[%c146_327, %c0_328] : memref<242x128xf32, #tpu.memory_space<vmem>>, vector<8x128xf32>
    %c157_329 = arith.constant 157 : index
    %c0_330 = arith.constant 0 : index
    %237 = vector.load %arg12[%c157_329, %c0_330] : memref<242x128xf32, #tpu.memory_space<vmem>>, vector<8x128xf32>
    %c168_331 = arith.constant 168 : index
    %c0_332 = arith.constant 0 : index
    %238 = vector.load %arg12[%c168_331, %c0_332] : memref<242x128xf32, #tpu.memory_space<vmem>>, vector<8x128xf32>
    %c179_333 = arith.constant 179 : index
    %c0_334 = arith.constant 0 : index
    %239 = vector.load %arg12[%c179_333, %c0_334] : memref<242x128xf32, #tpu.memory_space<vmem>>, vector<8x128xf32>
    %c190_335 = arith.constant 190 : index
    %c0_336 = arith.constant 0 : index
    %240 = vector.load %arg12[%c190_335, %c0_336] : memref<242x128xf32, #tpu.memory_space<vmem>>, vector<8x128xf32>
    %c201_337 = arith.constant 201 : index
    %c0_338 = arith.constant 0 : index
    %241 = vector.load %arg12[%c201_337, %c0_338] : memref<242x128xf32, #tpu.memory_space<vmem>>, vector<8x128xf32>
    %c212_339 = arith.constant 212 : index
    %c0_340 = arith.constant 0 : index
    %242 = vector.load %arg12[%c212_339, %c0_340] : memref<242x128xf32, #tpu.memory_space<vmem>>, vector<8x128xf32>
    %c223 = arith.constant 223 : index
    %c0_341 = arith.constant 0 : index
    %243 = vector.load %arg12[%c223, %c0_341] : memref<242x128xf32, #tpu.memory_space<vmem>>, vector<8x128xf32>
    %244 = tpu.concatenate %228, %229, %230, %231, %232, %233, %234, %235, %236, %237, %238, %239, %240, %241, %242, %243 in 0 : vector<8x128xf32>, vector<8x128xf32>, vector<8x128xf32>, vector<8x128xf32>, vector<8x128xf32>, vector<8x128xf32>, vector<8x128xf32>, vector<8x128xf32>, vector<8x128xf32>, vector<8x128xf32>, vector<8x128xf32>, vector<8x128xf32>, vector<8x128xf32>, vector<8x128xf32>, vector<8x128xf32>, vector<8x128xf32> -> vector<128x128xf32>
    %245 = vector.extract_strided_slice %244 {offsets = [0, 0], sizes = [128, 8], strides = [1, 1]} : vector<128x128xf32> to vector<128x8xf32>
    %c33_342 = arith.constant 33 : index
    %c0_343 = arith.constant 0 : index
    %246 = vector.load %arg12[%c33_342, %c0_343] : memref<242x128xf32, #tpu.memory_space<vmem>>, vector<8x128xf32>
    %c44_344 = arith.constant 44 : index
    %c0_345 = arith.constant 0 : index
    %247 = vector.load %arg12[%c44_344, %c0_345] : memref<242x128xf32, #tpu.memory_space<vmem>>, vector<8x128xf32>
    %c55_346 = arith.constant 55 : index
    %c0_347 = arith.constant 0 : index
    %248 = vector.load %arg12[%c55_346, %c0_347] : memref<242x128xf32, #tpu.memory_space<vmem>>, vector<8x128xf32>
    %c66_348 = arith.constant 66 : index
    %c0_349 = arith.constant 0 : index
    %249 = vector.load %arg12[%c66_348, %c0_349] : memref<242x128xf32, #tpu.memory_space<vmem>>, vector<8x128xf32>
    %c77_350 = arith.constant 77 : index
    %c0_351 = arith.constant 0 : index
    %250 = vector.load %arg12[%c77_350, %c0_351] : memref<242x128xf32, #tpu.memory_space<vmem>>, vector<8x128xf32>
    %c88_352 = arith.constant 88 : index
    %c0_353 = arith.constant 0 : index
    %251 = vector.load %arg12[%c88_352, %c0_353] : memref<242x128xf32, #tpu.memory_space<vmem>>, vector<8x128xf32>
    %c99_354 = arith.constant 99 : index
    %c0_355 = arith.constant 0 : index
    %252 = vector.load %arg12[%c99_354, %c0_355] : memref<242x128xf32, #tpu.memory_space<vmem>>, vector<8x128xf32>
    %c110 = arith.constant 110 : index
    %c0_356 = arith.constant 0 : index
    %253 = vector.load %arg12[%c110, %c0_356] : memref<242x128xf32, #tpu.memory_space<vmem>>, vector<8x128xf32>
    %c154_357 = arith.constant 154 : index
    %c0_358 = arith.constant 0 : index
    %254 = vector.load %arg12[%c154_357, %c0_358] : memref<242x128xf32, #tpu.memory_space<vmem>>, vector<8x128xf32>
    %c165_359 = arith.constant 165 : index
    %c0_360 = arith.constant 0 : index
    %255 = vector.load %arg12[%c165_359, %c0_360] : memref<242x128xf32, #tpu.memory_space<vmem>>, vector<8x128xf32>
    %c176_361 = arith.constant 176 : index
    %c0_362 = arith.constant 0 : index
    %256 = vector.load %arg12[%c176_361, %c0_362] : memref<242x128xf32, #tpu.memory_space<vmem>>, vector<8x128xf32>
    %c187_363 = arith.constant 187 : index
    %c0_364 = arith.constant 0 : index
    %257 = vector.load %arg12[%c187_363, %c0_364] : memref<242x128xf32, #tpu.memory_space<vmem>>, vector<8x128xf32>
    %c198_365 = arith.constant 198 : index
    %c0_366 = arith.constant 0 : index
    %258 = vector.load %arg12[%c198_365, %c0_366] : memref<242x128xf32, #tpu.memory_space<vmem>>, vector<8x128xf32>
    %c209_367 = arith.constant 209 : index
    %c0_368 = arith.constant 0 : index
    %259 = vector.load %arg12[%c209_367, %c0_368] : memref<242x128xf32, #tpu.memory_space<vmem>>, vector<8x128xf32>
    %c220_369 = arith.constant 220 : index
    %c0_370 = arith.constant 0 : index
    %260 = vector.load %arg12[%c220_369, %c0_370] : memref<242x128xf32, #tpu.memory_space<vmem>>, vector<8x128xf32>
    %c231 = arith.constant 231 : index
    %c0_371 = arith.constant 0 : index
    %261 = vector.load %arg12[%c231, %c0_371] : memref<242x128xf32, #tpu.memory_space<vmem>>, vector<8x128xf32>
    %262 = tpu.concatenate %246, %247, %248, %249, %250, %251, %252, %253, %254, %255, %256, %257, %258, %259, %260, %261 in 0 : vector<8x128xf32>, vector<8x128xf32>, vector<8x128xf32>, vector<8x128xf32>, vector<8x128xf32>, vector<8x128xf32>, vector<8x128xf32>, vector<8x128xf32>, vector<8x128xf32>, vector<8x128xf32>, vector<8x128xf32>, vector<8x128xf32>, vector<8x128xf32>, vector<8x128xf32>, vector<8x128xf32>, vector<8x128xf32> -> vector<128x128xf32>
    %263 = vector.extract_strided_slice %262 {offsets = [0, 0], sizes = [128, 8], strides = [1, 1]} : vector<128x128xf32> to vector<128x8xf32>
    %c34_372 = arith.constant 34 : index
    %c0_373 = arith.constant 0 : index
    %264 = vector.load %arg12[%c34_372, %c0_373] : memref<242x128xf32, #tpu.memory_space<vmem>>, vector<8x128xf32>
    %c45_374 = arith.constant 45 : index
    %c0_375 = arith.constant 0 : index
    %265 = vector.load %arg12[%c45_374, %c0_375] : memref<242x128xf32, #tpu.memory_space<vmem>>, vector<8x128xf32>
    %c56_376 = arith.constant 56 : index
    %c0_377 = arith.constant 0 : index
    %266 = vector.load %arg12[%c56_376, %c0_377] : memref<242x128xf32, #tpu.memory_space<vmem>>, vector<8x128xf32>
    %c67_378 = arith.constant 67 : index
    %c0_379 = arith.constant 0 : index
    %267 = vector.load %arg12[%c67_378, %c0_379] : memref<242x128xf32, #tpu.memory_space<vmem>>, vector<8x128xf32>
    %c78_380 = arith.constant 78 : index
    %c0_381 = arith.constant 0 : index
    %268 = vector.load %arg12[%c78_380, %c0_381] : memref<242x128xf32, #tpu.memory_space<vmem>>, vector<8x128xf32>
    %c89_382 = arith.constant 89 : index
    %c0_383 = arith.constant 0 : index
    %269 = vector.load %arg12[%c89_382, %c0_383] : memref<242x128xf32, #tpu.memory_space<vmem>>, vector<8x128xf32>
    %c100_384 = arith.constant 100 : index
    %c0_385 = arith.constant 0 : index
    %270 = vector.load %arg12[%c100_384, %c0_385] : memref<242x128xf32, #tpu.memory_space<vmem>>, vector<8x128xf32>
    %c111 = arith.constant 111 : index
    %c0_386 = arith.constant 0 : index
    %271 = vector.load %arg12[%c111, %c0_386] : memref<242x128xf32, #tpu.memory_space<vmem>>, vector<8x128xf32>
    %c155_387 = arith.constant 155 : index
    %c0_388 = arith.constant 0 : index
    %272 = vector.load %arg12[%c155_387, %c0_388] : memref<242x128xf32, #tpu.memory_space<vmem>>, vector<8x128xf32>
    %c166_389 = arith.constant 166 : index
    %c0_390 = arith.constant 0 : index
    %273 = vector.load %arg12[%c166_389, %c0_390] : memref<242x128xf32, #tpu.memory_space<vmem>>, vector<8x128xf32>
    %c177_391 = arith.constant 177 : index
    %c0_392 = arith.constant 0 : index
    %274 = vector.load %arg12[%c177_391, %c0_392] : memref<242x128xf32, #tpu.memory_space<vmem>>, vector<8x128xf32>
    %c188_393 = arith.constant 188 : index
    %c0_394 = arith.constant 0 : index
    %275 = vector.load %arg12[%c188_393, %c0_394] : memref<242x128xf32, #tpu.memory_space<vmem>>, vector<8x128xf32>
    %c199_395 = arith.constant 199 : index
    %c0_396 = arith.constant 0 : index
    %276 = vector.load %arg12[%c199_395, %c0_396] : memref<242x128xf32, #tpu.memory_space<vmem>>, vector<8x128xf32>
    %c210_397 = arith.constant 210 : index
    %c0_398 = arith.constant 0 : index
    %277 = vector.load %arg12[%c210_397, %c0_398] : memref<242x128xf32, #tpu.memory_space<vmem>>, vector<8x128xf32>
    %c221_399 = arith.constant 221 : index
    %c0_400 = arith.constant 0 : index
    %278 = vector.load %arg12[%c221_399, %c0_400] : memref<242x128xf32, #tpu.memory_space<vmem>>, vector<8x128xf32>
    %c232 = arith.constant 232 : index
    %c0_401 = arith.constant 0 : index
    %279 = vector.load %arg12[%c232, %c0_401] : memref<242x128xf32, #tpu.memory_space<vmem>>, vector<8x128xf32>
    %280 = tpu.concatenate %264, %265, %266, %267, %268, %269, %270, %271, %272, %273, %274, %275, %276, %277, %278, %279 in 0 : vector<8x128xf32>, vector<8x128xf32>, vector<8x128xf32>, vector<8x128xf32>, vector<8x128xf32>, vector<8x128xf32>, vector<8x128xf32>, vector<8x128xf32>, vector<8x128xf32>, vector<8x128xf32>, vector<8x128xf32>, vector<8x128xf32>, vector<8x128xf32>, vector<8x128xf32>, vector<8x128xf32>, vector<8x128xf32> -> vector<128x128xf32>
    %281 = vector.extract_strided_slice %280 {offsets = [0, 0], sizes = [128, 8], strides = [1, 1]} : vector<128x128xf32> to vector<128x8xf32>
    %c35_402 = arith.constant 35 : index
    %c0_403 = arith.constant 0 : index
    %282 = vector.load %arg12[%c35_402, %c0_403] : memref<242x128xf32, #tpu.memory_space<vmem>>, vector<8x128xf32>
    %c46_404 = arith.constant 46 : index
    %c0_405 = arith.constant 0 : index
    %283 = vector.load %arg12[%c46_404, %c0_405] : memref<242x128xf32, #tpu.memory_space<vmem>>, vector<8x128xf32>
    %c57_406 = arith.constant 57 : index
    %c0_407 = arith.constant 0 : index
    %284 = vector.load %arg12[%c57_406, %c0_407] : memref<242x128xf32, #tpu.memory_space<vmem>>, vector<8x128xf32>
    %c68_408 = arith.constant 68 : index
    %c0_409 = arith.constant 0 : index
    %285 = vector.load %arg12[%c68_408, %c0_409] : memref<242x128xf32, #tpu.memory_space<vmem>>, vector<8x128xf32>
    %c79_410 = arith.constant 79 : index
    %c0_411 = arith.constant 0 : index
    %286 = vector.load %arg12[%c79_410, %c0_411] : memref<242x128xf32, #tpu.memory_space<vmem>>, vector<8x128xf32>
    %c90_412 = arith.constant 90 : index
    %c0_413 = arith.constant 0 : index
    %287 = vector.load %arg12[%c90_412, %c0_413] : memref<242x128xf32, #tpu.memory_space<vmem>>, vector<8x128xf32>
    %c101_414 = arith.constant 101 : index
    %c0_415 = arith.constant 0 : index
    %288 = vector.load %arg12[%c101_414, %c0_415] : memref<242x128xf32, #tpu.memory_space<vmem>>, vector<8x128xf32>
    %c112 = arith.constant 112 : index
    %c0_416 = arith.constant 0 : index
    %289 = vector.load %arg12[%c112, %c0_416] : memref<242x128xf32, #tpu.memory_space<vmem>>, vector<8x128xf32>
    %c156_417 = arith.constant 156 : index
    %c0_418 = arith.constant 0 : index
    %290 = vector.load %arg12[%c156_417, %c0_418] : memref<242x128xf32, #tpu.memory_space<vmem>>, vector<8x128xf32>
    %c167_419 = arith.constant 167 : index
    %c0_420 = arith.constant 0 : index
    %291 = vector.load %arg12[%c167_419, %c0_420] : memref<242x128xf32, #tpu.memory_space<vmem>>, vector<8x128xf32>
    %c178_421 = arith.constant 178 : index
    %c0_422 = arith.constant 0 : index
    %292 = vector.load %arg12[%c178_421, %c0_422] : memref<242x128xf32, #tpu.memory_space<vmem>>, vector<8x128xf32>
    %c189_423 = arith.constant 189 : index
    %c0_424 = arith.constant 0 : index
    %293 = vector.load %arg12[%c189_423, %c0_424] : memref<242x128xf32, #tpu.memory_space<vmem>>, vector<8x128xf32>
    %c200_425 = arith.constant 200 : index
    %c0_426 = arith.constant 0 : index
    %294 = vector.load %arg12[%c200_425, %c0_426] : memref<242x128xf32, #tpu.memory_space<vmem>>, vector<8x128xf32>
    %c211_427 = arith.constant 211 : index
    %c0_428 = arith.constant 0 : index
    %295 = vector.load %arg12[%c211_427, %c0_428] : memref<242x128xf32, #tpu.memory_space<vmem>>, vector<8x128xf32>
    %c222_429 = arith.constant 222 : index
    %c0_430 = arith.constant 0 : index
    %296 = vector.load %arg12[%c222_429, %c0_430] : memref<242x128xf32, #tpu.memory_space<vmem>>, vector<8x128xf32>
    %c233 = arith.constant 233 : index
    %c0_431 = arith.constant 0 : index
    %297 = vector.load %arg12[%c233, %c0_431] : memref<242x128xf32, #tpu.memory_space<vmem>>, vector<8x128xf32>
    %298 = tpu.concatenate %282, %283, %284, %285, %286, %287, %288, %289, %290, %291, %292, %293, %294, %295, %296, %297 in 0 : vector<8x128xf32>, vector<8x128xf32>, vector<8x128xf32>, vector<8x128xf32>, vector<8x128xf32>, vector<8x128xf32>, vector<8x128xf32>, vector<8x128xf32>, vector<8x128xf32>, vector<8x128xf32>, vector<8x128xf32>, vector<8x128xf32>, vector<8x128xf32>, vector<8x128xf32>, vector<8x128xf32>, vector<8x128xf32> -> vector<128x128xf32>
    %299 = vector.extract_strided_slice %298 {offsets = [0, 0], sizes = [128, 8], strides = [1, 1]} : vector<128x128xf32> to vector<128x8xf32>
    %c36_432 = arith.constant 36 : index
    %c0_433 = arith.constant 0 : index
    %300 = vector.load %arg12[%c36_432, %c0_433] : memref<242x128xf32, #tpu.memory_space<vmem>>, vector<8x128xf32>
    %c47_434 = arith.constant 47 : index
    %c0_435 = arith.constant 0 : index
    %301 = vector.load %arg12[%c47_434, %c0_435] : memref<242x128xf32, #tpu.memory_space<vmem>>, vector<8x128xf32>
    %c58_436 = arith.constant 58 : index
    %c0_437 = arith.constant 0 : index
    %302 = vector.load %arg12[%c58_436, %c0_437] : memref<242x128xf32, #tpu.memory_space<vmem>>, vector<8x128xf32>
    %c69_438 = arith.constant 69 : index
    %c0_439 = arith.constant 0 : index
    %303 = vector.load %arg12[%c69_438, %c0_439] : memref<242x128xf32, #tpu.memory_space<vmem>>, vector<8x128xf32>
    %c80_440 = arith.constant 80 : index
    %c0_441 = arith.constant 0 : index
    %304 = vector.load %arg12[%c80_440, %c0_441] : memref<242x128xf32, #tpu.memory_space<vmem>>, vector<8x128xf32>
    %c91_442 = arith.constant 91 : index
    %c0_443 = arith.constant 0 : index
    %305 = vector.load %arg12[%c91_442, %c0_443] : memref<242x128xf32, #tpu.memory_space<vmem>>, vector<8x128xf32>
    %c102_444 = arith.constant 102 : index
    %c0_445 = arith.constant 0 : index
    %306 = vector.load %arg12[%c102_444, %c0_445] : memref<242x128xf32, #tpu.memory_space<vmem>>, vector<8x128xf32>
    %c113 = arith.constant 113 : index
    %c0_446 = arith.constant 0 : index
    %307 = vector.load %arg12[%c113, %c0_446] : memref<242x128xf32, #tpu.memory_space<vmem>>, vector<8x128xf32>
    %c157_447 = arith.constant 157 : index
    %c0_448 = arith.constant 0 : index
    %308 = vector.load %arg12[%c157_447, %c0_448] : memref<242x128xf32, #tpu.memory_space<vmem>>, vector<8x128xf32>
    %c168_449 = arith.constant 168 : index
    %c0_450 = arith.constant 0 : index
    %309 = vector.load %arg12[%c168_449, %c0_450] : memref<242x128xf32, #tpu.memory_space<vmem>>, vector<8x128xf32>
    %c179_451 = arith.constant 179 : index
    %c0_452 = arith.constant 0 : index
    %310 = vector.load %arg12[%c179_451, %c0_452] : memref<242x128xf32, #tpu.memory_space<vmem>>, vector<8x128xf32>
    %c190_453 = arith.constant 190 : index
    %c0_454 = arith.constant 0 : index
    %311 = vector.load %arg12[%c190_453, %c0_454] : memref<242x128xf32, #tpu.memory_space<vmem>>, vector<8x128xf32>
    %c201_455 = arith.constant 201 : index
    %c0_456 = arith.constant 0 : index
    %312 = vector.load %arg12[%c201_455, %c0_456] : memref<242x128xf32, #tpu.memory_space<vmem>>, vector<8x128xf32>
    %c212_457 = arith.constant 212 : index
    %c0_458 = arith.constant 0 : index
    %313 = vector.load %arg12[%c212_457, %c0_458] : memref<242x128xf32, #tpu.memory_space<vmem>>, vector<8x128xf32>
    %c223_459 = arith.constant 223 : index
    %c0_460 = arith.constant 0 : index
    %314 = vector.load %arg12[%c223_459, %c0_460] : memref<242x128xf32, #tpu.memory_space<vmem>>, vector<8x128xf32>
    %c234 = arith.constant 234 : index
    %c0_461 = arith.constant 0 : index
    %315 = vector.load %arg12[%c234, %c0_461] : memref<242x128xf32, #tpu.memory_space<vmem>>, vector<8x128xf32>
    %316 = tpu.concatenate %300, %301, %302, %303, %304, %305, %306, %307, %308, %309, %310, %311, %312, %313, %314, %315 in 0 : vector<8x128xf32>, vector<8x128xf32>, vector<8x128xf32>, vector<8x128xf32>, vector<8x128xf32>, vector<8x128xf32>, vector<8x128xf32>, vector<8x128xf32>, vector<8x128xf32>, vector<8x128xf32>, vector<8x128xf32>, vector<8x128xf32>, vector<8x128xf32>, vector<8x128xf32>, vector<8x128xf32>, vector<8x128xf32> -> vector<128x128xf32>
    %317 = vector.extract_strided_slice %316 {offsets = [0, 0], sizes = [128, 8], strides = [1, 1]} : vector<128x128xf32> to vector<128x8xf32>
    %318 = tpu.concatenate %47, %65, %83, %101, %119, %137, %155, %173, %191, %209, %227, %245, %263, %281, %299, %317 in 1 : vector<128x8xf32>, vector<128x8xf32>, vector<128x8xf32>, vector<128x8xf32>, vector<128x8xf32>, vector<128x8xf32>, vector<128x8xf32>, vector<128x8xf32>, vector<128x8xf32>, vector<128x8xf32>, vector<128x8xf32>, vector<128x8xf32>, vector<128x8xf32>, vector<128x8xf32>, vector<128x8xf32>, vector<128x8xf32> -> vector<128x128xf32>
    %c0_462 = arith.constant 0 : index
    %c0_463 = arith.constant 0 : index
    %319 = vector.load %arg3[%c0_462, %c0_463] : memref<128x128xf32, #tpu.memory_space<vmem>>, vector<128x128xf32>
    %cst_464 = arith.constant dense<0.000000e+00> : vector<128x128xf32>
    %320 = tpu.matmul %318, %319, %cst_464 {dimension_numbers = #tpu.dot_dimension_numbers<[1], [0], [0], [1], [0, 0, 1, 1], [], []>} : vector<128x128xf32>, vector<128x128xf32>, vector<128x128xf32> -> vector<128x128xf32>
    %c0_465 = arith.constant 0 : index
    %c0_466 = arith.constant 0 : index
    %321 = vector.load %arg4[%c0_465, %c0_466] : memref<1x128xf32, #tpu.memory_space<vmem>>, vector<1x128xf32>
    %322 = vector.broadcast %321 : vector<1x128xf32> to vector<128x128xf32>
    %323 = arith.addf %320, %322 : vector<128x128xf32>
    %cst_467 = arith.constant 0.000000e+00 : f32
    %324 = vector.broadcast %cst_467 : f32 to vector<128x128xf32>
    %325 = arith.maximumf %323, %324 : vector<128x128xf32>
    %c0_468 = arith.constant 0 : index
    %c0_469 = arith.constant 0 : index
    %326 = vector.load %arg13[%c0_468, %c0_469] : memref<128x128xf32, #tpu.memory_space<vmem>>, vector<128x128xf32>
    tpu.vector_store %arg13[%c0_468, %c0_469], %325 {strides = array<i32>} : memref<128x128xf32, #tpu.memory_space<vmem>>, vector<128x128xf32>,
    %c0_470 = arith.constant 0 : index
    %c0_471 = arith.constant 0 : index
    %327 = tpu.strided_load %arg13[%c0_470, %c0_471] {strides = array<i32: 2, 1>} : memref<128x128xf32, #tpu.memory_space<vmem>>, vector<4x128xf32>
    %c1_472 = arith.constant 1 : index
    %c0_473 = arith.constant 0 : index
    %328 = tpu.strided_load %arg13[%c1_472, %c0_473] {strides = array<i32: 2, 1>} : memref<128x128xf32, #tpu.memory_space<vmem>>, vector<4x128xf32>
    %c8 = arith.constant 8 : index
    %c0_474 = arith.constant 0 : index
    %329 = tpu.strided_load %arg13[%c8, %c0_474] {strides = array<i32: 2, 1>} : memref<128x128xf32, #tpu.memory_space<vmem>>, vector<4x128xf32>
    %c9 = arith.constant 9 : index
    %c0_475 = arith.constant 0 : index
    %330 = tpu.strided_load %arg13[%c9, %c0_475] {strides = array<i32: 2, 1>} : memref<128x128xf32, #tpu.memory_space<vmem>>, vector<4x128xf32>
    %331 = arith.maximumf %327, %328 : vector<4x128xf32>
    %332 = arith.maximumf %329, %330 : vector<4x128xf32>
    %333 = arith.maximumf %331, %332 : vector<4x128xf32>
    %c0_476 = arith.constant 0 : index
    %c0_477 = arith.constant 0 : index
    %334 = vector.load %arg14[%c0_476, %c0_477] : memref<32x128xf32, #tpu.memory_space<vmem>>, vector<4x128xf32>
    tpu.vector_store %arg14[%c0_476, %c0_477], %333 {strides = array<i32>} : memref<32x128xf32, #tpu.memory_space<vmem>>, vector<4x128xf32>,
    %c16 = arith.constant 16 : index
    %c0_478 = arith.constant 0 : index
    %335 = tpu.strided_load %arg13[%c16, %c0_478] {strides = array<i32: 2, 1>} : memref<128x128xf32, #tpu.memory_space<vmem>>, vector<4x128xf32>
    %c17 = arith.constant 17 : index
    %c0_479 = arith.constant 0 : index
    %336 = tpu.strided_load %arg13[%c17, %c0_479] {strides = array<i32: 2, 1>} : memref<128x128xf32, #tpu.memory_space<vmem>>, vector<4x128xf32>
    %c24_480 = arith.constant 24 : index
    %c0_481 = arith.constant 0 : index
    %337 = tpu.strided_load %arg13[%c24_480, %c0_481] {strides = array<i32: 2, 1>} : memref<128x128xf32, #tpu.memory_space<vmem>>, vector<4x128xf32>
    %c25_482 = arith.constant 25 : index
    %c0_483 = arith.constant 0 : index
    %338 = tpu.strided_load %arg13[%c25_482, %c0_483] {strides = array<i32: 2, 1>} : memref<128x128xf32, #tpu.memory_space<vmem>>, vector<4x128xf32>
    %339 = arith.maximumf %335, %336 : vector<4x128xf32>
    %340 = arith.maximumf %337, %338 : vector<4x128xf32>
    %341 = arith.maximumf %339, %340 : vector<4x128xf32>
    %c4 = arith.constant 4 : index
    %c0_484 = arith.constant 0 : index
    %342 = vector.load %arg14[%c4, %c0_484] : memref<32x128xf32, #tpu.memory_space<vmem>>, vector<4x128xf32>
    tpu.vector_store %arg14[%c4, %c0_484], %341 {strides = array<i32>} : memref<32x128xf32, #tpu.memory_space<vmem>>, vector<4x128xf32>,
    %c32 = arith.constant 32 : index
    %c0_485 = arith.constant 0 : index
    %343 = tpu.strided_load %arg13[%c32, %c0_485] {strides = array<i32: 2, 1>} : memref<128x128xf32, #tpu.memory_space<vmem>>, vector<4x128xf32>
    %c33_486 = arith.constant 33 : index
    %c0_487 = arith.constant 0 : index
    %344 = tpu.strided_load %arg13[%c33_486, %c0_487] {strides = array<i32: 2, 1>} : memref<128x128xf32, #tpu.memory_space<vmem>>, vector<4x128xf32>
    %c40 = arith.constant 40 : index
    %c0_488 = arith.constant 0 : index
    %345 = tpu.strided_load %arg13[%c40, %c0_488] {strides = array<i32: 2, 1>} : memref<128x128xf32, #tpu.memory_space<vmem>>, vector<4x128xf32>
    %c41 = arith.constant 41 : index
    %c0_489 = arith.constant 0 : index
    %346 = tpu.strided_load %arg13[%c41, %c0_489] {strides = array<i32: 2, 1>} : memref<128x128xf32, #tpu.memory_space<vmem>>, vector<4x128xf32>
    %347 = arith.maximumf %343, %344 : vector<4x128xf32>
    %348 = arith.maximumf %345, %346 : vector<4x128xf32>
    %349 = arith.maximumf %347, %348 : vector<4x128xf32>
    %c8_490 = arith.constant 8 : index
    %c0_491 = arith.constant 0 : index
    %350 = vector.load %arg14[%c8_490, %c0_491] : memref<32x128xf32, #tpu.memory_space<vmem>>, vector<4x128xf32>
    tpu.vector_store %arg14[%c8_490, %c0_491], %349 {strides = array<i32>} : memref<32x128xf32, #tpu.memory_space<vmem>>, vector<4x128xf32>,
    %c48 = arith.constant 48 : index
    %c0_492 = arith.constant 0 : index
    %351 = tpu.strided_load %arg13[%c48, %c0_492] {strides = array<i32: 2, 1>} : memref<128x128xf32, #tpu.memory_space<vmem>>, vector<4x128xf32>
    %c49 = arith.constant 49 : index
    %c0_493 = arith.constant 0 : index
    %352 = tpu.strided_load %arg13[%c49, %c0_493] {strides = array<i32: 2, 1>} : memref<128x128xf32, #tpu.memory_space<vmem>>, vector<4x128xf32>
    %c56_494 = arith.constant 56 : index
    %c0_495 = arith.constant 0 : index
    %353 = tpu.strided_load %arg13[%c56_494, %c0_495] {strides = array<i32: 2, 1>} : memref<128x128xf32, #tpu.memory_space<vmem>>, vector<4x128xf32>
    %c57_496 = arith.constant 57 : index
    %c0_497 = arith.constant 0 : index
    %354 = tpu.strided_load %arg13[%c57_496, %c0_497] {strides = array<i32: 2, 1>} : memref<128x128xf32, #tpu.memory_space<vmem>>, vector<4x128xf32>
    %355 = arith.maximumf %351, %352 : vector<4x128xf32>
    %356 = arith.maximumf %353, %354 : vector<4x128xf32>
    %357 = arith.maximumf %355, %356 : vector<4x128xf32>
    %c12_498 = arith.constant 12 : index
    %c0_499 = arith.constant 0 : index
    %358 = vector.load %arg14[%c12_498, %c0_499] : memref<32x128xf32, #tpu.memory_space<vmem>>, vector<4x128xf32>
    tpu.vector_store %arg14[%c12_498, %c0_499], %357 {strides = array<i32>} : memref<32x128xf32, #tpu.memory_space<vmem>>, vector<4x128xf32>,
    %c64 = arith.constant 64 : index
    %c0_500 = arith.constant 0 : index
    %359 = tpu.strided_load %arg13[%c64, %c0_500] {strides = array<i32: 2, 1>} : memref<128x128xf32, #tpu.memory_space<vmem>>, vector<4x128xf32>
    %c65 = arith.constant 65 : index
    %c0_501 = arith.constant 0 : index
    %360 = tpu.strided_load %arg13[%c65, %c0_501] {strides = array<i32: 2, 1>} : memref<128x128xf32, #tpu.memory_space<vmem>>, vector<4x128xf32>
    %c72 = arith.constant 72 : index
    %c0_502 = arith.constant 0 : index
    %361 = tpu.strided_load %arg13[%c72, %c0_502] {strides = array<i32: 2, 1>} : memref<128x128xf32, #tpu.memory_space<vmem>>, vector<4x128xf32>
    %c73 = arith.constant 73 : index
    %c0_503 = arith.constant 0 : index
    %362 = tpu.strided_load %arg13[%c73, %c0_503] {strides = array<i32: 2, 1>} : memref<128x128xf32, #tpu.memory_space<vmem>>, vector<4x128xf32>
    %363 = arith.maximumf %359, %360 : vector<4x128xf32>
    %364 = arith.maximumf %361, %362 : vector<4x128xf32>
    %365 = arith.maximumf %363, %364 : vector<4x128xf32>
    %c16_504 = arith.constant 16 : index
    %c0_505 = arith.constant 0 : index
    %366 = vector.load %arg14[%c16_504, %c0_505] : memref<32x128xf32, #tpu.memory_space<vmem>>, vector<4x128xf32>
    tpu.vector_store %arg14[%c16_504, %c0_505], %365 {strides = array<i32>} : memref<32x128xf32, #tpu.memory_space<vmem>>, vector<4x128xf32>,
    %c80_506 = arith.constant 80 : index
    %c0_507 = arith.constant 0 : index
    %367 = tpu.strided_load %arg13[%c80_506, %c0_507] {strides = array<i32: 2, 1>} : memref<128x128xf32, #tpu.memory_space<vmem>>, vector<4x128xf32>
    %c81 = arith.constant 81 : index
    %c0_508 = arith.constant 0 : index
    %368 = tpu.strided_load %arg13[%c81, %c0_508] {strides = array<i32: 2, 1>} : memref<128x128xf32, #tpu.memory_space<vmem>>, vector<4x128xf32>
    %c88_509 = arith.constant 88 : index
    %c0_510 = arith.constant 0 : index
    %369 = tpu.strided_load %arg13[%c88_509, %c0_510] {strides = array<i32: 2, 1>} : memref<128x128xf32, #tpu.memory_space<vmem>>, vector<4x128xf32>
    %c89_511 = arith.constant 89 : index
    %c0_512 = arith.constant 0 : index
    %370 = tpu.strided_load %arg13[%c89_511, %c0_512] {strides = array<i32: 2, 1>} : memref<128x128xf32, #tpu.memory_space<vmem>>, vector<4x128xf32>
    %371 = arith.maximumf %367, %368 : vector<4x128xf32>
    %372 = arith.maximumf %369, %370 : vector<4x128xf32>
    %373 = arith.maximumf %371, %372 : vector<4x128xf32>
    %c20 = arith.constant 20 : index
    %c0_513 = arith.constant 0 : index
    %374 = vector.load %arg14[%c20, %c0_513] : memref<32x128xf32, #tpu.memory_space<vmem>>, vector<4x128xf32>
    tpu.vector_store %arg14[%c20, %c0_513], %373 {strides = array<i32>} : memref<32x128xf32, #tpu.memory_space<vmem>>, vector<4x128xf32>,
    %c96 = arith.constant 96 : index
    %c0_514 = arith.constant 0 : index
    %375 = tpu.strided_load %arg13[%c96, %c0_514] {strides = array<i32: 2, 1>} : memref<128x128xf32, #tpu.memory_space<vmem>>, vector<4x128xf32>
    %c97 = arith.constant 97 : index
    %c0_515 = arith.constant 0 : index
    %376 = tpu.strided_load %arg13[%c97, %c0_515] {strides = array<i32: 2, 1>} : memref<128x128xf32, #tpu.memory_space<vmem>>, vector<4x128xf32>
    %c104 = arith.constant 104 : index
    %c0_516 = arith.constant 0 : index
    %377 = tpu.strided_load %arg13[%c104, %c0_516] {strides = array<i32: 2, 1>} : memref<128x128xf32, #tpu.memory_space<vmem>>, vector<4x128xf32>
    %c105 = arith.constant 105 : index
    %c0_517 = arith.constant 0 : index
    %378 = tpu.strided_load %arg13[%c105, %c0_517] {strides = array<i32: 2, 1>} : memref<128x128xf32, #tpu.memory_space<vmem>>, vector<4x128xf32>
    %379 = arith.maximumf %375, %376 : vector<4x128xf32>
    %380 = arith.maximumf %377, %378 : vector<4x128xf32>
    %381 = arith.maximumf %379, %380 : vector<4x128xf32>
    %c24_518 = arith.constant 24 : index
    %c0_519 = arith.constant 0 : index
    %382 = vector.load %arg14[%c24_518, %c0_519] : memref<32x128xf32, #tpu.memory_space<vmem>>, vector<4x128xf32>
    tpu.vector_store %arg14[%c24_518, %c0_519], %381 {strides = array<i32>} : memref<32x128xf32, #tpu.memory_space<vmem>>, vector<4x128xf32>,
    %c112_520 = arith.constant 112 : index
    %c0_521 = arith.constant 0 : index
    %383 = tpu.strided_load %arg13[%c112_520, %c0_521] {strides = array<i32: 2, 1>} : memref<128x128xf32, #tpu.memory_space<vmem>>, vector<4x128xf32>
    %c113_522 = arith.constant 113 : index
    %c0_523 = arith.constant 0 : index
    %384 = tpu.strided_load %arg13[%c113_522, %c0_523] {strides = array<i32: 2, 1>} : memref<128x128xf32, #tpu.memory_space<vmem>>, vector<4x128xf32>
    %c120 = arith.constant 120 : index
    %c0_524 = arith.constant 0 : index
    %385 = tpu.strided_load %arg13[%c120, %c0_524] {strides = array<i32: 2, 1>} : memref<128x128xf32, #tpu.memory_space<vmem>>, vector<4x128xf32>
    %c121_525 = arith.constant 121 : index
    %c0_526 = arith.constant 0 : index
    %386 = tpu.strided_load %arg13[%c121_525, %c0_526] {strides = array<i32: 2, 1>} : memref<128x128xf32, #tpu.memory_space<vmem>>, vector<4x128xf32>
    %387 = arith.maximumf %383, %384 : vector<4x128xf32>
    %388 = arith.maximumf %385, %386 : vector<4x128xf32>
    %389 = arith.maximumf %387, %388 : vector<4x128xf32>
    %c28 = arith.constant 28 : index
    %c0_527 = arith.constant 0 : index
    %390 = vector.load %arg14[%c28, %c0_527] : memref<32x128xf32, #tpu.memory_space<vmem>>, vector<4x128xf32>
    tpu.vector_store %arg14[%c28, %c0_527], %389 {strides = array<i32>} : memref<32x128xf32, #tpu.memory_space<vmem>>, vector<4x128xf32>,
    %c0_528 = arith.constant 0 : index
    %c0_529 = arith.constant 0 : index
    %391 = vector.load %arg14[%c0_528, %c0_529] : memref<32x128xf32, #tpu.memory_space<vmem>>, vector<1x128xf32>
    %c16_530 = arith.constant 16 : index
    %c0_531 = arith.constant 0 : index
    %392 = vector.load %arg14[%c16_530, %c0_531] : memref<32x128xf32, #tpu.memory_space<vmem>>, vector<1x128xf32>
    %393 = tpu.concatenate %391, %392 in 0 : vector<1x128xf32>, vector<1x128xf32> -> vector<2x128xf32>
    %394 = vector.extract_strided_slice %393 {offsets = [0, 0], sizes = [2, 16], strides = [1, 1]} : vector<2x128xf32> to vector<2x16xf32>
    %c1_532 = arith.constant 1 : index
    %c0_533 = arith.constant 0 : index
    %395 = vector.load %arg14[%c1_532, %c0_533] : memref<32x128xf32, #tpu.memory_space<vmem>>, vector<1x128xf32>
    %c17_534 = arith.constant 17 : index
    %c0_535 = arith.constant 0 : index
    %396 = vector.load %arg14[%c17_534, %c0_535] : memref<32x128xf32, #tpu.memory_space<vmem>>, vector<1x128xf32>
    %397 = tpu.concatenate %395, %396 in 0 : vector<1x128xf32>, vector<1x128xf32> -> vector<2x128xf32>
    %398 = vector.extract_strided_slice %397 {offsets = [0, 0], sizes = [2, 16], strides = [1, 1]} : vector<2x128xf32> to vector<2x16xf32>
    %c2_536 = arith.constant 2 : index
    %c0_537 = arith.constant 0 : index
    %399 = vector.load %arg14[%c2_536, %c0_537] : memref<32x128xf32, #tpu.memory_space<vmem>>, vector<1x128xf32>
    %c18 = arith.constant 18 : index
    %c0_538 = arith.constant 0 : index
    %400 = vector.load %arg14[%c18, %c0_538] : memref<32x128xf32, #tpu.memory_space<vmem>>, vector<1x128xf32>
    %401 = tpu.concatenate %399, %400 in 0 : vector<1x128xf32>, vector<1x128xf32> -> vector<2x128xf32>
    %402 = vector.extract_strided_slice %401 {offsets = [0, 0], sizes = [2, 16], strides = [1, 1]} : vector<2x128xf32> to vector<2x16xf32>
    %c3_539 = arith.constant 3 : index
    %c0_540 = arith.constant 0 : index
    %403 = vector.load %arg14[%c3_539, %c0_540] : memref<32x128xf32, #tpu.memory_space<vmem>>, vector<1x128xf32>
    %c19 = arith.constant 19 : index
    %c0_541 = arith.constant 0 : index
    %404 = vector.load %arg14[%c19, %c0_541] : memref<32x128xf32, #tpu.memory_space<vmem>>, vector<1x128xf32>
    %405 = tpu.concatenate %403, %404 in 0 : vector<1x128xf32>, vector<1x128xf32> -> vector<2x128xf32>
    %406 = vector.extract_strided_slice %405 {offsets = [0, 0], sizes = [2, 16], strides = [1, 1]} : vector<2x128xf32> to vector<2x16xf32>
    %c4_542 = arith.constant 4 : index
    %c0_543 = arith.constant 0 : index
    %407 = vector.load %arg14[%c4_542, %c0_543] : memref<32x128xf32, #tpu.memory_space<vmem>>, vector<1x128xf32>
    %c20_544 = arith.constant 20 : index
    %c0_545 = arith.constant 0 : index
    %408 = vector.load %arg14[%c20_544, %c0_545] : memref<32x128xf32, #tpu.memory_space<vmem>>, vector<1x128xf32>
    %409 = tpu.concatenate %407, %408 in 0 : vector<1x128xf32>, vector<1x128xf32> -> vector<2x128xf32>
    %410 = vector.extract_strided_slice %409 {offsets = [0, 0], sizes = [2, 16], strides = [1, 1]} : vector<2x128xf32> to vector<2x16xf32>
    %c5 = arith.constant 5 : index
    %c0_546 = arith.constant 0 : index
    %411 = vector.load %arg14[%c5, %c0_546] : memref<32x128xf32, #tpu.memory_space<vmem>>, vector<1x128xf32>
    %c21 = arith.constant 21 : index
    %c0_547 = arith.constant 0 : index
    %412 = vector.load %arg14[%c21, %c0_547] : memref<32x128xf32, #tpu.memory_space<vmem>>, vector<1x128xf32>
    %413 = tpu.concatenate %411, %412 in 0 : vector<1x128xf32>, vector<1x128xf32> -> vector<2x128xf32>
    %414 = vector.extract_strided_slice %413 {offsets = [0, 0], sizes = [2, 16], strides = [1, 1]} : vector<2x128xf32> to vector<2x16xf32>
    %c6 = arith.constant 6 : index
    %c0_548 = arith.constant 0 : index
    %415 = vector.load %arg14[%c6, %c0_548] : memref<32x128xf32, #tpu.memory_space<vmem>>, vector<1x128xf32>
    %c22_549 = arith.constant 22 : index
    %c0_550 = arith.constant 0 : index
    %416 = vector.load %arg14[%c22_549, %c0_550] : memref<32x128xf32, #tpu.memory_space<vmem>>, vector<1x128xf32>
    %417 = tpu.concatenate %415, %416 in 0 : vector<1x128xf32>, vector<1x128xf32> -> vector<2x128xf32>
    %418 = vector.extract_strided_slice %417 {offsets = [0, 0], sizes = [2, 16], strides = [1, 1]} : vector<2x128xf32> to vector<2x16xf32>
    %c7 = arith.constant 7 : index
    %c0_551 = arith.constant 0 : index
    %419 = vector.load %arg14[%c7, %c0_551] : memref<32x128xf32, #tpu.memory_space<vmem>>, vector<1x128xf32>
    %c23_552 = arith.constant 23 : index
    %c0_553 = arith.constant 0 : index
    %420 = vector.load %arg14[%c23_552, %c0_553] : memref<32x128xf32, #tpu.memory_space<vmem>>, vector<1x128xf32>
    %421 = tpu.concatenate %419, %420 in 0 : vector<1x128xf32>, vector<1x128xf32> -> vector<2x128xf32>
    %422 = vector.extract_strided_slice %421 {offsets = [0, 0], sizes = [2, 16], strides = [1, 1]} : vector<2x128xf32> to vector<2x16xf32>
    %c8_554 = arith.constant 8 : index
    %c0_555 = arith.constant 0 : index
    %423 = vector.load %arg14[%c8_554, %c0_555] : memref<32x128xf32, #tpu.memory_space<vmem>>, vector<1x128xf32>
    %c24_556 = arith.constant 24 : index
    %c0_557 = arith.constant 0 : index
    %424 = vector.load %arg14[%c24_556, %c0_557] : memref<32x128xf32, #tpu.memory_space<vmem>>, vector<1x128xf32>
    %425 = tpu.concatenate %423, %424 in 0 : vector<1x128xf32>, vector<1x128xf32> -> vector<2x128xf32>
    %426 = vector.extract_strided_slice %425 {offsets = [0, 0], sizes = [2, 16], strides = [1, 1]} : vector<2x128xf32> to vector<2x16xf32>
    %c9_558 = arith.constant 9 : index
    %c0_559 = arith.constant 0 : index
    %427 = vector.load %arg14[%c9_558, %c0_559] : memref<32x128xf32, #tpu.memory_space<vmem>>, vector<1x128xf32>
    %c25_560 = arith.constant 25 : index
    %c0_561 = arith.constant 0 : index
    %428 = vector.load %arg14[%c25_560, %c0_561] : memref<32x128xf32, #tpu.memory_space<vmem>>, vector<1x128xf32>
    %429 = tpu.concatenate %427, %428 in 0 : vector<1x128xf32>, vector<1x128xf32> -> vector<2x128xf32>
    %430 = vector.extract_strided_slice %429 {offsets = [0, 0], sizes = [2, 16], strides = [1, 1]} : vector<2x128xf32> to vector<2x16xf32>
    %c10 = arith.constant 10 : index
    %c0_562 = arith.constant 0 : index
    %431 = vector.load %arg14[%c10, %c0_562] : memref<32x128xf32, #tpu.memory_space<vmem>>, vector<1x128xf32>
    %c26 = arith.constant 26 : index
    %c0_563 = arith.constant 0 : index
    %432 = vector.load %arg14[%c26, %c0_563] : memref<32x128xf32, #tpu.memory_space<vmem>>, vector<1x128xf32>
    %433 = tpu.concatenate %431, %432 in 0 : vector<1x128xf32>, vector<1x128xf32> -> vector<2x128xf32>
    %434 = vector.extract_strided_slice %433 {offsets = [0, 0], sizes = [2, 16], strides = [1, 1]} : vector<2x128xf32> to vector<2x16xf32>
    %c11_564 = arith.constant 11 : index
    %c0_565 = arith.constant 0 : index
    %435 = vector.load %arg14[%c11_564, %c0_565] : memref<32x128xf32, #tpu.memory_space<vmem>>, vector<1x128xf32>
    %c27 = arith.constant 27 : index
    %c0_566 = arith.constant 0 : index
    %436 = vector.load %arg14[%c27, %c0_566] : memref<32x128xf32, #tpu.memory_space<vmem>>, vector<1x128xf32>
    %437 = tpu.concatenate %435, %436 in 0 : vector<1x128xf32>, vector<1x128xf32> -> vector<2x128xf32>
    %438 = vector.extract_strided_slice %437 {offsets = [0, 0], sizes = [2, 16], strides = [1, 1]} : vector<2x128xf32> to vector<2x16xf32>
    %c12_567 = arith.constant 12 : index
    %c0_568 = arith.constant 0 : index
    %439 = vector.load %arg14[%c12_567, %c0_568] : memref<32x128xf32, #tpu.memory_space<vmem>>, vector<1x128xf32>
    %c28_569 = arith.constant 28 : index
    %c0_570 = arith.constant 0 : index
    %440 = vector.load %arg14[%c28_569, %c0_570] : memref<32x128xf32, #tpu.memory_space<vmem>>, vector<1x128xf32>
    %441 = tpu.concatenate %439, %440 in 0 : vector<1x128xf32>, vector<1x128xf32> -> vector<2x128xf32>
    %442 = vector.extract_strided_slice %441 {offsets = [0, 0], sizes = [2, 16], strides = [1, 1]} : vector<2x128xf32> to vector<2x16xf32>
    %c13_571 = arith.constant 13 : index
    %c0_572 = arith.constant 0 : index
    %443 = vector.load %arg14[%c13_571, %c0_572] : memref<32x128xf32, #tpu.memory_space<vmem>>, vector<1x128xf32>
    %c29 = arith.constant 29 : index
    %c0_573 = arith.constant 0 : index
    %444 = vector.load %arg14[%c29, %c0_573] : memref<32x128xf32, #tpu.memory_space<vmem>>, vector<1x128xf32>
    %445 = tpu.concatenate %443, %444 in 0 : vector<1x128xf32>, vector<1x128xf32> -> vector<2x128xf32>
    %446 = vector.extract_strided_slice %445 {offsets = [0, 0], sizes = [2, 16], strides = [1, 1]} : vector<2x128xf32> to vector<2x16xf32>
    %c14_574 = arith.constant 14 : index
    %c0_575 = arith.constant 0 : index
    %447 = vector.load %arg14[%c14_574, %c0_575] : memref<32x128xf32, #tpu.memory_space<vmem>>, vector<1x128xf32>
    %c30 = arith.constant 30 : index
    %c0_576 = arith.constant 0 : index
    %448 = vector.load %arg14[%c30, %c0_576] : memref<32x128xf32, #tpu.memory_space<vmem>>, vector<1x128xf32>
    %449 = tpu.concatenate %447, %448 in 0 : vector<1x128xf32>, vector<1x128xf32> -> vector<2x128xf32>
    %450 = vector.extract_strided_slice %449 {offsets = [0, 0], sizes = [2, 16], strides = [1, 1]} : vector<2x128xf32> to vector<2x16xf32>
    %c15 = arith.constant 15 : index
    %c0_577 = arith.constant 0 : index
    %451 = vector.load %arg14[%c15, %c0_577] : memref<32x128xf32, #tpu.memory_space<vmem>>, vector<1x128xf32>
    %c31 = arith.constant 31 : index
    %c0_578 = arith.constant 0 : index
    %452 = vector.load %arg14[%c31, %c0_578] : memref<32x128xf32, #tpu.memory_space<vmem>>, vector<1x128xf32>
    %453 = tpu.concatenate %451, %452 in 0 : vector<1x128xf32>, vector<1x128xf32> -> vector<2x128xf32>
    %454 = vector.extract_strided_slice %453 {offsets = [0, 0], sizes = [2, 16], strides = [1, 1]} : vector<2x128xf32> to vector<2x16xf32>
    %455 = tpu.concatenate %394, %398, %402, %406, %410, %414, %418, %422, %426, %430, %434, %438, %442, %446, %450, %454 in 1 : vector<2x16xf32>, vector<2x16xf32>, vector<2x16xf32>, vector<2x16xf32>, vector<2x16xf32>, vector<2x16xf32>, vector<2x16xf32>, vector<2x16xf32>, vector<2x16xf32>, vector<2x16xf32>, vector<2x16xf32>, vector<2x16xf32>, vector<2x16xf32>, vector<2x16xf32>, vector<2x16xf32>, vector<2x16xf32> -> vector<2x256xf32>
    %c0_579 = arith.constant 0 : index
    %c0_580 = arith.constant 0 : index
    %456 = vector.load %arg5[%c0_579, %c0_580] : memref<256x128xf32, #tpu.memory_space<vmem>>, vector<256x128xf32>
    %cst_581 = arith.constant dense<0.000000e+00> : vector<2x128xf32>
    %457 = tpu.matmul %455, %456, %cst_581 {dimension_numbers = #tpu.dot_dimension_numbers<[1], [0], [0], [1], [0, 0, 1, 1], [], []>} : vector<2x256xf32>, vector<256x128xf32>, vector<2x128xf32> -> vector<2x128xf32>
    %c0_582 = arith.constant 0 : index
    %c0_583 = arith.constant 0 : index
    %458 = vector.load %arg6[%c0_582, %c0_583] : memref<1x128xf32, #tpu.memory_space<vmem>>, vector<1x128xf32>
    %459 = vector.broadcast %458 : vector<1x128xf32> to vector<2x128xf32>
    %460 = arith.addf %457, %459 : vector<2x128xf32>
    %c0_584 = arith.constant 0 : index
    %c0_585 = arith.constant 0 : index
    %461 = vector.load %arg7[%c0_584, %c0_585] : memref<128x128xf32, #tpu.memory_space<vmem>>, vector<128x128xf32>
    %cst_586 = arith.constant dense<0.000000e+00> : vector<2x128xf32>
    %462 = tpu.matmul %460, %461, %cst_586 {dimension_numbers = #tpu.dot_dimension_numbers<[1], [0], [0], [1], [0, 0, 1, 1], [], []>} : vector<2x128xf32>, vector<128x128xf32>, vector<2x128xf32> -> vector<2x128xf32>
    %c0_587 = arith.constant 0 : index
    %c0_588 = arith.constant 0 : index
    %463 = vector.load %arg8[%c0_587, %c0_588] : memref<1x128xf32, #tpu.memory_space<vmem>>, vector<1x128xf32>
    %464 = vector.broadcast %463 : vector<1x128xf32> to vector<2x128xf32>
    %465 = arith.addf %462, %464 : vector<2x128xf32>
    %cst_589 = arith.constant 0.000000e+00 : f32
    %466 = vector.broadcast %cst_589 : f32 to vector<2x128xf32>
    %467 = arith.maximumf %465, %466 : vector<2x128xf32>
    %c0_590 = arith.constant 0 : index
    %c0_591 = arith.constant 0 : index
    %468 = vector.load %arg9[%c0_590, %c0_591] : memref<128x128xf32, #tpu.memory_space<vmem>>, vector<128x128xf32>
    %cst_592 = arith.constant dense<0.000000e+00> : vector<2x128xf32>
    %469 = tpu.matmul %467, %468, %cst_592 {dimension_numbers = #tpu.dot_dimension_numbers<[1], [0], [0], [1], [0, 0, 1, 1], [], []>} : vector<2x128xf32>, vector<128x128xf32>, vector<2x128xf32> -> vector<2x128xf32>
    %c0_593 = arith.constant 0 : index
    %c0_594 = arith.constant 0 : index
    %470 = vector.load %arg10[%c0_593, %c0_594] : memref<1x128xf32, #tpu.memory_space<vmem>>, vector<1x128xf32>
    %471 = vector.broadcast %470 : vector<1x128xf32> to vector<2x128xf32>
    %472 = arith.addf %469, %471 : vector<2x128xf32>
    %473 = tpu.iota {dimensions = array<i32: 1>} : vector<2x128xi32>
    %c10_i32 = arith.constant 10 : i32
    %474 = vector.broadcast %c10_i32 : i32 to vector<2x128xi32>
    %475 = arith.cmpi slt, %473, %474 : vector<2x128xi32>
    %cst_595 = arith.constant -1.000000e+30 : f32
    %476 = vector.broadcast %cst_595 : f32 to vector<2x128xf32>
    %477 = arith.select %475, %472, %476 : vector<2x128xi1>, vector<2x128xf32>
    %cst_596 = arith.constant dense<0xFF800000> : vector<2xf32>
    %478 = vector.multi_reduction <maximumf>, %477, %cst_596 [1] : vector<2x128xf32> to vector<2xf32>
    %479 = vector.shape_cast %478 : vector<2xf32> to vector<2x1xf32>
    %480 = vector.broadcast %479 : vector<2x1xf32> to vector<2x128xf32>
    %481 = arith.subf %477, %480 : vector<2x128xf32>
    %482 = math.exp %481 : vector<2x128xf32>
    %cst_597 = arith.constant dense<0.000000e+00> : vector<2xf32>
    %483 = vector.multi_reduction <add>, %482, %cst_597 [1] : vector<2x128xf32> to vector<2xf32>
    %484 = vector.shape_cast %483 : vector<2xf32> to vector<2x1xf32>
    %485 = vector.broadcast %484 : vector<2x1xf32> to vector<2x128xf32>
    %486 = arith.divf %482, %485 : vector<2x128xf32>
    %c0_598 = arith.constant 0 : index
    %c0_599 = arith.constant 0 : index
    %487 = vector.load %arg11[%c0_598, %c0_599] : memref<2x128xf32, #tpu.memory_space<vmem>>, vector<2x128xf32>
    tpu.vector_store %arg11[%c0_598, %c0_599], %486 {strides = array<i32>} : memref<2x128xf32, #tpu.memory_space<vmem>>, vector<2x128xf32>,
    return
  }
}

</mosaic_0001>

<bundles_post_ra>
// kernel: lnet_forward.1
= control target key start
LH: loop header
LB: loop body
LE: loop exit
PB: predicated region body
PF: predicated region fallthrough
CT: control target
= control target key end

     0   :  { %v7917_v2 = vmov 0.0|0.0   ;;  %vm5586_vm0 = vmmov 0   ;;  %v7915_v4 = vmov 0.0   ;;  %vm72_vm1 = vcmask 130048   ;;  %s7903_s0 = inlined_call_operand.vmem [shape: f32[4,242,16], index: 0, kind: input, shape index: {}]   ;;  %s7904_s1 = inlined_call_operand.vmem [shape: f32[16,128], index: 1, kind: input, shape index: {}]   ;;  %s7905_s2 = inlined_call_operand.vmem [shape: f32[1,128], index: 2, kind: input, shape index: {}]   ;;  %s7906_s3 = inlined_call_operand.vmem [shape: f32[128,128], index: 3, kind: input, shape index: {}]   ;;  %s7907_s4 = inlined_call_operand.vmem [shape: f32[1,128], index: 4, kind: input, shape index: {}]   ;;  %s7908_s5 = inlined_call_operand.vmem [shape: f32[256,128], index: 5, kind: input, shape index: {}]   ;;  %s7909_s6 = inlined_call_operand.vmem [shape: f32[1,128], index: 6, kind: input, shape index: {}]   ;;  %s7910_s7 = inlined_call_operand.vmem [shape: f32[128,128], index: 7, kind: input, shape index: {}]   ;;  %s7911_s8 = inlined_call_operand.vmem [shape: f32[1,128], index: 8, kind: input, shape index: {}]   ;;  %s7912_s9 = inlined_call_operand.vmem [shape: f32[128,128], index: 9, kind: input, shape index: {}]   ;;  %s7913_s10 = inlined_call_operand.vmem [shape: f32[1,128], index: 10, kind: input, shape index: {}]   ;;  %s7914_s11 = inlined_call_operand.hbm [shape: f32[2,128], index: 11, kind: output, shape index: {}]  }
   0x1   :  { %v39_v0 = vld [vmem:[%s7904_s1] sm:$0xff]  ;;  %v40_v1 = vld [vmem:[%s7904_s1 + $0x8] sm:$0xff]  ;;  %4768 = vmatprep.subr.bf16.mxu0 %v7917_v2  ;;  %4258 = vmatprep.mubr.msk.f32.mxu0 %vm5586_vm0, %v7915_v4  ;;  %v3830_v6 = vld [vmem:[%s7903_s0 + $0xf8] sm:$0xff] }
   0x2   :  { %v4769_v3 = vpack.c.bf16 %v40_v1, %v39_v0  ;;  %4771 = vmatprep.subr.bf16.mxu1 %v7917_v2  ;;  %4355 = vmatprep.mubr.msk.f32.mxu1 %vm5586_vm0, %v7915_v4  ;;  %v41_v5 = vld [vmem:[%s7903_s0] sm:$0xff]  ;;  %v42_v7 = vld [vmem:[%s7903_s0 + $0x8] sm:$0xff]  ;;  %v43_v9 = vld [vmem:[%s7903_s0 + $0x10] sm:$0xff] }
   0x3   :  { %v3831_v8 = vld [vmem:[%s7903_s0 + $0x100] sm:$0xff]  ;;  %v3832_v10 = vld [vmem:[%s7903_s0 + $0x108] sm:$0xff]  ;;  %v44_v11 = vld [vmem:[%s7903_s0 + $0x18] sm:$0xff] }
   0x4   :  { %4770 = vmatpush3.bf16.msra.mxu0 %v4769_v3  ;;  %4773 = vmatpush3.bf16.msra.mxu1 %v4769_v3  ;;  %v3833_v12 = vld [vmem:[%s7903_s0 + $0x110] sm:$0xff]  ;;  %v45_v13 = vld [vmem:[%s7903_s0 + $0x20] sm:$0xff]  ;;  %v3834_v14 = vld [vmem:[%s7903_s0 + $0x118] sm:$0xff] }
   0x5   :  { %4774 = vmatprep.subr.bf16.mxu0 %v7917_v2  ;;  %4777 = vmatprep.subr.bf16.mxu1 %v7917_v2  ;;  %v46_v15 = vld [vmem:[%s7903_s0 + $0x28] sm:$0xff]  ;;  %v3835_v16 = vld [vmem:[%s7903_s0 + $0x120] sm:$0xff] }
   0x7   :  { %4259 = vmatmul.mubr.msk.f32.vlgmr.msra.gmra.mrb[0].mxu0 %vm72_vm1, %v41_v5  ;;  %4356 = vmatmul.mubr.msk.f32.vlgmr.msra.gmra.mrb[0].mxu1 %vm72_vm1, %v3830_v6 }
   0x8   :  { %4776 = vmatpush3.bf16.msra.mxu0 %v4769_v3  ;;  %4261 = vmatprep.mubr.msk.f32.mxu0 %vm5586_vm0, %v7915_v4 }
   0x9   :  { %4779 = vmatpush3.bf16.msra.mxu1 %v4769_v3  ;;  %4358 = vmatprep.mubr.msk.f32.mxu1 %vm5586_vm0, %v7915_v4 }
   0xb   :  { %4262 = vmatmul.mubr.msk.f32.gmra.mrb[2].mxu0 %vm72_vm1, %v42_v7  ;;  %4359 = vmatmul.mubr.msk.f32.gmra.mrb[2].mxu1 %vm72_vm1, %v3831_v8 }
   0xc   :  { %4264 = vmatprep.mubr.msk.f32.mxu0 %vm5586_vm0, %v7915_v4  ;;  %4361 = vmatprep.mubr.msk.f32.mxu1 %vm5586_vm0, %v7915_v4 }
   0xf   :  { %4265 = vmatmul.mubr.msk.f32.gmra.mrb[4].mxu0 %vm72_vm1, %v43_v9  ;;  %4362 = vmatmul.mubr.msk.f32.gmra.mrb[4].mxu1 %vm72_vm1, %v3832_v10 }
  0x10   :  { %4267 = vmatprep.mubr.msk.f32.mxu0 %vm5586_vm0, %v7915_v4  ;;  %4364 = vmatprep.mubr.msk.f32.mxu1 %vm5586_vm0, %v7915_v4 }
  0x13   :  { %4268 = vmatmul.mubr.msk.f32.gmra.mrb[6].mxu0 %vm72_vm1, %v44_v11  ;;  %4365 = vmatmul.mubr.msk.f32.gmra.mrb[6].mxu1 %vm72_vm1, %v3833_v12 }
  0x14   :  { %4270 = vmatprep.mubr.msk.f32.mxu0 %vm5586_vm0, %v7915_v4  ;;  %4367 = vmatprep.mubr.msk.f32.mxu1 %vm5586_vm0, %v7915_v4 }
  0x17   :  { %4271 = vmatmul.mubr.msk.f32.gmra.mrb[8].mxu0 %vm72_vm1, %v45_v13  ;;  %4368 = vmatmul.mubr.msk.f32.gmra.mrb[8].mxu1 %vm72_vm1, %v3834_v14 }
  0x18   :  { %4273 = vmatprep.mubr.msk.f32.mxu0 %vm5586_vm0, %v7915_v4  ;;  %4370 = vmatprep.mubr.msk.f32.mxu1 %vm5586_vm0, %v7915_v4 }
  0x19   :  { %16 = vsyncpa [#allocation6], 0  ;;  %v47_v17 = vld [vmem:[%s7903_s0 + $0x30] sm:$0xff]  ;;  %v3836_v18 = vld [vmem:[%s7903_s0 + $0x128] sm:$0xff]  ;;  %s5589_s29 = smov 8   ;;  %s5590_s30 = smov 16  }
  0x1a   :  { %v48_v19 = vld [vmem:[%s7903_s0 + $0x38] sm:$0xff]  ;;  %v3837_v20 = vld [vmem:[%s7903_s0 + $0x130] sm:$0xff]  ;;  %v49_v21 = vld [vmem:[%s7903_s0 + $0x40] sm:$0xff]  ;;  %s5591_s12 = smov 32   ;;  %s5592_s17 = smov 40   ;;  %vm2756_vm2 = vcmask 64512  }
  0x1b   :  { %4274 = vmatmul.mubr.msk.f32.gmra.mrb[10].mxu0 %vm72_vm1, %v46_v15  ;;  %4371 = vmatmul.mubr.msk.f32.gmra.mrb[10].mxu1 %vm72_vm1, %v3835_v16  ;;  %v3838_v22 = vld [vmem:[%s7903_s0 + $0x138] sm:$0xff]  ;;  %v50_v23 = vld [vmem:[%s7903_s0 + $0x48] sm:$0xff]  ;;  %v3839_v24 = vld [vmem:[%s7903_s0 + $0x140] sm:$0xff]  ;;  %s5593_s22 = smov 48   ;;  %s5594_s26 = smov 56   ;;  %vm2789_vm3 = vcmask 195584  }
  0x1c   :  { %4276 = vmatprep.mubr.msk.f32.mxu0 %vm5586_vm0, %v7915_v4  ;;  %4373 = vmatprep.mubr.msk.f32.mxu1 %vm5586_vm0, %v7915_v4  ;;  %v51_v25 = vld [vmem:[%s7903_s0 + $0x50] sm:$0xff]  ;;  %v3840_v26 = vld [vmem:[%s7903_s0 + $0x148] sm:$0xff]  ;;  %v52_v27 = vld [vmem:[%s7903_s0 + $0x58] sm:$0xff]  ;;  %s5595_s14 = smov 64   ;;  %s5596_s20 = smov 72   ;;  %vm2806_vm4 = vcmask 261120  }
  0x1d   :  { %v3841_v28 = vld [vmem:[%s7903_s0 + $0x150] sm:$0xff]  ;;  %v53_v29 = vld [vmem:[%s7903_s0 + $0x60] sm:$0xff]  ;;  %v3842_v30 = vld [vmem:[%s7903_s0 + $0x158] sm:$0xff]  ;;  %s5597_s21 = smov 80   ;;  %s5598_s27 = smov 88   ;;  %vm2823_vm5 = vcmask 326656  }
  0x1e   :  { %v54_v31 = vld [vmem:[%s7903_s0 + $0x68] sm:$0xff]  ;;  %v3843_v32 = vld [vmem:[%s7903_s0 + $0x160] sm:$0xff]  ;;  %v55_v33 = vld [vmem:[%s7903_s0 + $0x70] sm:$0xff]  ;;  %s5599_s23 = smov 96   ;;  %s5601_s24 = smov 112   ;;  %vm2840_vm6 = vcmask 392192  }
  0x1f   :  { %4277 = vmatmul.mubr.msk.f32.gmra.mrb[12].mxu0 %vm72_vm1, %v47_v17  ;;  %4374 = vmatmul.mubr.msk.f32.gmra.mrb[12].mxu1 %vm72_vm1, %v3836_v18  ;;  %v3844_v34 = vld [vmem:[%s7903_s0 + $0x168] sm:$0xff]  ;;  %v56_v35 = vld [vmem:[%s7903_s0 + $0x78] sm:$0xff]  ;;  %v3845_v36 = vld [vmem:[%s7903_s0 + $0x170] sm:$0xff]  ;;  %s5602_s25 = smov 120   ;;  %vm2857_vm7 = vcmask 457728   ;;  %vm2874_vm8 = vcmask 523264  }
  0x20   :  { %4279 = vmatprep.mubr.msk.f32.mxu0 %vm5586_vm0, %v7915_v4  ;;  %4376 = vmatprep.mubr.msk.f32.mxu1 %vm5586_vm0, %v7915_v4  ;;  %v57_v37 = vld [vmem:[%s7903_s0 + $0x80] sm:$0xff]  ;;  %v3846_v38 = vld [vmem:[%s7903_s0 + $0x178] sm:$0xff]  ;;  %v58_v39 = vld [vmem:[%s7903_s0 + $0x88] sm:$0xff]  ;;  %vm2891_vm9 = vcmask 588800   ;;  %vm2908_vm10 = vcmask 654336   ;;  %vm2925_vm11 = vcmask 719872  }
  0x21   :  { %v3847_v40 = vld [vmem:[%s7903_s0 + $0x180] sm:$0xff]  ;;  %v59_v41 = vld [vmem:[%s7903_s0 + $0x90] sm:$0xff]  ;;  %v3848_v42 = vld [vmem:[%s7903_s0 + $0x188] sm:$0xff]  ;;  %vm2942_vm12 = vcmask 785408   ;;  %vm2959_vm13 = vcmask 850944   ;;  %vm2976_vm14 = vcmask 916480  }
  0x22   :  { %v60_v43 = vld [vmem:[%s7903_s0 + $0x98] sm:$0xff]  ;;  %v3849_v44 = vld [vmem:[%s7903_s0 + $0x190] sm:$0xff]  ;;  %v61_v45 = vld [vmem:[%s7903_s0 + $0xa0] sm:$0xff]  ;;  %vm2993_vm15 = vcmask 982016  }
  0x23   :  { %4280 = vmatmul.mubr.msk.f32.gmra.mrb[14].mxu0 %vm72_vm1, %v48_v19  ;;  %4377 = vmatmul.mubr.msk.f32.gmra.mrb[14].mxu1 %vm72_vm1, %v3837_v20  ;;  %v3850_v46 = vld [vmem:[%s7903_s0 + $0x198] sm:$0xff]  ;;  %v62_v47 = vld [vmem:[%s7903_s0 + $0xa8] sm:$0xff]  ;;  %v3851_v48 = vld [vmem:[%s7903_s0 + $0x1a0] sm:$0xff] }
  0x24   :  { %4282 = vmatprep.mubr.msk.f32.mxu0 %vm5586_vm0, %v7915_v4  ;;  %4379 = vmatprep.mubr.msk.f32.mxu1 %vm5586_vm0, %v7915_v4  ;;  %v63_v49 = vld [vmem:[%s7903_s0 + $0xb0] sm:$0xff]  ;;  %v3852_v50 = vld [vmem:[%s7903_s0 + $0x1a8] sm:$0xff]  ;;  %v64_v51 = vld [vmem:[%s7903_s0 + $0xb8] sm:$0xff] }
  0x25   :  { %v3853_v52 = vld [vmem:[%s7903_s0 + $0x1b0] sm:$0xff]  ;;  %v65_v53 = vld [vmem:[%s7903_s0 + $0xc0] sm:$0xff]  ;;  %v3854_v54 = vld [vmem:[%s7903_s0 + $0x1b8] sm:$0xff] }
  0x26   :  { %v66_v55 = vld [vmem:[%s7903_s0 + $0xc8] sm:$0xff]  ;;  %v3855_v56 = vld [vmem:[%s7903_s0 + $0x1c0] sm:$0xff]  ;;  %v67_v57 = vld [vmem:[%s7903_s0 + $0xd0] sm:$0xff] }
  0x27   :  { %4283 = vmatmul.mubr.msk.f32.gmra.mrb[16].mxu0 %vm72_vm1, %v49_v21  ;;  %4380 = vmatmul.mubr.msk.f32.gmra.mrb[16].mxu1 %vm72_vm1, %v3838_v22  ;;  %v3856_v58 = vld [vmem:[%s7903_s0 + $0x1c8] sm:$0xff]  ;;  %v68_v59 = vld [vmem:[%s7903_s0 + $0xd8] sm:$0xff]  ;;  %v3857_v60 = vld [vmem:[%s7903_s0 + $0x1d0] sm:$0xff] }
  0x28   :  { %4285 = vmatprep.mubr.msk.f32.mxu0 %vm5586_vm0, %v7915_v4  ;;  %4382 = vmatprep.mubr.msk.f32.mxu1 %vm5586_vm0, %v7915_v4  ;;  %v69_v61 = vld [vmem:[%s7903_s0 + $0xe0] sm:$0xff]  ;;  %v3858_v62 = vld [vmem:[%s7903_s0 + $0x1d8] sm:$0xff]  ;;  %v70_v63 = vld [vmem:[%s7903_s0 + $0xe8] sm:$0xff] }
  0x29   :  { %v3859_v0 = vld [vmem:[%s7903_s0 + $0x1e0] sm:$0xff]  ;;  %v71_v1 = vld [vmem:[%s7903_s0 + $0xf0] sm:$0x3]  ;;  %v3860_v3 = vld [vmem:[%s7903_s0 + $0x1e8] sm:$0x3] }
  0x2a   :  { %v3892_v5 = vld [vmem:[%s7903_s0 + $0x1f0] sm:$0xff]  ;;  %v3954_v6 = vld [vmem:[%s7903_s0 + $0x2e8] sm:$0xff]  ;;  %v3893_v7 = vld [vmem:[%s7903_s0 + $0x1f8] sm:$0xff] }
  0x2b   :  { %4286 = vmatmul.mubr.msk.f32.gmra.mrb[18].mxu0 %vm72_vm1, %v50_v23  ;;  %4383 = vmatmul.mubr.msk.f32.gmra.mrb[18].mxu1 %vm72_vm1, %v3839_v24  ;;  %v3955_v8 = vld [vmem:[%s7903_s0 + $0x2f0] sm:$0xff]  ;;  %v3894_v9 = vld [vmem:[%s7903_s0 + $0x200] sm:$0xff]  ;;  %v3956_v10 = vld [vmem:[%s7903_s0 + $0x2f8] sm:$0xff] }
  0x2c   :  { %4288 = vmatprep.mubr.msk.f32.mxu0 %vm5586_vm0, %v7915_v4  ;;  %4385 = vmatprep.mubr.msk.f32.mxu1 %vm5586_vm0, %v7915_v4  ;;  %v3895_v11 = vld [vmem:[%s7903_s0 + $0x208] sm:$0xff]  ;;  %v3957_v12 = vld [vmem:[%s7903_s0 + $0x300] sm:$0xff]  ;;  %v3896_v13 = vld [vmem:[%s7903_s0 + $0x210] sm:$0xff] }
  0x2d   :  { %v3958_v14 = vld [vmem:[%s7903_s0 + $0x308] sm:$0xff]  ;;  %v3897_v15 = vld [vmem:[%s7903_s0 + $0x218] sm:$0xff]  ;;  %v3959_v16 = vld [vmem:[%s7903_s0 + $0x310] sm:$0xff] }
  0x2e   :  { %v3898_v17 = vld [vmem:[%s7903_s0 + $0x220] sm:$0xff]  ;;  %v3960_v18 = vld [vmem:[%s7903_s0 + $0x318] sm:$0xff]  ;;  %v3899_v19 = vld [vmem:[%s7903_s0 + $0x228] sm:$0xff] }
  0x2f   :  { %4289 = vmatmul.mubr.msk.f32.gmra.mrb[20].mxu0 %vm72_vm1, %v51_v25  ;;  %4386 = vmatmul.mubr.msk.f32.gmra.mrb[20].mxu1 %vm72_vm1, %v3840_v26  ;;  %v3961_v20 = vld [vmem:[%s7903_s0 + $0x320] sm:$0xff]  ;;  %v3900_v21 = vld [vmem:[%s7903_s0 + $0x230] sm:$0xff]  ;;  %v3962_v22 = vld [vmem:[%s7903_s0 + $0x328] sm:$0xff] }
  0x30   :  { %4291 = vmatprep.mubr.msk.f32.mxu0 %vm5586_vm0, %v7915_v4  ;;  %4388 = vmatprep.mubr.msk.f32.mxu1 %vm5586_vm0, %v7915_v4  ;;  %v3901_v23 = vld [vmem:[%s7903_s0 + $0x238] sm:$0xff]  ;;  %v3963_v24 = vld [vmem:[%s7903_s0 + $0x330] sm:$0xff]  ;;  %v3902_v25 = vld [vmem:[%s7903_s0 + $0x240] sm:$0xff] }
  0x31   :  { %v3964_v26 = vld [vmem:[%s7903_s0 + $0x338] sm:$0xff] }
  0x33   :  { %4292 = vmatmul.mubr.msk.f32.gmra.mrb[22].mxu0 %vm72_vm1, %v52_v27  ;;  %4389 = vmatmul.mubr.msk.f32.gmra.mrb[22].mxu1 %vm72_vm1, %v3841_v28  ;;  %v3903_v27 = vld [vmem:[%s7903_s0 + $0x248] sm:$0xff]  ;;  %v3965_v28 = vld [vmem:[%s7903_s0 + $0x340] sm:$0xff] }
  0x34   :  { %4294 = vmatprep.mubr.msk.f32.mxu0 %vm5586_vm0, %v7915_v4  ;;  %4391 = vmatprep.mubr.msk.f32.mxu1 %vm5586_vm0, %v7915_v4 }
  0x37   :  { %4295 = vmatmul.mubr.msk.f32.gmra.mrb[24].mxu0 %vm72_vm1, %v53_v29  ;;  %4392 = vmatmul.mubr.msk.f32.gmra.mrb[24].mxu1 %vm72_vm1, %v3842_v30  ;;  %v3904_v29 = vld [vmem:[%s7903_s0 + $0x250] sm:$0xff]  ;;  %v3966_v30 = vld [vmem:[%s7903_s0 + $0x348] sm:$0xff] }
  0x38   :  { %4297 = vmatprep.mubr.msk.f32.mxu0 %vm5586_vm0, %v7915_v4  ;;  %4394 = vmatprep.mubr.msk.f32.mxu1 %vm5586_vm0, %v7915_v4 }
  0x3b   :  { %4298 = vmatmul.mubr.msk.f32.gmra.mrb[26].mxu0 %vm72_vm1, %v54_v31  ;;  %4395 = vmatmul.mubr.msk.f32.gmra.mrb[26].mxu1 %vm72_vm1, %v3843_v32  ;;  %v3905_v31 = vld [vmem:[%s7903_s0 + $0x258] sm:$0xff]  ;;  %v3967_v32 = vld [vmem:[%s7903_s0 + $0x350] sm:$0xff] }
  0x3c   :  { %4300 = vmatprep.mubr.msk.f32.mxu0 %vm5586_vm0, %v7915_v4  ;;  %4397 = vmatprep.mubr.msk.f32.mxu1 %vm5586_vm0, %v7915_v4 }
  0x3f   :  { %4301 = vmatmul.mubr.msk.f32.gmra.mrb[28].mxu0 %vm72_vm1, %v55_v33  ;;  %4398 = vmatmul.mubr.msk.f32.gmra.mrb[28].mxu1 %vm72_vm1, %v3844_v34  ;;  %v3906_v33 = vld [vmem:[%s7903_s0 + $0x260] sm:$0xff]  ;;  %v3968_v34 = vld [vmem:[%s7903_s0 + $0x358] sm:$0xff] }
  0x40   :  { %4303 = vmatprep.mubr.msk.f32.mxu0 %vm5586_vm0, %v7915_v4  ;;  %4400 = vmatprep.mubr.msk.f32.mxu1 %vm5586_vm0, %v7915_v4 }
  0x43   :  { %4304 = vmatmul.mubr.msk.f32.gmra.mrb[30].mxu0 %vm72_vm1, %v56_v35  ;;  %4401 = vmatmul.mubr.msk.f32.gmra.mrb[30].mxu1 %vm72_vm1, %v3845_v36  ;;  %v3907_v35 = vld [vmem:[%s7903_s0 + $0x268] sm:$0xff]  ;;  %v3969_v36 = vld [vmem:[%s7903_s0 + $0x360] sm:$0xff] }
  0x44   :  { %4306 = vmatprep.mubr.msk.f32.mxu0 %vm5586_vm0, %v7915_v4  ;;  %4403 = vmatprep.mubr.msk.f32.mxu1 %vm5586_vm0, %v7915_v4 }
  0x47   :  { %4307 = vmatmul.mubr.msk.f32.gmra.mrb[32].mxu0 %vm72_vm1, %v57_v37  ;;  %4404 = vmatmul.mubr.msk.f32.gmra.mrb[32].mxu1 %vm72_vm1, %v3846_v38  ;;  %v3908_v37 = vld [vmem:[%s7903_s0 + $0x270] sm:$0xff]  ;;  %v3970_v38 = vld [vmem:[%s7903_s0 + $0x368] sm:$0xff] }
  0x48   :  { %4309 = vmatprep.mubr.msk.f32.mxu0 %vm5586_vm0, %v7915_v4  ;;  %4406 = vmatprep.mubr.msk.f32.mxu1 %vm5586_vm0, %v7915_v4 }
  0x4b   :  { %4310 = vmatmul.mubr.msk.f32.gmra.mrb[34].mxu0 %vm72_vm1, %v58_v39  ;;  %4407 = vmatmul.mubr.msk.f32.gmra.mrb[34].mxu1 %vm72_vm1, %v3847_v40  ;;  %v3909_v39 = vld [vmem:[%s7903_s0 + $0x278] sm:$0xff]  ;;  %v3971_v40 = vld [vmem:[%s7903_s0 + $0x370] sm:$0xff] }
  0x4c   :  { %4312 = vmatprep.mubr.msk.f32.mxu0 %vm5586_vm0, %v7915_v4  ;;  %4409 = vmatprep.mubr.msk.f32.mxu1 %vm5586_vm0, %v7915_v4 }
  0x4f   :  { %4313 = vmatmul.mubr.msk.f32.gmra.mrb[36].mxu0 %vm72_vm1, %v59_v41  ;;  %4410 = vmatmul.mubr.msk.f32.gmra.mrb[36].mxu1 %vm72_vm1, %v3848_v42  ;;  %v3910_v41 = vld [vmem:[%s7903_s0 + $0x280] sm:$0xff]  ;;  %v3972_v42 = vld [vmem:[%s7903_s0 + $0x378] sm:$0xff] }
  0x50   :  { %4315 = vmatprep.mubr.msk.f32.mxu0 %vm5586_vm0, %v7915_v4  ;;  %4412 = vmatprep.mubr.msk.f32.mxu1 %vm5586_vm0, %v7915_v4 }
  0x53   :  { %4316 = vmatmul.mubr.msk.f32.gmra.mrb[38].mxu0 %vm72_vm1, %v60_v43  ;;  %4413 = vmatmul.mubr.msk.f32.gmra.mrb[38].mxu1 %vm72_vm1, %v3849_v44  ;;  %v3911_v43 = vld [vmem:[%s7903_s0 + $0x288] sm:$0xff]  ;;  %v3973_v44 = vld [vmem:[%s7903_s0 + $0x380] sm:$0xff] }
  0x54   :  { %4318 = vmatprep.mubr.msk.f32.mxu0 %vm5586_vm0, %v7915_v4  ;;  %4415 = vmatprep.mubr.msk.f32.mxu1 %vm5586_vm0, %v7915_v4 }
  0x57   :  { %4319 = vmatmul.mubr.msk.f32.gmra.mrb[40].mxu0 %vm72_vm1, %v61_v45  ;;  %4416 = vmatmul.mubr.msk.f32.gmra.mrb[40].mxu1 %vm72_vm1, %v3850_v46  ;;  %v3912_v45 = vld [vmem:[%s7903_s0 + $0x290] sm:$0xff]  ;;  %v3974_v46 = vld [vmem:[%s7903_s0 + $0x388] sm:$0xff] }
  0x58   :  { %4321 = vmatprep.mubr.msk.f32.mxu0 %vm5586_vm0, %v7915_v4  ;;  %4418 = vmatprep.mubr.msk.f32.mxu1 %vm5586_vm0, %v7915_v4 }
  0x5b   :  { %4322 = vmatmul.mubr.msk.f32.gmra.mrb[42].mxu0 %vm72_vm1, %v62_v47  ;;  %4419 = vmatmul.mubr.msk.f32.gmra.mrb[42].mxu1 %vm72_vm1, %v3851_v48  ;;  %v3913_v47 = vld [vmem:[%s7903_s0 + $0x298] sm:$0xff]  ;;  %v3975_v48 = vld [vmem:[%s7903_s0 + $0x390] sm:$0xff] }
  0x5c   :  { %4324 = vmatprep.mubr.msk.f32.mxu0 %vm5586_vm0, %v7915_v4  ;;  %4421 = vmatprep.mubr.msk.f32.mxu1 %vm5586_vm0, %v7915_v4 }
  0x5f   :  { %4325 = vmatmul.mubr.msk.f32.gmra.mrb[44].mxu0 %vm72_vm1, %v63_v49  ;;  %4422 = vmatmul.mubr.msk.f32.gmra.mrb[44].mxu1 %vm72_vm1, %v3852_v50  ;;  %v3914_v49 = vld [vmem:[%s7903_s0 + $0x2a0] sm:$0xff]  ;;  %v3976_v50 = vld [vmem:[%s7903_s0 + $0x398] sm:$0xff] }
  0x60   :  { %4327 = vmatprep.mubr.msk.f32.mxu0 %vm5586_vm0, %v7915_v4  ;;  %4424 = vmatprep.mubr.msk.f32.mxu1 %vm5586_vm0, %v7915_v4 }
  0x63   :  { %4328 = vmatmul.mubr.msk.f32.gmra.mrb[46].mxu0 %vm72_vm1, %v64_v51  ;;  %4425 = vmatmul.mubr.msk.f32.gmra.mrb[46].mxu1 %vm72_vm1, %v3853_v52 }
  0x64   :  { %4330 = vmatprep.mubr.msk.f32.mxu0 %vm5586_vm0, %v7915_v4  ;;  %4427 = vmatprep.mubr.msk.f32.mxu1 %vm5586_vm0, %v7915_v4 }
  0x67   :  { %4331 = vmatmul.mubr.msk.f32.gmra.mrb[48].mxu0 %vm72_vm1, %v65_v53  ;;  %4428 = vmatmul.mubr.msk.f32.gmra.mrb[48].mxu1 %vm72_vm1, %v3854_v54 }
  0x68   :  { %4333 = vmatprep.mubr.msk.f32.mxu0 %vm5586_vm0, %v7915_v4  ;;  %4430 = vmatprep.mubr.msk.f32.mxu1 %vm5586_vm0, %v7915_v4 }
  0x6b   :  { %4334 = vmatmul.mubr.msk.f32.gmra.mrb[50].mxu0 %vm72_vm1, %v66_v55  ;;  %4431 = vmatmul.mubr.msk.f32.gmra.mrb[50].mxu1 %vm72_vm1, %v3855_v56  ;;  %v3915_v56 = vld [vmem:[%s7903_s0 + $0x2a8] sm:$0xff] }
  0x6c   :  { %4336 = vmatprep.mubr.msk.f32.mxu0 %vm5586_vm0, %v7915_v4  ;;  %4433 = vmatprep.mubr.msk.f32.mxu1 %vm5586_vm0, %v7915_v4 }
  0x6f   :  { %4337 = vmatmul.mubr.msk.f32.gmra.mrb[52].mxu0 %vm72_vm1, %v67_v57  ;;  %4434 = vmatmul.mubr.msk.f32.gmra.mrb[52].mxu1 %vm72_vm1, %v3856_v58  ;;  %v3977_v57 = vld [vmem:[%s7903_s0 + $0x3a0] sm:$0xff] }
  0x70   :  { %4339 = vmatprep.mubr.msk.f32.mxu0 %vm5586_vm0, %v7915_v4  ;;  %4436 = vmatprep.mubr.msk.f32.mxu1 %vm5586_vm0, %v7915_v4 }
  0x73   :  { %4340 = vmatmul.mubr.msk.f32.gmra.mrb[54].mxu0 %vm72_vm1, %v68_v59  ;;  %4437 = vmatmul.mubr.msk.f32.gmra.mrb[54].mxu1 %vm72_vm1, %v3857_v60 }
  0x74   :  { %4342 = vmatprep.mubr.msk.f32.mxu0 %vm5586_vm0, %v7915_v4  ;;  %4439 = vmatprep.mubr.msk.f32.mxu1 %vm5586_vm0, %v7915_v4 }
  0x77   :  { %4343 = vmatmul.mubr.msk.f32.gmra.mrb[56].mxu0 %vm72_vm1, %v69_v61  ;;  %4440 = vmatmul.mubr.msk.f32.gmra.mrb[56].mxu1 %vm72_vm1, %v3858_v62 }
  0x78   :  { %4345 = vmatprep.mubr.msk.f32.mxu0 %vm5586_vm0, %v7915_v4  ;;  %4442 = vmatprep.mubr.msk.f32.mxu1 %vm5586_vm0, %v7915_v4 }
  0x7b   :  { %4346 = vmatmul.mubr.msk.f32.gmra.mrb[58].mxu0 %vm72_vm1, %v70_v63  ;;  %4443 = vmatmul.mubr.msk.f32.gmra.mrb[58].mxu1 %vm72_vm1, %v3859_v0  ;;  %v3916_v63 = vld [vmem:[%s7903_s0 + $0x2b0] sm:$0xff]  ;;  %v3978_v0 = vld [vmem:[%s7903_s0 + $0x3a8] sm:$0xff] }
  0x7c   :  { %4348 = vmatprep.mubr.msk.f32.mxu0 %vm5586_vm0, %v7915_v4  ;;  %4445 = vmatprep.mubr.msk.f32.mxu1 %vm5586_vm0, %v7915_v4 }
  0x7f   :  { %4349 = vmatmul.mubr.msk.f32.gmra.mrb[60].mxu0 %vm72_vm1, %v71_v1  ;;  %4446 = vmatmul.mubr.msk.f32.gmra.mrb[60].mxu1 %vm72_vm1, %v3860_v3 }
  0x80   :  { %4452 = vmatprep.mubr.msk.f32.mxu0 %vm5586_vm0, %v7915_v4  ;;  %4549 = vmatprep.mubr.msk.f32.mxu1 %vm5586_vm0, %v7915_v4 }
  0x83   :  { %4453 = vmatmul.mubr.msk.f32.vlgmr.msra.gmra.mrb[62].mxu0 %vm72_vm1, %v3892_v5  ;;  %4550 = vmatmul.mubr.msk.f32.vlgmr.msra.gmra.mrb[62].mxu1 %vm72_vm1, %v3954_v6 }
  0x84   :  { %4455 = vmatprep.mubr.msk.f32.mxu0 %vm5586_vm0, %v7915_v4  ;;  %4552 = vmatprep.mubr.msk.f32.mxu1 %vm5586_vm0, %v7915_v4 }
  0x87   :  { %4456 = vmatmul.mubr.msk.f32.gmra.mrb[64].mxu0 %vm72_vm1, %v3893_v7  ;;  %4553 = vmatmul.mubr.msk.f32.gmra.mrb[64].mxu1 %vm72_vm1, %v3955_v8  ;;  %v3917_v8 = vld [vmem:[%s7903_s0 + $0x2b8] sm:$0xff] }
  0x88   :  { %4458 = vmatprep.mubr.msk.f32.mxu0 %vm5586_vm0, %v7915_v4  ;;  %4555 = vmatprep.mubr.msk.f32.mxu1 %vm5586_vm0, %v7915_v4 }
  0x8b   :  { %4459 = vmatmul.mubr.msk.f32.gmra.mrb[66].mxu0 %vm72_vm1, %v3894_v9  ;;  %4556 = vmatmul.mubr.msk.f32.gmra.mrb[66].mxu1 %vm72_vm1, %v3956_v10  ;;  %v3979_v9 = vld [vmem:[%s7903_s0 + $0x3b0] sm:$0xff] }
  0x8c   :  { %4461 = vmatprep.mubr.msk.f32.mxu0 %vm5586_vm0, %v7915_v4  ;;  %4558 = vmatprep.mubr.msk.f32.mxu1 %vm5586_vm0, %v7915_v4 }
  0x8f   :  { %4462 = vmatmul.mubr.msk.f32.gmra.mrb[68].mxu0 %vm72_vm1, %v3895_v11  ;;  %4559 = vmatmul.mubr.msk.f32.gmra.mrb[68].mxu1 %vm72_vm1, %v3957_v12 }
  0x90   :  { %4464 = vmatprep.mubr.msk.f32.mxu0 %vm5586_vm0, %v7915_v4  ;;  %4561 = vmatprep.mubr.msk.f32.mxu1 %vm5586_vm0, %v7915_v4 }
  0x93   :  { %4465 = vmatmul.mubr.msk.f32.gmra.mrb[70].mxu0 %vm72_vm1, %v3896_v13  ;;  %4562 = vmatmul.mubr.msk.f32.gmra.mrb[70].mxu1 %vm72_vm1, %v3958_v14 }
  0x94   :  { %4467 = vmatprep.mubr.msk.f32.mxu0 %vm5586_vm0, %v7915_v4  ;;  %4564 = vmatprep.mubr.msk.f32.mxu1 %vm5586_vm0, %v7915_v4 }
  0x97   :  { %4468 = vmatmul.mubr.msk.f32.gmra.mrb[72].mxu0 %vm72_vm1, %v3897_v15  ;;  %4565 = vmatmul.mubr.msk.f32.gmra.mrb[72].mxu1 %vm72_vm1, %v3959_v16  ;;  %v3918_v15 = vld [vmem:[%s7903_s0 + $0x2c0] sm:$0xff]  ;;  %v3980_v16 = vld [vmem:[%s7903_s0 + $0x3b8] sm:$0xff] }
  0x98   :  { %4470 = vmatprep.mubr.msk.f32.mxu0 %vm5586_vm0, %v7915_v4  ;;  %4567 = vmatprep.mubr.msk.f32.mxu1 %vm5586_vm0, %v7915_v4 }
  0x9b   :  { %4471 = vmatmul.mubr.msk.f32.gmra.mrb[74].mxu0 %vm72_vm1, %v3898_v17  ;;  %4568 = vmatmul.mubr.msk.f32.gmra.mrb[74].mxu1 %vm72_vm1, %v3960_v18 }
  0x9c   :  { %4473 = vmatprep.mubr.msk.f32.mxu0 %vm5586_vm0, %v7915_v4  ;;  %4570 = vmatprep.mubr.msk.f32.mxu1 %vm5586_vm0, %v7915_v4 }
  0x9f   :  { %4474 = vmatmul.mubr.msk.f32.gmra.mrb[76].mxu0 %vm72_vm1, %v3899_v19  ;;  %4571 = vmatmul.mubr.msk.f32.gmra.mrb[76].mxu1 %vm72_vm1, %v3961_v20 }
  0xa0   :  { %4476 = vmatprep.mubr.msk.f32.mxu0 %vm5586_vm0, %v7915_v4  ;;  %4573 = vmatprep.mubr.msk.f32.mxu1 %vm5586_vm0, %v7915_v4 }
  0xa3   :  { %4477 = vmatmul.mubr.msk.f32.gmra.mrb[78].mxu0 %vm72_vm1, %v3900_v21  ;;  %4574 = vmatmul.mubr.msk.f32.gmra.mrb[78].mxu1 %vm72_vm1, %v3962_v22  ;;  %v3919_v22 = vld [vmem:[%s7903_s0 + $0x2c8] sm:$0xff] }
  0xa4   :  { %4479 = vmatprep.mubr.msk.f32.mxu0 %vm5586_vm0, %v7915_v4  ;;  %4576 = vmatprep.mubr.msk.f32.mxu1 %vm5586_vm0, %v7915_v4 }
  0xa7   :  { %4480 = vmatmul.mubr.msk.f32.gmra.mrb[80].mxu0 %vm72_vm1, %v3901_v23  ;;  %4577 = vmatmul.mubr.msk.f32.gmra.mrb[80].mxu1 %vm72_vm1, %v3963_v24  ;;  %v3981_v23 = vld [vmem:[%s7903_s0 + $0x3c0] sm:$0xff] }
  0xa8   :  { %4482 = vmatprep.mubr.msk.f32.mxu0 %vm5586_vm0, %v7915_v4  ;;  %4579 = vmatprep.mubr.msk.f32.mxu1 %vm5586_vm0, %v7915_v4 }
  0xab   :  { %4483 = vmatmul.mubr.msk.f32.gmra.mrb[82].mxu0 %vm72_vm1, %v3902_v25  ;;  %4580 = vmatmul.mubr.msk.f32.gmra.mrb[82].mxu1 %vm72_vm1, %v3964_v26 }
  0xac   :  { %4485 = vmatprep.mubr.msk.f32.mxu0 %vm5586_vm0, %v7915_v4  ;;  %4582 = vmatprep.mubr.msk.f32.mxu1 %vm5586_vm0, %v7915_v4 }
  0xaf   :  { %4486 = vmatmul.mubr.msk.f32.gmra.mrb[84].mxu0 %vm72_vm1, %v3903_v27  ;;  %4583 = vmatmul.mubr.msk.f32.gmra.mrb[84].mxu1 %vm72_vm1, %v3965_v28 }
  0xb0   :  { %4488 = vmatprep.mubr.msk.f32.mxu0 %vm5586_vm0, %v7915_v4  ;;  %4585 = vmatprep.mubr.msk.f32.mxu1 %vm5586_vm0, %v7915_v4 }
  0xb3   :  { %4489 = vmatmul.mubr.msk.f32.gmra.mrb[86].mxu0 %vm72_vm1, %v3904_v29  ;;  %4586 = vmatmul.mubr.msk.f32.gmra.mrb[86].mxu1 %vm72_vm1, %v3966_v30  ;;  %v3920_v29 = vld [vmem:[%s7903_s0 + $0x2d0] sm:$0xff]  ;;  %v3982_v30 = vld [vmem:[%s7903_s0 + $0x3c8] sm:$0xff] }
  0xb4   :  { %4491 = vmatprep.mubr.msk.f32.mxu0 %vm5586_vm0, %v7915_v4  ;;  %4588 = vmatprep.mubr.msk.f32.mxu1 %vm5586_vm0, %v7915_v4 }
  0xb7   :  { %4492 = vmatmul.mubr.msk.f32.gmra.mrb[88].mxu0 %vm72_vm1, %v3905_v31  ;;  %4589 = vmatmul.mubr.msk.f32.gmra.mrb[88].mxu1 %vm72_vm1, %v3967_v32 }
  0xb8   :  { %4494 = vmatprep.mubr.msk.f32.mxu0 %vm5586_vm0, %v7915_v4  ;;  %4591 = vmatprep.mubr.msk.f32.mxu1 %vm5586_vm0, %v7915_v4 }
  0xbb   :  { %4495 = vmatmul.mubr.msk.f32.gmra.mrb[90].mxu0 %vm72_vm1, %v3906_v33  ;;  %4592 = vmatmul.mubr.msk.f32.gmra.mrb[90].mxu1 %vm72_vm1, %v3968_v34 }
  0xbc   :  { %4497 = vmatprep.mubr.msk.f32.mxu0 %vm5586_vm0, %v7915_v4  ;;  %4594 = vmatprep.mubr.msk.f32.mxu1 %vm5586_vm0, %v7915_v4 }
  0xbf   :  { %4498 = vmatmul.mubr.msk.f32.gmra.mrb[92].mxu0 %vm72_vm1, %v3907_v35  ;;  %4595 = vmatmul.mubr.msk.f32.gmra.mrb[92].mxu1 %vm72_vm1, %v3969_v36  ;;  %v3921_v36 = vld [vmem:[%s7903_s0 + $0x2d8] sm:$0xff] }
  0xc0   :  { %4500 = vmatprep.mubr.msk.f32.mxu0 %vm5586_vm0, %v7915_v4  ;;  %4597 = vmatprep.mubr.msk.f32.mxu1 %vm5586_vm0, %v7915_v4 }
  0xc3   :  { %4501 = vmatmul.mubr.msk.f32.gmra.mrb[94].mxu0 %vm72_vm1, %v3908_v37  ;;  %4598 = vmatmul.mubr.msk.f32.gmra.mrb[94].mxu1 %vm72_vm1, %v3970_v38  ;;  %v3983_v37 = vld [vmem:[%s7903_s0 + $0x3d0] sm:$0xff] }
  0xc4   :  { %4503 = vmatprep.mubr.msk.f32.mxu0 %vm5586_vm0, %v7915_v4  ;;  %4600 = vmatprep.mubr.msk.f32.mxu1 %vm5586_vm0, %v7915_v4 }
  0xc7   :  { %4504 = vmatmul.mubr.msk.f32.gmra.mrb[96].mxu0 %vm72_vm1, %v3909_v39  ;;  %4601 = vmatmul.mubr.msk.f32.gmra.mrb[96].mxu1 %vm72_vm1, %v3971_v40 }
  0xc8   :  { %4506 = vmatprep.mubr.msk.f32.mxu0 %vm5586_vm0, %v7915_v4  ;;  %4603 = vmatprep.mubr.msk.f32.mxu1 %vm5586_vm0, %v7915_v4 }
  0xcb   :  { %4507 = vmatmul.mubr.msk.f32.gmra.mrb[98].mxu0 %vm72_vm1, %v3910_v41  ;;  %4604 = vmatmul.mubr.msk.f32.gmra.mrb[98].mxu1 %vm72_vm1, %v3972_v42 }
  0xcc   :  { %4509 = vmatprep.mubr.msk.f32.mxu0 %vm5586_vm0, %v7915_v4  ;;  %4606 = vmatprep.mubr.msk.f32.mxu1 %vm5586_vm0, %v7915_v4 }
  0xcf   :  { %4510 = vmatmul.mubr.msk.f32.gmra.mrb[100].mxu0 %vm72_vm1, %v3911_v43  ;;  %4607 = vmatmul.mubr.msk.f32.gmra.mrb[100].mxu1 %vm72_vm1, %v3973_v44  ;;  %v3922_v43 = vld [vmem:[%s7903_s0 + $0x2e0] sm:$0x3]  ;;  %v3984_v44 = vld [vmem:[%s7903_s0 + $0x3d8] sm:$0x3] }
  0xd0   :  { %4512 = vmatprep.mubr.msk.f32.mxu0 %vm5586_vm0, %v7915_v4  ;;  %4609 = vmatprep.mubr.msk.f32.mxu1 %vm5586_vm0, %v7915_v4 }
  0xd3   :  { %4513 = vmatmul.mubr.msk.f32.gmra.mrb[102].mxu0 %vm72_vm1, %v3912_v45  ;;  %4610 = vmatmul.mubr.msk.f32.gmra.mrb[102].mxu1 %vm72_vm1, %v3974_v46 }
  0xd4   :  { %4515 = vmatprep.mubr.msk.f32.mxu0 %vm5586_vm0, %v7915_v4  ;;  %4612 = vmatprep.mubr.msk.f32.mxu1 %vm5586_vm0, %v7915_v4 }
  0xd7   :  { %4516 = vmatmul.mubr.msk.f32.gmra.mrb[104].mxu0 %vm72_vm1, %v3913_v47  ;;  %4613 = vmatmul.mubr.msk.f32.gmra.mrb[104].mxu1 %vm72_vm1, %v3975_v48 }
  0xd8   :  { %4518 = vmatprep.mubr.msk.f32.mxu0 %vm5586_vm0, %v7915_v4  ;;  %4615 = vmatprep.mubr.msk.f32.mxu1 %vm5586_vm0, %v7915_v4 }
  0xda   :  { %v6320_v51 = vpop.f32.mrb[0].mxu0  ;;  %v6322_v52 = vpop.f32.mrb[0].mxu1 }
  0xdb   :  { %v4260_v53 = vpop.f32.mrb[1].mxu0  ;;  %4519 = vmatmul.mubr.msk.f32.gmra.mrb[106].mxu0 %vm72_vm1, %v3914_v49  ;;  %v4357_v55 = vpop.f32.mrb[1].mxu1  ;;  %4616 = vmatmul.mubr.msk.f32.gmra.mrb[106].mxu1 %vm72_vm1, %v3976_v50 }
  0xdc   :  { %4521 = vmatprep.mubr.msk.f32.mxu0 %vm5586_vm0, %v7915_v4  ;;  %4618 = vmatprep.mubr.msk.f32.mxu1 %vm5586_vm0, %v7915_v4 }
  0xde   :  { %v6338_v58 = vpop.f32.mrb[2].mxu0  ;;  %v6340_v59 = vpop.f32.mrb[2].mxu1 }
  0xdf   :  { %v4263_v60 = vpop.f32.mrb[3].mxu0  ;;  %4522 = vmatmul.mubr.msk.f32.gmra.mrb[108].mxu0 %vm72_vm1, %v3915_v56  ;;  %v4360_v62 = vpop.f32.mrb[3].mxu1  ;;  %4619 = vmatmul.mubr.msk.f32.gmra.mrb[108].mxu1 %vm72_vm1, %v3977_v57 }
  0xe0   :  { %4524 = vmatprep.mubr.msk.f32.mxu0 %vm5586_vm0, %v7915_v4  ;;  %4621 = vmatprep.mubr.msk.f32.mxu1 %vm5586_vm0, %v7915_v4 }
  0xe2   :  { %v6356_v1 = vpop.f32.mrb[4].mxu0  ;;  %v6358_v3 = vpop.f32.mrb[4].mxu1 }
  0xe3   :  { %v4266_v5 = vpop.f32.mrb[5].mxu0  ;;  %4525 = vmatmul.mubr.msk.f32.gmra.mrb[110].mxu0 %vm72_vm1, %v3916_v63  ;;  %v4363_v7 = vpop.f32.mrb[5].mxu1  ;;  %4622 = vmatmul.mubr.msk.f32.gmra.mrb[110].mxu1 %vm72_vm1, %v3978_v0 }
  0xe4   :  { %4527 = vmatprep.mubr.msk.f32.mxu0 %vm5586_vm0, %v7915_v4  ;;  %4624 = vmatprep.mubr.msk.f32.mxu1 %vm5586_vm0, %v7915_v4 }
  0xe6   :  { %v6374_v10 = vpop.f32.mrb[6].mxu0  ;;  %v6376_v11 = vpop.f32.mrb[6].mxu1 }
  0xe7   :  { %v4269_v12 = vpop.f32.mrb[7].mxu0  ;;  %4528 = vmatmul.mubr.msk.f32.gmra.mrb[112].mxu0 %vm72_vm1, %v3917_v8  ;;  %v4366_v14 = vpop.f32.mrb[7].mxu1  ;;  %4625 = vmatmul.mubr.msk.f32.gmra.mrb[112].mxu1 %vm72_vm1, %v3979_v9 }
  0xe8   :  { %4530 = vmatprep.mubr.msk.f32.mxu0 %vm5586_vm0, %v7915_v4  ;;  %4627 = vmatprep.mubr.msk.f32.mxu1 %vm5586_vm0, %v7915_v4 }
  0xea   :  { %v6392_v17 = vpop.f32.mrb[8].mxu0  ;;  %v6394_v18 = vpop.f32.mrb[8].mxu1 }
  0xeb   :  { %v4272_v19 = vpop.f32.mrb[9].mxu0  ;;  %4531 = vmatmul.mubr.msk.f32.gmra.mrb[114].mxu0 %vm72_vm1, %v3918_v15  ;;  %v4369_v21 = vpop.f32.mrb[9].mxu1  ;;  %4628 = vmatmul.mubr.msk.f32.gmra.mrb[114].mxu1 %vm72_vm1, %v3980_v16 }
  0xec   :  { %4533 = vmatprep.mubr.msk.f32.mxu0 %vm5586_vm0, %v7915_v4  ;;  %4630 = vmatprep.mubr.msk.f32.mxu1 %vm5586_vm0, %v7915_v4 }
  0xee   :  { %v6410_v24 = vpop.f32.mrb[10].mxu0  ;;  %v6412_v25 = vpop.f32.mrb[10].mxu1 }
  0xef   :  { %v4275_v26 = vpop.f32.mrb[11].mxu0  ;;  %4534 = vmatmul.mubr.msk.f32.gmra.mrb[116].mxu0 %vm72_vm1, %v3919_v22  ;;  %v4372_v28 = vpop.f32.mrb[11].mxu1  ;;  %4631 = vmatmul.mubr.msk.f32.gmra.mrb[116].mxu1 %vm72_vm1, %v3981_v23 }
  0xf0   :  { %4536 = vmatprep.mubr.msk.f32.mxu0 %vm5586_vm0, %v7915_v4  ;;  %4633 = vmatprep.mubr.msk.f32.mxu1 %vm5586_vm0, %v7915_v4 }
  0xf2   :  { %v6428_v31 = vpop.f32.mrb[12].mxu0  ;;  %v6430_v32 = vpop.f32.mrb[12].mxu1 }
  0xf3   :  { %v4278_v33 = vpop.f32.mrb[13].mxu0  ;;  %4537 = vmatmul.mubr.msk.f32.gmra.mrb[118].mxu0 %vm72_vm1, %v3920_v29  ;;  %v4375_v35 = vpop.f32.mrb[13].mxu1  ;;  %4634 = vmatmul.mubr.msk.f32.gmra.mrb[118].mxu1 %vm72_vm1, %v3982_v30 }
  0xf4   :  { %4539 = vmatprep.mubr.msk.f32.mxu0 %vm5586_vm0, %v7915_v4  ;;  %4636 = vmatprep.mubr.msk.f32.mxu1 %vm5586_vm0, %v7915_v4 }
  0xf6   :  { %v6446_v38 = vpop.f32.mrb[14].mxu0  ;;  %v6448_v39 = vpop.f32.mrb[14].mxu1 }
  0xf7   :  { %v4281_v40 = vpop.f32.mrb[15].mxu0  ;;  %4540 = vmatmul.mubr.msk.f32.gmra.mrb[120].mxu0 %vm72_vm1, %v3921_v36  ;;  %v4378_v42 = vpop.f32.mrb[15].mxu1  ;;  %4637 = vmatmul.mubr.msk.f32.gmra.mrb[120].mxu1 %vm72_vm1, %v3983_v37 }
  0xf8   :  { %4542 = vmatprep.mubr.msk.f32.mxu0 %vm5586_vm0, %v7915_v4  ;;  %4639 = vmatprep.mubr.msk.f32.mxu1 %vm5586_vm0, %v7915_v4 }
  0xfa   :  { %v6464_v45 = vpop.f32.mrb[16].mxu0  ;;  %v6466_v46 = vpop.f32.mrb[16].mxu1 }
  0xfb   :  { %v4284_v47 = vpop.f32.mrb[17].mxu0  ;;  %4543 = vmatmul.mubr.msk.f32.gmra.mrb[122].mxu0 %vm72_vm1, %v3922_v43  ;;  %v4381_v49 = vpop.f32.mrb[17].mxu1  ;;  %4640 = vmatmul.mubr.msk.f32.gmra.mrb[122].mxu1 %vm72_vm1, %v3984_v44 }
  0xfe   :  { %v6472_v50 = vpop.f32.mrb[18].mxu0  ;;  %v6474_v53 = vpop.f32.mrb[18].mxu1 }
  0xff   :  { %v4287_v55 = vpop.f32.mrb[19].mxu0  ;;  %v4384_v57 = vpop.f32.mrb[19].mxu1 }
 0x102   :  { %v6478_v60 = vpop.f32.mrb[20].mxu0  ;;  %v6480_v62 = vpop.f32.mrb[20].mxu1 }
 0x103   :  { %v4290_v63 = vpop.f32.mrb[21].mxu0  ;;  %v4387_v5 = vpop.f32.mrb[21].mxu1 }
 0x106   :  { %v6484_v7 = vpop.f32.mrb[22].mxu0  ;;  %v6486_v8 = vpop.f32.mrb[22].mxu1 }
 0x107   :  { %v4293_v9 = vpop.f32.mrb[23].mxu0  ;;  %v4390_v14 = vpop.f32.mrb[23].mxu1 }
 0x10a   :  { %v6490_v15 = vpop.f32.mrb[24].mxu0  ;;  %v6492_v16 = vpop.f32.mrb[24].mxu1 }
 0x10b   :  { %v4296_v19 = vpop.f32.mrb[25].mxu0  ;;  %v4393_v22 = vpop.f32.mrb[25].mxu1 }
 0x10e   :  { %v6496_v23 = vpop.f32.mrb[26].mxu0  ;;  %v6498_v26 = vpop.f32.mrb[26].mxu1 }
 0x10f   :  { %v4299_v28 = vpop.f32.mrb[27].mxu0  ;;  %v4396_v30 = vpop.f32.mrb[27].mxu1 }
 0x112   :  { %v6502_v33 = vpop.f32.mrb[28].mxu0  ;;  %v6504_v35 = vpop.f32.mrb[28].mxu1 }
 0x113   :  { %v4302_v36 = vpop.f32.mrb[29].mxu0  ;;  %v4399_v40 = vpop.f32.mrb[29].mxu1 }
 0x116   :  { %v6508_v42 = vpop.f32.mrb[30].mxu0  ;;  %v6510_v43 = vpop.f32.mrb[30].mxu1 }
 0x117   :  { %v4305_v44 = vpop.f32.mrb[31].mxu0  ;;  %v4402_v49 = vpop.f32.mrb[31].mxu1 }
 0x11a   :  { %v6514_v55 = vpop.f32.mrb[32].mxu0  ;;  %v6516_v57 = vpop.f32.mrb[32].mxu1 }
 0x11b   :  { %v4308_v63 = vpop.f32.mrb[33].mxu0  ;;  %v4405_v9 = vpop.f32.mrb[33].mxu1 }
 0x11e   :  { %v6520_v14 = vpop.f32.mrb[34].mxu0  ;;  %v6522_v19 = vpop.f32.mrb[34].mxu1 }
 0x11f   :  { %v4311_v22 = vpop.f32.mrb[35].mxu0  ;;  %v4408_v30 = vpop.f32.mrb[35].mxu1 }
 0x122   :  { %v6526_v36 = vpop.f32.mrb[36].mxu0  ;;  %v6528_v40 = vpop.f32.mrb[36].mxu1 }
 0x123   :  { %v4314_v44 = vpop.f32.mrb[37].mxu0  ;;  %v4411_v63 = vpop.f32.mrb[37].mxu1 }
 0x126   :  { %v6532_v4 = vpop.f32.mrb[38].mxu0  ;;  %v6534_v9 = vpop.f32.mrb[38].mxu1 }
 0x127   :  { %v4317_v2 = vpop.f32.mrb[39].mxu0  ;;  %v4414_v5 = vpop.f32.mrb[39].mxu1 }
 0x12a   :  { %v6538_v28 = vpop.f32.mrb[40].mxu0  ;;  %v6540_v30 = vpop.f32.mrb[40].mxu1 }
 0x12b   :  { %v4320_v47 = vpop.f32.mrb[41].mxu0  ;;  %v4417_v37 = vpop.f32.mrb[41].mxu1 }
 0x12e   :  { %v6544_v49 = vpop.f32.mrb[42].mxu0  ;;  %v6546_v63 = vpop.f32.mrb[42].mxu1 }
 0x12f   :  { %v4323_v29 = vpop.f32.mrb[43].mxu0  ;;  %v4420_v21 = vpop.f32.mrb[43].mxu1 }
 0x132   :  { %v6550_v22 = vpop.f32.mrb[44].mxu0  ;;  %v6552_v5 = vpop.f32.mrb[44].mxu1 }
 0x133   :  { %v4326_v12 = vpop.f32.mrb[45].mxu0  ;;  %v4423_v0 = vpop.f32.mrb[45].mxu1 }
 0x136   :  { %v6556_v44 = vpop.f32.mrb[46].mxu0  ;;  %v6558_v37 = vpop.f32.mrb[46].mxu1 }
 0x137   :  { %7933 = vst [vmem:[#allocation8_spill] sm:$0xff] %v6556_v44  ;;  %7934 = vst [vmem:[#allocation9_spill] sm:$0xff] %v6558_v37  ;;  %v4329_v56 = vpop.f32.mrb[47].mxu0  ;;  %v4426_v48 = vpop.f32.mrb[47].mxu1 }
 0x13a   :  { %v6562_v2 = vpop.f32.mrb[48].mxu0  ;;  %v6564_v21 = vpop.f32.mrb[48].mxu1 }
 0x13b   :  { %7935 = vst [vmem:[#allocation10_spill] sm:$0xff] %v6562_v2  ;;  %7936 = vst [vmem:[#allocation11_spill] sm:$0xff] %v6564_v21  ;;  %v4332_v41 = vpop.f32.mrb[49].mxu0  ;;  %v4429_v34 = vpop.f32.mrb[49].mxu1 }
 0x13e   :  { %v6568_v47 = vpop.f32.mrb[50].mxu0  ;;  %v6570_v0 = vpop.f32.mrb[50].mxu1 }
 0x13f   :  { %7937 = vst [vmem:[#allocation12_spill] sm:$0xff] %v6568_v47  ;;  %7938 = vst [vmem:[#allocation13_spill] sm:$0xff] %v6570_v0  ;;  %v4335_v27 = vpop.f32.mrb[51].mxu0  ;;  %v4432_v20 = vpop.f32.mrb[51].mxu1 }
 0x142   :  { %v6574_v29 = vpop.f32.mrb[52].mxu0  ;;  %v6576_v48 = vpop.f32.mrb[52].mxu1 }
 0x143   :  { %7939 = vst [vmem:[#allocation14_spill] sm:$0xff] %v6574_v29  ;;  %7940 = vst [vmem:[#allocation15_spill] sm:$0xff] %v6576_v48  ;;  %v4338_v13 = vpop.f32.mrb[53].mxu0  ;;  %v4435_v6 = vpop.f32.mrb[53].mxu1 }
 0x144   :  { %v7947_v13 = vmax.f32 %v6320_v51, %v6322_v52 }
 0x146   :  { %v6580_v12 = vpop.f32.mrb[54].mxu0  ;;  %v6582_v34 = vpop.f32.mrb[54].mxu1 }
 0x147   :  { %7941 = vst [vmem:[#allocation16_spill] sm:$0xff] %v6580_v12  ;;  %7942 = vst [vmem:[#allocation17_spill] sm:$0xff] %v6582_v34  ;;  %v4341_v61 = vpop.f32.mrb[55].mxu0  ;;  %v4438_v54 = vpop.f32.mrb[55].mxu1 }
 0x14a   :  { %v6586_v56 = vpop.f32.mrb[56].mxu0  ;;  %v6588_v20 = vpop.f32.mrb[56].mxu1 }
 0x14b   :  { %7943 = vst [vmem:[#allocation18_spill] sm:$0xff] %v6586_v56  ;;  %7944 = vst [vmem:[#allocation19_spill] sm:$0xff] %v6588_v20  ;;  %v4344_v0 = vpop.f32.mrb[57].mxu0  ;;  %v4441_v47 = vpop.f32.mrb[57].mxu1 }
 0x14e   :  { %v6592_v41 = vpop.f32.mrb[58].mxu0  ;;  %v6594_v6 = vpop.f32.mrb[58].mxu1 }
 0x14f   :  { %7945 = vst [vmem:[#allocation20_spill] sm:$0xff] %v6592_v41  ;;  %7946 = vst [vmem:[#allocation21_spill] sm:$0xff] %v6594_v6  ;;  %v4347_v48 = vpop.f32.mrb[59].mxu0  ;;  %v4444_v29 = vpop.f32.mrb[59].mxu1 }
 0x150   :  { %v6604_v48 = vld [vmem:[%s7905_s2] ss:$0 sm:$0xff]  ;;  %s5588_s2 = smov 24  }
 0x152   :  { %v382_v27 = vpop.f32.mrb[60].mxu0  ;;  %v789_v54 = vpop.f32.mrb[60].mxu1 }
 0x153   :  { %416 = vst [vmem:[#allocation2 + $0xf0] sm:$0x3] %v382_v27  ;;  %v4350_v34 = vpop.f32.mrb[61].mxu0  ;;  %v4447_v12 = vpop.f32.mrb[61].mxu1 }
 0x154   :  { %v7948_v12 = vmax.f32 %v6338_v58, %v6340_v59 }
 0x156   :  { %v1077_v21 = vpop.f32.mrb[62].mxu0  ;;  %v1515_v0 = vpop.f32.mrb[62].mxu1 }
 0x157   :  { %v1231_v47 = vmax.f32 %v7947_v13, %v1077_v21  ;;  %v4454_v20 = vpop.f32.mrb[63].mxu0  ;;  %v4551_v56 = vpop.f32.mrb[63].mxu1 }
 0x159   :  { %v1669_v61 = vmax.f32 %v1231_v47, %v1515_v0  ;;  %v7949_v0 = vmax.f32 %v6356_v1, %v6358_v3 }
 0x15a   :  { %v1082_v29 = vpop.f32.mrb[64].mxu0  ;;  %v447_v6 = vld [vmem:[#allocation2 + $0xf0] sm:$0x3]  ;;  %v1520_v41 = vpop.f32.mrb[64].mxu1 }
 0x15b   :  { %v1232_v34 = vmax.f32 %v7948_v12, %v1082_v29  ;;  %v823_v27 = vmax.f32 %v447_v6, %v789_v54  ;;  %v4457_v2 = vpop.f32.mrb[65].mxu0  ;;  %v1769_v51 = vadd.f32 %v6604_v48, %v1669_v61  ;;  %v4554_v52 = vpop.f32.mrb[65].mxu1  ;;  %v7950_v61 = vmax.f32 %v6374_v10, %v6376_v11 }
 0x15d   :  { %854 = vst [vmem:[#allocation2 + $0xf0] sm:$0x3] %v823_v27  ;;  %v1800_v21 = vmax.f32 %v1769_v51, 0.0  ;;  %v1670_v56 = vmax.f32 %v1232_v34, %v1520_v41  ;;  %v7951_v51 = vmax.f32 %v6392_v17, %v6394_v18 }
 0x15e   :  { %v1087_v20 = vpop.f32.mrb[66].mxu0  ;;  %v1525_v13 = vpop.f32.mrb[66].mxu1 }
 0x15f   :  { %v1233_v47 = vmax.f32 %v7949_v0, %v1087_v20  ;;  %v4460_v37 = vpop.f32.mrb[67].mxu0  ;;  %1831 = vst [vmem:[#allocation2] sm:$0xff] %v1800_v21  ;;  %v1770_v44 = vadd.f32 %v6604_v48, %v1670_v56  ;;  %v4557_v58 = vpop.f32.mrb[67].mxu1  ;;  %v7952_v0 = vmax.f32 %v6410_v24, %v6412_v25 }
 0x161   :  { %v1801_v59 = vmax.f32 %v1770_v44, 0.0  ;;  %v1671_v6 = vmax.f32 %v1233_v47, %v1525_v13 }
 0x162   :  { %v1092_v2 = vpop.f32.mrb[68].mxu0  ;;  %v1530_v54 = vpop.f32.mrb[68].mxu1 }
 0x163   :  { %v1234_v29 = vmax.f32 %v7950_v61, %v1092_v2  ;;  %v4463_v41 = vpop.f32.mrb[69].mxu0  ;;  %1832 = vst [vmem:[#allocation2 + $0x8] sm:$0xff] %v1801_v59  ;;  %v1771_v12 = vadd.f32 %v6604_v48, %v1671_v6  ;;  %v4560_v34 = vpop.f32.mrb[69].mxu1 }
 0x164   :  { %v7953_v34 = vmax.f32 %v6428_v31, %v6430_v32 }
 0x165   :  { %v1802_v1 = vmax.f32 %v1771_v12, 0.0  ;;  %v1672_v3 = vmax.f32 %v1234_v29, %v1530_v54 }
 0x166   :  { %v1097_v37 = vpop.f32.mrb[70].mxu0  ;;  %v1535_v27 = vpop.f32.mrb[70].mxu1 }
 0x167   :  { %v1235_v44 = vmax.f32 %v7951_v51, %v1097_v37  ;;  %v4466_v52 = vpop.f32.mrb[71].mxu0  ;;  %1833 = vst [vmem:[#allocation2 + $0x10] sm:$0xff] %v1802_v1  ;;  %v1772_v21 = vadd.f32 %v6604_v48, %v1672_v3  ;;  %v4563_v56 = vpop.f32.mrb[71].mxu1 }
 0x169   :  { %v6622_v10 = vmax.f32 %v1772_v21, 0.0  ;;  %v1673_v11 = vmax.f32 %v1235_v44, %v1535_v27 }
 0x16a   :  { %v1102_v20 = vpop.f32.mrb[72].mxu0  ;;  %v1540_v13 = vpop.f32.mrb[72].mxu1  ;;  %v1910_v2 = vld [vmem:[#allocation2 + $0x3] sm:$0xff] }
 0x16b   :  { %v1236_v47 = vmax.f32 %v7952_v0, %v1102_v20  ;;  %v4469_v58 = vpop.f32.mrb[73].mxu0  ;;  %1834 = vst [vmem:[#allocation2 + $0x18] sm:$0xff] %v6622_v10  ;;  %v1773_v17 = vadd.f32 %v6604_v48, %v1673_v11  ;;  %v4566_v18 = vpop.f32.mrb[73].mxu1  ;;  %v1878_v41 = vld [vmem:[#allocation2 + $0x1] sm:$0xff]  ;;  %v7954_v20 = vmax.f32 %v6446_v38, %v6448_v39 }
 0x16c   :  { %v1894_v32 = vld [vmem:[#allocation2 + $0x2] sm:$0xff] }
 0x16d   :  { %v1804_v59 = vmax.f32 %v1773_v17, 0.0  ;;  %v1674_v6 = vmax.f32 %v1236_v47, %v1540_v13 }
 0x16e   :  { %v1107_v54 = vpop.f32.mrb[74].mxu0  ;;  %v1545_v61 = vpop.f32.mrb[74].mxu1  ;;  %v6629_v29 = vld [vmem:[#allocation2 + $0xe] sm:$0xff] }
 0x16f   :  { %v1879_v12 = vld [vmem:[#allocation2 + $0xc] sm:$0xff]  ;;  %v1237_v24 = vmax.f32 %v7953_v34, %v1107_v54  ;;  %1835 = vst [vmem:[#allocation2 + $0x20] sm:$0xff] %v1804_v59  ;;  %v4472_v25 = vpop.f32.mrb[75].mxu0  ;;  %v1774_v1 = vadd.f32 %v6604_v48, %v1674_v6  ;;  %v4569_v3 = vpop.f32.mrb[75].mxu1  ;;  %v4921_v37 = vpack.i.bf16 %v6629_v29, %v1910_v2  ;;  %v7955_v54 = vmax.f32 %v6464_v45, %v6466_v46 }
 0x170   :  { %v4911_v27 = vpack.i.bf16 %v1879_v12, %v1878_v41  ;;  %v1895_v51 = vld [vmem:[#allocation2 + $0xd] sm:$0xff] }
 0x171   :  { %v1805_v44 = vmax.f32 %v1774_v1, 0.0  ;;  %v1675_v52 = vmax.f32 %v1237_v24, %v1545_v61  ;;  %4922 = vrot.lane.b32.xlu1 %v4921_v37, %s5588_s2  ;;  %v6638_v56 = vld [vmem:[#allocation2 + $0xb] sm:$0xff]  ;;  %v4916_v17 = vpack.i.bf16 %v1895_v51, %v1894_v32  ;;  %v3010_v1 = vld [vmem:[%s7906_s3] sm:$0xff] }
 0x172   :  { %4912 = vrot.lane.b32.xlu0 %v4911_v27, %s5589_s29  ;;  %v1112_v21 = vpop.f32.mrb[76].mxu0  ;;  %v1550_v31 = vpop.f32.mrb[76].mxu1  ;;  %v6640_v11 = vld [vmem:[#allocation2 + $0x16] sm:$0xff]  ;;  %v3011_v3 = vld [vmem:[%s7906_s3 + $0x8] sm:$0xff] }
 0x173   :  { %v1238_v13 = vmax.f32 %v7954_v20, %v1112_v21  ;;  %1836 = vst [vmem:[#allocation2 + $0x28] sm:$0xff] %v1805_v44  ;;  %v4475_v0 = vpop.f32.mrb[77].mxu0  ;;  %v1775_v47 = vadd.f32 %v6604_v48, %v1675_v52  ;;  %v4572_v58 = vpop.f32.mrb[77].mxu1  ;;  %v4926_v18 = vpack.i.bf16 %v6640_v11, %v6638_v56  ;;  %v1880_v59 = vld [vmem:[#allocation2 + $0x17] sm:$0xff]  ;;  %v4780_v45 = vpack.c.bf16 %v3011_v3, %v3010_v1 }
 0x174   :  { %v4931_v24 = vpack.i.bf16 %v1880_v59, %v1879_v12  ;;  %v7956_v12 = vmax.f32 %v6472_v50, %v6474_v53  ;;  %v4936_v0 = vpack.i.bf16 %v6622_v10, %v1895_v51  ;;  %v3012_v50 = vld [vmem:[%s7906_s3 + $0x10] sm:$0xff]  ;;  %v3013_v53 = vld [vmem:[%s7906_s3 + $0x18] sm:$0xff] }
 0x175   :  { %v1806_v6 = vmax.f32 %v1775_v47, 0.0  ;;  %v1676_v2 = vmax.f32 %v1238_v13, %v1550_v31  ;;  %4927 = vrot.lane.b32.xlu1 %v4926_v18, %s5591_s12  ;;  %4781 = vmatprep.subr.bf16.mxu0 %v4780_v45  ;;  %v4784_v51 = vpack.c.bf16 %v3013_v53, %v3012_v50  ;;  %v7959_v53 = vmax.f32 %v6490_v15, %v6492_v16 }
 0x176   :  { %4917 = vrot.lane.b32.xlu0 %v4916_v17, %s5590_s30  ;;  %v1117_v38 = vpop.f32.mrb[78].mxu0  ;;  %v1555_v39 = vpop.f32.mrb[78].mxu1  ;;  %v1912_v20 = vld [vmem:[#allocation2 + $0x19] sm:$0xff]  ;;  %4783 = vmatpush3.bf16.msra.mxu0 %v4780_v45  ;;  %v7958_v45 = vmax.f32 %v6484_v7, %v6486_v8 }
 0x177   :  { %v1239_v61 = vmax.f32 %v7955_v54, %v1117_v38  ;;  %1837 = vst [vmem:[#allocation2 + $0x30] sm:$0xff] %v1806_v6  ;;  %v4478_v41 = vpop.f32.mrb[79].mxu0  ;;  %v1776_v34 = vadd.f32 %v6604_v48, %v1676_v2  ;;  %v4575_v25 = vpop.f32.mrb[79].mxu1  ;;  %v7957_v2 = vmax.f32 %v6478_v60, %v6480_v62  ;;  %4785 = vmatprep.subr.bf16.mxu0 %v4784_v51  ;;  %v3014_v60 = vld [vmem:[%s7906_s3 + $0x20] sm:$0xff]  ;;  %v3015_v62 = vld [vmem:[%s7906_s3 + $0x28] sm:$0xff]  ;;  %v3017_v7 = vld [vmem:[%s7906_s3 + $0x38] sm:$0xff] }
 0x179   :  { %v6660_v37 = vmax.f32 %v1776_v34, 0.0  ;;  %v1677_v27 = vmax.f32 %v1239_v61, %v1555_v39  ;;  %4932 = vrot.lane.b32.xlu1 %v4931_v24, %s5592_s17  ;;  %v4941_v39 = vpack.i.bf16 %v1912_v20, %v6629_v29 }
 0x17a   :  { %v1122_v46 = vpop.f32.mrb[80].mxu0  ;;  %v1560_v44 = vpop.f32.mrb[80].mxu1  ;;  %v6663_v52 = vld [vmem:[#allocation2 + $0x22] sm:$0xff]  ;;  %4787 = vmatpush3.bf16.msra.mxu0 %v4784_v51 }
 0x17b   :  { %v1240_v21 = vmax.f32 %v7956_v12, %v1122_v46  ;;  %1838 = vst [vmem:[#allocation2 + $0x38] sm:$0xff] %v6660_v37  ;;  %v4481_v31 = vpop.f32.mrb[81].mxu0  ;;  %v1777_v32 = vadd.f32 %v6604_v48, %v1677_v27  ;;  %v4578_v13 = vpop.f32.mrb[81].mxu1  ;;  %v6672_v47 = vpack.i.bf16 %v6663_v52, %v1880_v59  ;;  %v6674_v58 = vld [vmem:[#allocation2 + $0x23] sm:$0xff]  ;;  %v4788_v27 = vpack.c.bf16 %v3015_v62, %v3014_v60 }
 0x17c   :  { %v4951_v34 = vpack.i.bf16 %v6674_v58, %v6622_v10  ;;  %v6692_v24 = vld [vmem:[#allocation2 + $0x24] sm:$0xff]  ;;  %v3016_v13 = vld [vmem:[%s7906_s3 + $0x30] sm:$0xff] }
 0x17d   :  { %v1808_v17 = vmax.f32 %v1777_v32, 0.0  ;;  %v1678_v18 = vmax.f32 %v1240_v21, %v1560_v44  ;;  %4937 = vrot.lane.b32.xlu1 %v4936_v0, %s5593_s22  ;;  %4947 = vrot.lane.b32.xlu0 %v6672_v47, %s5589_s29  ;;  %v6694_v25 = vld [vmem:[#allocation2 + $0x21] sm:$0xff]  ;;  %v4956_v31 = vpack.i.bf16 %v6692_v24, %v1912_v20  ;;  %v4792_v20 = vpack.c.bf16 %v3017_v7, %v3016_v13 }
 0x17e   :  { %v1127_v59 = vpop.f32.mrb[82].mxu0  ;;  %v1565_v6 = vpop.f32.mrb[82].mxu1  ;;  %v4961_v32 = vpack.i.bf16 %v6694_v25, %v6640_v11  ;;  %4789 = vmatprep.subr.bf16.mxu0 %v4788_v27 }
 0x17f   :  { %v1241_v38 = vmax.f32 %v7957_v2, %v1127_v59  ;;  %1839 = vst [vmem:[#allocation2 + $0x40] sm:$0xff] %v1808_v17  ;;  %v4484_v54 = vpop.f32.mrb[83].mxu0  ;;  %v1778_v61 = vadd.f32 %v6604_v48, %v1678_v18  ;;  %v4581_v41 = vpop.f32.mrb[83].mxu1  ;;  %4791 = vmatpush3.bf16.msra.mxu0 %v4788_v27  ;;  %v3018_v2 = vld [vmem:[%s7906_s3 + $0x40] sm:$0xff] }
 0x180   :  { %4793 = vmatprep.subr.bf16.mxu0 %v4792_v20  ;;  %v7960_v41 = vmax.f32 %v6496_v23, %v6498_v26  ;;  %v3021_v23 = vld [vmem:[%s7906_s3 + $0x58] sm:$0xff] }
 0x181   :  { %v1809_v29 = vmax.f32 %v1778_v61, 0.0  ;;  %v1679_v1 = vmax.f32 %v1241_v38, %v1565_v6  ;;  %4942 = vrot.lane.b32.xlu1 %v4941_v39, %s5594_s26  ;;  %4952 = vrot.lane.b32.xlu0 %v4951_v34, %s5590_s30  ;;  %v6726_v6 = vld [vmem:[#allocation2 + $0x2d] sm:$0xff] }
 0x182   :  { %v1132_v10 = vpop.f32.mrb[84].mxu0  ;;  %v1570_v3 = vpop.f32.mrb[84].mxu1  ;;  %v3019_v38 = vld [vmem:[%s7906_s3 + $0x48] sm:$0xff] }
 0x183   :  { %v1242_v46 = vmax.f32 %v7958_v45, %v1132_v10  ;;  %1840 = vst [vmem:[#allocation2 + $0x48] sm:$0xff] %v1809_v29  ;;  %v4487_v44 = vpop.f32.mrb[85].mxu0  ;;  %v1779_v12 = vadd.f32 %v6604_v48, %v1679_v1  ;;  %v4584_v21 = vpop.f32.mrb[85].mxu1  ;;  %v4796_v16 = vpack.c.bf16 %v3019_v38, %v3018_v2  ;;  %4795 = vmatpush3.bf16.msra.mxu0 %v4792_v20  ;;  %v6746_v10 = vld [vmem:[#allocation2 + $0x2f] sm:$0xff] }
 0x184   :  { %v7961_v44 = vmax.f32 %v6502_v33, %v6504_v35  ;;  %v6764_v7 = vpack.i.bf16 %v6746_v10, %v6692_v24  ;;  %v3022_v33 = vld [vmem:[%s7906_s3 + $0x60] sm:$0xff]  ;;  %v3023_v35 = vld [vmem:[%s7906_s3 + $0x68] sm:$0xff]  ;;  %v3024_v38 = vld [vmem:[%s7906_s3 + $0x70] sm:$0xff] }
 0x185   :  { %v6717_v8 = vmax.f32 %v1779_v12, 0.0  ;;  %v1680_v0 = vmax.f32 %v1242_v46, %v1570_v3  ;;  %4957 = vrot.lane.b32.xlu0 %v4956_v31, %s5588_s2  ;;  %4962 = vrot.lane.b32.xlu1 %v4961_v32, %s5595_s14  ;;  %v3020_v3 = vld [vmem:[%s7906_s3 + $0x50] sm:$0xff]  ;;  %v4804_v24 = vpack.c.bf16 %v3023_v35, %v3022_v33 }
 0x186   :  { %v1137_v50 = vpop.f32.mrb[86].mxu0  ;;  %v1575_v11 = vpop.f32.mrb[86].mxu1  ;;  %4797 = vmatprep.subr.bf16.mxu0 %v4796_v16  ;;  %v4800_v46 = vpack.c.bf16 %v3021_v23, %v3020_v3  ;;  %v1867_v3 = vld [vmem:[#allocation2 + $0x37] sm:$0xff] }
 0x187   :  { %v1243_v17 = vmax.f32 %v7959_v53, %v1137_v50  ;;  %1841 = vst [vmem:[#allocation2 + $0x50] sm:$0xff] %v6717_v8  ;;  %v4490_v18 = vpop.f32.mrb[87].mxu0  ;;  %v1780_v51 = vadd.f32 %v6604_v48, %v1680_v0  ;;  %v4587_v59 = vpop.f32.mrb[87].mxu1  ;;  %4799 = vmatpush3.bf16.msra.mxu0 %v4796_v16  ;;  %v6768_v0 = vld [vmem:[#allocation2 + $0x2e] sm:$0xff]  ;;  %v7962_v53 = vmax.f32 %v6508_v42, %v6510_v43  ;;  %v6818_v35 = vld [vmem:[#allocation2 + $0x3a] sm:$0xff] }
 0x188   :  { %4801 = vmatprep.subr.bf16.mxu0 %v4800_v46  ;;  %v4991_v2 = vpack.i.bf16 %v6768_v0, %v6674_v58 }
 0x189   :  { %v6734_v39 = vmax.f32 %v1780_v51, 0.0  ;;  %v1681_v15 = vmax.f32 %v1243_v17, %v1575_v11  ;;  %4967 = vrot.lane.b32.xlu0 %v6672_v47, %s5596_s20  ;;  %4972 = vrot.lane.b32.xlu1 %v4951_v34, %s5597_s21  ;;  %v4986_v47 = vpack.i.bf16 %v6726_v6, %v6663_v52  ;;  %v6748_v34 = vld [vmem:[#allocation2 + $0x2c] sm:$0xff] }
 0x18a   :  { %v1142_v54 = vpop.f32.mrb[88].mxu0  ;;  %v1580_v61 = vpop.f32.mrb[88].mxu1 }
 0x18b   :  { %v1244_v60 = vmax.f32 %v7960_v41, %v1142_v54  ;;  %1842 = vst [vmem:[#allocation2 + $0x58] sm:$0xff] %v6734_v39  ;;  %v4493_v62 = vpop.f32.mrb[89].mxu0  ;;  %v1781_v29 = vadd.f32 %v6604_v48, %v1681_v15  ;;  %v4590_v1 = vpop.f32.mrb[89].mxu1  ;;  %4803 = vmatpush3.bf16.msra.mxu0 %v4800_v46  ;;  %v3025_v15 = vld [vmem:[%s7906_s3 + $0x78] sm:$0xff]  ;;  %s5600_s3 = smov 104  }
 0x18c   :  { %4805 = vmatprep.subr.bf16.mxu0 %v4804_v24  ;;  %v4808_v16 = vpack.c.bf16 %v3025_v15, %v3024_v38  ;;  %v5021_v1 = vpack.i.bf16 %v6660_v37, %v6726_v6  ;;  %v6830_v38 = vld [vmem:[#allocation2 + $0x42] sm:$0xff] }
 0x18d   :  { %v1812_v26 = vmax.f32 %v1781_v29, 0.0  ;;  %v1682_v27 = vmax.f32 %v1244_v60, %v1580_v61  ;;  %4977 = vrot.lane.b32.xlu0 %v4956_v31, %s5598_s27  ;;  %4987 = vrot.lane.b32.xlu1 %v4986_v47, %s5592_s17  ;;  %v4981_v31 = vpack.i.bf16 %v6748_v34, %v6694_v25  ;;  %v7963_v61 = vmax.f32 %v6514_v55, %v6516_v57 }
 0x18e   :  { %v1147_v52 = vpop.f32.mrb[90].mxu0  ;;  %v1585_v45 = vpop.f32.mrb[90].mxu1 }
 0x18f   :  { %v1245_v12 = vmax.f32 %v7961_v44, %v1147_v52  ;;  %1843 = vst [vmem:[#allocation2 + $0x60] sm:$0xff] %v1812_v26  ;;  %v4496_v21 = vpop.f32.mrb[91].mxu0  ;;  %v1782_v32 = vadd.f32 %v6604_v48, %v1682_v27  ;;  %v4593_v13 = vpop.f32.mrb[91].mxu1  ;;  %4807 = vmatpush3.bf16.msra.mxu0 %v4804_v24  ;;  %v7964_v27 = vmax.f32 %v6520_v14, %v6522_v19 }
 0x190   :  { %4809 = vmatprep.subr.bf16.mxu0 %v4808_v16  ;;  %v5026_v44 = vpack.i.bf16 %v1867_v3, %v6748_v34  ;;  %v7966_v14 = vmax.f32 %v6526_v36, %v6528_v40  ;;  %v7967_v36 = vmax.f32 %v6532_v4, %v6534_v9 }
 0x191   :  { %v1813_v20 = vmax.f32 %v1782_v32, 0.0  ;;  %v1683_v50 = vmax.f32 %v1245_v12, %v1585_v45  ;;  %4997 = vrot.lane.b32.xlu1 %v6764_v7, %s5594_s26  ;;  %4982 = vrot.lane.b32.xlu0 %v4981_v31, %s5591_s12  ;;  %v7965_v12 = vmov 0.0|0.0  }
 0x192   :  { %v1152_v25 = vpop.f32.mrb[92].mxu0  ;;  %v1590_v11 = vpop.f32.mrb[92].mxu1 }
 0x193   :  { %v1246_v17 = vmax.f32 %v7962_v53, %v1152_v25  ;;  %1844 = vst [vmem:[#allocation2 + $0x68] sm:$0xff] %v1813_v20  ;;  %v4499_v18 = vpop.f32.mrb[93].mxu0  ;;  %v6783_v51 = vadd.f32 %v6604_v48, %v1683_v50  ;;  %v4596_v59 = vpop.f32.mrb[93].mxu1  ;;  %4811 = vmatpush3.bf16.msra.mxu0 %v4808_v16  ;;  %v1899_v20 = vld [vmem:[#allocation2 + $0x39] sm:$0xff] }
 0x194   :  { %4844 = vmatprep.subr.bf16.mxu0 %v7965_v12  ;;  %v5041_v59 = vpack.i.bf16 %v6818_v35, %v6746_v10 }
 0x195   :  { %v1814_v42 = vmax.f32 %v6783_v51, 0.0  ;;  %v1684_v43 = vmax.f32 %v1246_v17, %v1590_v11  ;;  %5002 = vrot.lane.b32.xlu1 %v4981_v31, %s5599_s23  ;;  %4992 = vrot.lane.b32.xlu0 %v4991_v2, %s5593_s22 }
 0x196   :  { %v1157_v54 = vpop.f32.mrb[94].mxu0  ;;  %v1595_v58 = vpop.f32.mrb[94].mxu1 }
 0x197   :  { %v1247_v41 = vmax.f32 %v7963_v61, %v1157_v54  ;;  %1845 = vst [vmem:[#allocation2 + $0x70] sm:$0xff] %v1814_v42  ;;  %v4502_v60 = vpop.f32.mrb[95].mxu0  ;;  %v1784_v62 = vadd.f32 %v6604_v48, %v1684_v43  ;;  %v4599_v29 = vpop.f32.mrb[95].mxu1  ;;  %v7968_v43 = vmax.f32 %v6538_v28, %v6540_v30  ;;  %v6842_v61 = vld [vmem:[#allocation2 + $0x43] sm:$0xff]  ;;  %v7969_v28 = vmax.f32 %v6544_v49, %v6546_v63 }
 0x198   :  { %v7970_v49 = vmax.f32 %v6550_v22, %v6552_v5  ;;  %v7971_v22 = vld [vmem:[#allocation8_spill] sm:$0xff]  ;;  %v7972_v5 = vld [vmem:[#allocation9_spill] sm:$0xff] }
 0x199   :  { %v1815_v23 = vmax.f32 %v1784_v62, 0.0  ;;  %v1685_v26 = vmax.f32 %v1247_v41, %v1595_v58  ;;  %5007 = vrot.lane.b32.xlu1 %v4986_v47, %s5600_s3  ;;  %5022 = vrot.lane.b32.xlu0 %v5021_v1, %s5589_s29  ;;  %v5056_v58 = vpack.i.bf16 %v6830_v38, %v1867_v3  ;;  %v5061_v3 = vpack.i.bf16 %v6842_v61, %v6660_v37 }
 0x19a   :  { %v1162_v55 = vpop.f32.mrb[96].mxu0  ;;  %v1600_v57 = vpop.f32.mrb[96].mxu1 }
 0x19b   :  { %v1248_v52 = vmax.f32 %v7964_v27, %v1162_v55  ;;  %1846 = vst [vmem:[#allocation2 + $0x78] sm:$0xff] %v1815_v23  ;;  %v4505_v45 = vpop.f32.mrb[97].mxu0  ;;  %v1785_v6 = vadd.f32 %v6604_v48, %v1685_v26  ;;  %v4602_v46 = vpop.f32.mrb[97].mxu1  ;;  %v6852_v55 = vld [vmem:[#allocation2 + $0x44] sm:$0xff] }
 0x19c   :  { %v5066_v37 = vpack.i.bf16 %v6852_v55, %v1899_v20 }
 0x19d   :  { %v1816_v21 = vmax.f32 %v1785_v6, 0.0  ;;  %v1686_v47 = vmax.f32 %v1248_v52, %v1600_v57  ;;  %5012 = vrot.lane.b32.xlu1 %v4991_v2, %s5601_s24  ;;  %5027 = vrot.lane.b32.xlu0 %v5026_v44, %s5595_s14  ;;  %v5036_v2 = vpack.i.bf16 %v1899_v20, %v6768_v0 }
 0x19e   :  { %v1167_v32 = vpop.f32.mrb[98].mxu0  ;;  %v1605_v13 = vpop.f32.mrb[98].mxu1 }
 0x19f   :  { %v1249_v19 = vmax.f32 %v7966_v14, %v1167_v32  ;;  %1847 = vst [vmem:[#allocation2 + $0x80] sm:$0xff] %v1816_v21  ;;  %v4508_v31 = vpop.f32.mrb[99].mxu0  ;;  %v1786_v33 = vadd.f32 %v6604_v48, %v1686_v47  ;;  %v4605_v34 = vpop.f32.mrb[99].mxu1  ;;  %v6861_v21 = vld [vmem:[#allocation2 + $0x45] sm:$0xff] }
 0x1a1   :  { %v1817_v50 = vmax.f32 %v1786_v33, 0.0  ;;  %v1687_v24 = vmax.f32 %v1249_v19, %v1605_v13  ;;  %5017 = vrot.lane.b32.xlu1 %v6764_v7, %s5602_s25  ;;  %5032 = vrot.lane.b32.xlu0 %v5021_v1, %s5596_s20  ;;  %v7973_v19 = vmax.f32 %v7971_v22, %v7972_v5 }
 0x1a2   :  { %v1172_v25 = vpop.f32.mrb[100].mxu0  ;;  %v1610_v11 = vpop.f32.mrb[100].mxu1 }
 0x1a3   :  { %v1250_v40 = vmax.f32 %v7967_v36, %v1172_v25  ;;  %1848 = vst [vmem:[#allocation2 + $0x88] sm:$0xff] %v1817_v50  ;;  %v4511_v53 = vpop.f32.mrb[101].mxu0  ;;  %v1787_v17 = vadd.f32 %v6604_v48, %v1687_v24  ;;  %v4608_v18 = vpop.f32.mrb[101].mxu1  ;;  %v5071_v50 = vpack.i.bf16 %v6861_v21, %v6818_v35  ;;  %v1869_v24 = vld [vmem:[#allocation2 + $0x4d] sm:$0xff] }
 0x1a4   :  { %v7974_v53 = vld [vmem:[#allocation10_spill] sm:$0xff] }
 0x1a5   :  { %v6832_v7 = vmax.f32 %v1787_v17, 0.0  ;;  %v1688_v15 = vmax.f32 %v1250_v40, %v1610_v11  ;;  %5042 = vrot.lane.b32.xlu0 %v5041_v59, %s5588_s2  ;;  %5037 = vrot.lane.b32.xlu1 %v5036_v2, %s5590_s30  ;;  %v7975_v17 = vld [vmem:[#allocation11_spill] sm:$0xff] }
 0x1a6   :  { %v1177_v4 = vpop.f32.mrb[102].mxu0  ;;  %v1615_v9 = vpop.f32.mrb[102].mxu1  ;;  %v7976_v18 = vmax.f32 %v7974_v53, %v7975_v17 }
 0x1a7   :  { %v1251_v16 = vmax.f32 %v7968_v43, %v1177_v4  ;;  %1849 = vst [vmem:[#allocation2 + $0x90] sm:$0xff] %v6832_v7  ;;  %v4514_v10 = vpop.f32.mrb[103].mxu0  ;;  %v1788_v0 = vadd.f32 %v6604_v48, %v1688_v15  ;;  %v4611_v54 = vpop.f32.mrb[103].mxu1  ;;  %v5111_v4 = vpack.i.bf16 %v1869_v24, %v6830_v38 }
 0x1a8   :  { %v7977_v54 = vld [vmem:[#allocation12_spill] sm:$0xff] }
 0x1a9   :  { %v1819_v41 = vmax.f32 %v1788_v0, 0.0  ;;  %v1689_v60 = vmax.f32 %v1251_v16, %v1615_v9  ;;  %5047 = vrot.lane.b32.xlu0 %v5036_v2, %s5597_s21  ;;  %5057 = vrot.lane.b32.xlu1 %v5056_v58, %s5591_s12  ;;  %v1885_v9 = vld [vmem:[#allocation2 + $0x4e] sm:$0xff] }
 0x1aa   :  { %v1182_v62 = vpop.f32.mrb[104].mxu0  ;;  %v1620_v29 = vpop.f32.mrb[104].mxu1  ;;  %v5116_v38 = vpack.i.bf16 %v1885_v9, %v6842_v61 }
 0x1ab   :  { %v1252_v30 = vmax.f32 %v7969_v28, %v1182_v62  ;;  %1850 = vst [vmem:[#allocation2 + $0x98] sm:$0xff] %v1819_v41  ;;  %v4517_v1 = vpop.f32.mrb[105].mxu0  ;;  %v1789_v23 = vadd.f32 %v6604_v48, %v1689_v60  ;;  %v4614_v26 = vpop.f32.mrb[105].mxu1 }
 0x1ad   :  { %v1820_v57 = vmax.f32 %v1789_v23, 0.0  ;;  %v1690_v27 = vmax.f32 %v1252_v30, %v1620_v29  ;;  %5052 = vrot.lane.b32.xlu0 %v5041_v59, %s5598_s27  ;;  %5062 = vrot.lane.b32.xlu1 %v5061_v3, %s5592_s17  ;;  %v1901_v30 = vld [vmem:[#allocation2 + $0x4f] sm:$0xff] }
 0x1ae   :  { %v1187_v52 = vpop.f32.mrb[106].mxu0  ;;  %v1625_v45 = vpop.f32.mrb[106].mxu1  ;;  %v5121_v61 = vpack.i.bf16 %v1901_v30, %v6852_v55  ;;  %v5126_v55 = vpack.i.bf16 %v6717_v8, %v6861_v21  ;;  %v1928_v21 = vld [vmem:[#allocation2 + $0x59] sm:$0xff] }
 0x1af   :  { %v1253_v63 = vmax.f32 %v7970_v49, %v1187_v52  ;;  %1851 = vst [vmem:[#allocation2 + $0xa0] sm:$0xff] %v1820_v57  ;;  %v4520_v6 = vpop.f32.mrb[107].mxu0  ;;  %v1790_v46 = vadd.f32 %v6604_v48, %v1690_v27  ;;  %v4617_v44 = vpop.f32.mrb[107].mxu1  ;;  %v7980_v57 = vld [vmem:[#allocation14_spill] sm:$0xff]  ;;  %v7981_v27 = vld [vmem:[#allocation15_spill] sm:$0xff] }
 0x1b0   :  { %v7982_v52 = vmax.f32 %v7980_v57, %v7981_v27 }
 0x1b1   :  { %v6863_v47 = vmax.f32 %v1790_v46, 0.0  ;;  %v1691_v32 = vmax.f32 %v1253_v63, %v1625_v45  ;;  %5077 = vrot.lane.b32.xlu0 %v5056_v58, %s5599_s23  ;;  %5067 = vrot.lane.b32.xlu1 %v5066_v37, %s5593_s22  ;;  %v7978_v58 = vld [vmem:[#allocation13_spill] sm:$0xff] }
 0x1b2   :  { %v1192_v13 = vpop.f32.mrb[108].mxu0  ;;  %v1630_v14 = vpop.f32.mrb[108].mxu1  ;;  %v7979_v41 = vmax.f32 %v7977_v54, %v7978_v58 }
 0x1b3   :  { %v1254_v31 = vmax.f32 %v7973_v19, %v1192_v13  ;;  %1852 = vst [vmem:[#allocation2 + $0xa8] sm:$0xff] %v6863_v47  ;;  %v4523_v33 = vpop.f32.mrb[109].mxu0  ;;  %v1791_v34 = vadd.f32 %v6604_v48, %v1691_v32  ;;  %v4620_v20 = vpop.f32.mrb[109].mxu1  ;;  %v7983_v13 = vld [vmem:[#allocation16_spill] sm:$0xff] }
 0x1b5   :  { %v6874_v25 = vmax.f32 %v1791_v34, 0.0  ;;  %v1692_v11 = vmax.f32 %v1254_v31, %v1630_v14  ;;  %5082 = vrot.lane.b32.xlu0 %v5061_v3, %s5600_s3  ;;  %5072 = vrot.lane.b32.xlu1 %v5071_v50, %s5594_s26  ;;  %v7984_v14 = vld [vmem:[#allocation17_spill] sm:$0xff] }
 0x1b6   :  { %v1197_v36 = vpop.f32.mrb[110].mxu0  ;;  %v1635_v40 = vpop.f32.mrb[110].mxu1  ;;  %v7985_v22 = vmax.f32 %v7983_v13, %v7984_v14  ;;  %v1902_v14 = vld [vmem:[#allocation2 + $0x7b] sm:$0xff] }
 0x1b7   :  { %v1255_v59 = vmax.f32 %v7976_v18, %v1197_v36  ;;  %1853 = vst [vmem:[#allocation2 + $0xb0] sm:$0xff] %v6874_v25  ;;  %v4526_v2 = vpop.f32.mrb[111].mxu0  ;;  %v1792_v15 = vadd.f32 %v6604_v48, %v1692_v11  ;;  %v4623_v35 = vpop.f32.mrb[111].mxu1  ;;  %v7986_v36 = vld [vmem:[#allocation18_spill] sm:$0xff] }
 0x1b9   :  { %v1823_v43 = vmax.f32 %v1792_v15, 0.0  ;;  %v1693_v16 = vmax.f32 %v1255_v59, %v1635_v40  ;;  %5087 = vrot.lane.b32.xlu0 %v5066_v37, %s5601_s24  ;;  %5112 = vrot.lane.b32.xlu1 %v5111_v4, %s5595_s14  ;;  %v7987_v40 = vld [vmem:[#allocation19_spill] sm:$0xff]  ;;  %v5136_v15 = vpack.i.bf16 %v6734_v39, %v1869_v24  ;;  %v1930_v24 = vld [vmem:[#allocation2 + $0x5a] sm:$0xff] }
 0x1ba   :  { %v1202_v10 = vpop.f32.mrb[112].mxu0  ;;  %v1640_v0 = vpop.f32.mrb[112].mxu1  ;;  %v7988_v53 = vmax.f32 %v7986_v36, %v7987_v40  ;;  %v5161_v27 = vpack.i.bf16 %v1930_v24, %v1901_v30 }
 0x1bb   :  { %v1256_v60 = vmax.f32 %v7979_v41, %v1202_v10  ;;  %1854 = vst [vmem:[#allocation2 + $0xb8] sm:$0xff] %v1823_v43  ;;  %v4529_v62 = vpop.f32.mrb[113].mxu0  ;;  %v1793_v29 = vadd.f32 %v6604_v48, %v1693_v16  ;;  %v4626_v28 = vpop.f32.mrb[113].mxu1  ;;  %v7989_v10 = vld [vmem:[#allocation20_spill] sm:$0xff] }
 0x1bd   :  { %v1824_v1 = vmax.f32 %v1793_v29, 0.0  ;;  %v1694_v23 = vmax.f32 %v1256_v60, %v1640_v0  ;;  %5092 = vrot.lane.b32.xlu0 %v5071_v50, %s5602_s25  ;;  %5117 = vrot.lane.b32.xlu1 %v5116_v38, %s5596_s20  ;;  %v7990_v0 = vld [vmem:[#allocation21_spill] sm:$0xff]  ;;  %v5156_v29 = vpack.i.bf16 %v1928_v21, %v1885_v9 }
 0x1be   :  { %v1207_v26 = vpop.f32.mrb[114].mxu0  ;;  %v1645_v3 = vpop.f32.mrb[114].mxu1  ;;  %v7991_v54 = vmax.f32 %v7989_v10, %v7990_v0  ;;  %v1944_v0 = vld [vmem:[#allocation2 + $0x6f] sm:$0xff] }
 0x1bf   :  { %v1257_v45 = vmax.f32 %v7982_v52, %v1207_v26  ;;  %1855 = vst [vmem:[#allocation2 + $0xc0] sm:$0xff] %v1824_v1  ;;  %v4532_v49 = vpop.f32.mrb[115].mxu0  ;;  %v1794_v63 = vadd.f32 %v6604_v48, %v1694_v23  ;;  %v4629_v6 = vpop.f32.mrb[115].mxu1  ;;  %v885_v1 = vld [vmem:[#allocation2 + $0xf0] sm:$0x3] }
 0x1c0   :  { %v1932_v49 = vld [vmem:[#allocation2 + $0x5b] sm:$0xff]  ;;  %v1887_v6 = vld [vmem:[#allocation2 + $0x85] sm:$0xff] }
 0x1c1   :  { %v6898_v46 = vmax.f32 %v1794_v63, 0.0  ;;  %v1695_v44 = vmax.f32 %v1257_v45, %v1645_v3  ;;  %5097 = vrot.lane.b32.xlu0 %v5116_v38, %s5589_s29  ;;  %5122 = vrot.lane.b32.xlu1 %v5121_v61, %s5597_s21  ;;  %v5166_v63 = vpack.i.bf16 %v1932_v49, %v6717_v8 }
 0x1c2   :  { %v1212_v37 = vpop.f32.mrb[116].mxu0  ;;  %v1650_v32 = vpop.f32.mrb[116].mxu1 }
 0x1c3   :  { %v1258_v5 = vmax.f32 %v7985_v22, %v1212_v37  ;;  %1856 = vst [vmem:[#allocation2 + $0xc8] sm:$0xff] %v6898_v46  ;;  %v4535_v19 = vpop.f32.mrb[117].mxu0  ;;  %v1795_v31 = vadd.f32 %v6604_v48, %v1695_v44  ;;  %v4632_v33 = vpop.f32.mrb[117].mxu1  ;;  %v1934_v37 = vld [vmem:[#allocation2 + $0x63] sm:$0xff] }
 0x1c4   :  { %v5171_v22 = vpack.i.bf16 %v1934_v37, %v6734_v39  ;;  %v1919_v19 = vld [vmem:[#allocation2 + $0x87] sm:$0xff] }
 0x1c5   :  { %v1826_v34 = vmax.f32 %v1795_v31, 0.0  ;;  %v1696_v20 = vmax.f32 %v1258_v5, %v1650_v32  ;;  %5102 = vrot.lane.b32.xlu0 %v5121_v61, %s5590_s30  ;;  %5127 = vrot.lane.b32.xlu1 %v5126_v55, %s5598_s27  ;;  %v1886_v61 = vld [vmem:[#allocation2 + $0x7a] sm:$0xff]  ;;  %v1903_v32 = vld [vmem:[#allocation2 + $0x86] sm:$0xff] }
 0x1c6   :  { %v1217_v50 = vpop.f32.mrb[118].mxu0  ;;  %v1655_v11 = vpop.f32.mrb[118].mxu1  ;;  %v5211_v44 = vpack.i.bf16 %v1887_v6, %v1886_v61  ;;  %v5216_v8 = vpack.i.bf16 %v1903_v32, %v1902_v14  ;;  %v1936_v5 = vld [vmem:[#allocation2 + $0x64] sm:$0xff]  ;;  %v1918_v31 = vld [vmem:[#allocation2 + $0x7c] sm:$0xff] }
 0x1c7   :  { %v1259_v17 = vmax.f32 %v7988_v53, %v1217_v50  ;;  %1857 = vst [vmem:[#allocation2 + $0xd0] sm:$0xff] %v1826_v34  ;;  %v4538_v18 = vpop.f32.mrb[119].mxu0  ;;  %v1796_v59 = vadd.f32 %v6604_v48, %v1696_v20  ;;  %v4635_v2 = vpop.f32.mrb[119].mxu1  ;;  %v5176_v33 = vpack.i.bf16 %v1936_v5, %v1928_v21  ;;  %v1938_v34 = vld [vmem:[#allocation2 + $0x65] sm:$0xff]  ;;  %v1872_v20 = vld [vmem:[#allocation2 + $0x8f] sm:$0xff]  ;;  %v5231_v21 = vpack.i.bf16 %v6832_v7, %v1887_v6  ;;  %v6982_v6 = vld [vmem:[#allocation2 + $0x9d] sm:$0xff] }
 0x1c8   :  { %v5181_v40 = vpack.i.bf16 %v1938_v34, %v1930_v24 }
 0x1c9   :  { %v1827_v35 = vmax.f32 %v1796_v59, 0.0  ;;  %v1697_v4 = vmax.f32 %v1259_v17, %v1655_v11  ;;  %5107 = vrot.lane.b32.xlu0 %v5126_v55, %s5588_s2  ;;  %5137 = vrot.lane.b32.xlu1 %v5136_v15, %s5599_s23  ;;  %v5221_v55 = vpack.i.bf16 %v1919_v19, %v1918_v31  ;;  %v6937_v11 = vld [vmem:[#allocation2 + $0x84] sm:$0xff] }
 0x1ca   :  { %v1222_v43 = vpop.f32.mrb[120].mxu0  ;;  %v1660_v16 = vpop.f32.mrb[120].mxu1  ;;  %v5226_v53 = vpack.i.bf16 %v1872_v20, %v6937_v11  ;;  %v1940_v17 = vld [vmem:[#allocation2 + $0x66] sm:$0xff] }
 0x1cb   :  { %v1260_v58 = vmax.f32 %v7991_v54, %v1222_v43  ;;  %1858 = vst [vmem:[#allocation2 + $0xd8] sm:$0xff] %v1827_v35  ;;  %v4541_v41 = vpop.f32.mrb[121].mxu0  ;;  %v1797_v60 = vadd.f32 %v6604_v48, %v1697_v4  ;;  %v4638_v62 = vpop.f32.mrb[121].mxu1  ;;  %v1942_v35 = vld [vmem:[#allocation2 + $0x6e] sm:$0xff] }
 0x1cc   :  { %v1920_v54 = vld [vmem:[#allocation2 + $0x92] sm:$0xff] }
 0x1cd   :  { %v1828_v28 = vmax.f32 %v1797_v60, 0.0  ;;  %v1698_v38 = vmax.f32 %v1260_v58, %v1660_v16  ;;  %5132 = vrot.lane.b32.xlu0 %v5136_v15, %s5591_s12  ;;  %5157 = vrot.lane.b32.xlu1 %v5156_v29, %s5600_s3  ;;  %v5186_v15 = vpack.i.bf16 %v1940_v17, %v1932_v49  ;;  %v5191_v16 = vpack.i.bf16 %v1942_v35, %v1934_v37 }
 0x1ce   :  { %v1227_v23 = vpop.f32.mrb[122].mxu0  ;;  %v1665_v26 = vpop.f32.mrb[122].mxu1  ;;  %v5196_v60 = vpack.i.bf16 %v1944_v0, %v1936_v5  ;;  %v5241_v62 = vpack.i.bf16 %v1920_v54, %v1919_v19 }
 0x1cf   :  { %v1261_v3 = vmax.f32 %v885_v1, %v1227_v23  ;;  %1859 = vst [vmem:[#allocation2 + $0xe0] sm:$0xff] %v1828_v28  ;;  %v1798_v57 = vadd.f32 %v6604_v48, %v1698_v38  ;;  %v4544_v52 = vpop.f32.mrb[123].mxu0  ;;  %v4641_v45 = vpop.f32.mrb[123].mxu1  ;;  %v5201_v38 = vpack.i.bf16 %v1814_v42, %v1938_v34  ;;  %v1948_v23 = vld [vmem:[#allocation2 + $0x71] sm:$0xff]  ;;  %v7007_v34 = vld [vmem:[#allocation2 + $0xa6] sm:$0xff] }
 0x1d0   :  { %v6973_v45 = vld [vmem:[#allocation2 + $0x9c] sm:$0xff] }
 0x1d1   :  { %1292 = vst [vmem:[#allocation2 + $0xf0] sm:$0x3] %v1261_v3  ;;  %v1829_v9 = vmax.f32 %v1798_v57, 0.0  ;;  %5162 = vrot.lane.b32.xlu1 %v5161_v27, %s5601_s24  ;;  %5142 = vrot.lane.b32.xlu0 %v5156_v29, %s5592_s17  ;;  %v1873_v29 = vld [vmem:[#allocation2 + $0x9a] sm:$0xff] }
 0x1d2   :  { %v5261_v1 = vpack.i.bf16 %v1873_v29, %v1872_v20 }
 0x1d3   :  { %1860 = vst [vmem:[#allocation2 + $0xe8] sm:$0xff] %v1829_v9 }
 0x1d5   :  { %5167 = vrot.lane.b32.xlu1 %v5166_v63, %s5602_s25  ;;  %5147 = vrot.lane.b32.xlu0 %v5161_v27, %s5593_s22  ;;  %v5206_v27 = vpack.i.bf16 %v1948_v23, %v1940_v17 }
 0x1d8   :  { %v1323_v30 = vld [vmem:[#allocation2 + $0xf0] sm:$0x3] }
 0x1d9   :  { %v1699_v13 = vmax.f32 %v1323_v30, %v1665_v26  ;;  %5152 = vrot.lane.b32.xlu0 %v5166_v63, %s5594_s26  ;;  %5212 = vrot.lane.b32.xlu1 %v5211_v44, %s5589_s29  ;;  %v1889_v26 = vld [vmem:[#allocation2 + $0x9b] sm:$0xff] }
 0x1da   :  { %v5266_v52 = vpack.i.bf16 %v1889_v26, %v6832_v7  ;;  %v1862_v7 = vld [vmem:[#allocation2] sm:$0xff]  ;;  %v5306_v17 = vpack.i.bf16 %v7007_v34, %v1889_v26 }
 0x1db   :  { %1730 = vst [vmem:[#allocation2 + $0xf0] sm:$0x3] %v1699_v13 }
 0x1dd   :  { %5172 = vrot.lane.b32.xlu0 %v5171_v22, %s5595_s14  ;;  %5217 = vrot.lane.b32.xlu1 %v5216_v8, %s5590_s30  ;;  %v6994_v22 = vld [vmem:[#allocation2 + $0xa5] sm:$0xff] }
 0x1e1   :  { %5177 = vrot.lane.b32.xlu0 %v5176_v33, %s5596_s20  ;;  %5222 = vrot.lane.b32.xlu1 %v5221_v55, %s5588_s2 }
 0x1e2   :  { %v1761_v50 = vld [vmem:[#allocation2 + $0xf0] sm:$0x3] }
 0x1e3   :  { %v1799_v39 = vadd.f32 %v6604_v48, %v1761_v50  ;;  %v6940_v36 = vpop.permute.xlu1 %4922  ;;  %v1904_v48 = vld [vmem:[#allocation2 + $0x91] sm:$0xff] }
 0x1e4   :  { %v4913_v59 = vpop.permute.xlu0 %4912  ;;  %v5236_v10 = vpack.i.bf16 %v1904_v48, %v1903_v32  ;;  %v5271_v49 = vpack.i.bf16 %v6973_v45, %v1904_v48  ;;  %v5276_v32 = vpack.i.bf16 %v6982_v6, %v1920_v54  ;;  %v4925_v19 = vunpack.i.h.bf16 %v6940_v36 }
 0x1e5   :  { %v1830_v18 = vmax.f32 %v1799_v39, 0.0  ;;  %5182 = vrot.lane.b32.xlu0 %v5181_v40, %s5597_s21  ;;  %5227 = vrot.lane.b32.xlu1 %v5226_v53, %s5591_s12  ;;  %v4915_v9 = vunpack.i.h.bf16 %v4913_v59  ;;  %v4914_v63 = vunpack.i.l.bf16 %v4913_v59  ;;  %v4924_v31 = vunpack.i.l.bf16 %v6940_v36 }
 0x1e7   :  { %1861 = vst [vmem:[#allocation2 + $0xf0] sm:$0x3] %v1830_v18  ;;  %v6945_v2 = vpop.permute.xlu1 %4927  ;;  %v2757_v13 = vsel %vm2756_vm2, %v1862_v7, %v4914_v63  ;;  %v2758_v14 = vsel %vm2756_vm2, %v6638_v56, %v4915_v9  ;;  %v5301_v56 = vpack.i.bf16 %v6994_v22, %v1873_v29 }
 0x1e8   :  { %v4918_v4 = vpop.permute.xlu0 %4917  ;;  %v4930_v39 = vunpack.i.h.bf16 %v6945_v2  ;;  %v4929_v40 = vunpack.i.l.bf16 %v6945_v2 }
 0x1e9   :  { %5187 = vrot.lane.b32.xlu0 %v5186_v15, %s5598_s27  ;;  %5232 = vrot.lane.b32.xlu1 %v5231_v21, %s5592_s17  ;;  %v4920_v61 = vunpack.i.h.bf16 %v4918_v4  ;;  %v4919_v44 = vunpack.i.l.bf16 %v4918_v4 }
 0x1eb   :  { %v6950_v43 = vpop.permute.xlu1 %4932  ;;  %v2773_v8 = vsel %vm72_vm1, %v2757_v13, %v4919_v44  ;;  %v2774_v5 = vsel %vm72_vm1, %v2758_v14, %v4920_v61 }
 0x1ec   :  { %v2790_v20 = vsel %vm2789_vm3, %v2773_v8, %v4924_v31  ;;  %v2791_v50 = vsel %vm2789_vm3, %v2774_v5, %v4925_v19  ;;  %v4935_v36 = vunpack.i.h.bf16 %v6950_v43  ;;  %v4934_v53 = vunpack.i.l.bf16 %v6950_v43  ;;  %v7026_v43 = vld [vmem:[#allocation2 + $0xa7] sm:$0xff]  ;;  %v7058_v8 = vld [vmem:[#allocation2 + $0xb1] sm:$0xff] }
 0x1ed   :  { %5192 = vrot.lane.b32.xlu0 %v5191_v16, %s5599_s23  ;;  %5237 = vrot.lane.b32.xlu1 %v5236_v10, %s5593_s22  ;;  %v2808_v18 = vsel %vm2806_vm4, %v2791_v50, %v4930_v39  ;;  %v2807_v59 = vsel %vm2806_vm4, %v2790_v20, %v4929_v40 }
 0x1ee   :  { %v2824_v0 = vsel %vm2823_vm5, %v2807_v59, %v4934_v53  ;;  %v2825_v54 = vsel %vm2823_vm5, %v2808_v18, %v4935_v36  ;;  %v5326_v36 = vpack.i.bf16 %v7058_v8, %v7007_v34 }
 0x1ef   :  { %v6954_v58 = vpop.permute.xlu1 %4937  ;;  %v6956_v41 = vpop.permute.xlu0 %4947 }
 0x1f0   :  { %v4940_v15 = vunpack.i.h.bf16 %v6954_v58  ;;  %v4939_v21 = vunpack.i.l.bf16 %v6954_v58 }
 0x1f1   :  { %5197 = vrot.lane.b32.xlu0 %v5196_v60, %s5600_s3  ;;  %5242 = vrot.lane.b32.xlu1 %v5241_v62, %s5594_s26 }
 0x1f2   :  { %v2841_v62 = vsel %vm2840_vm6, %v2824_v0, %v4939_v21  ;;  %v2842_v29 = vsel %vm2840_vm6, %v2825_v54, %v4940_v15  ;;  %v1907_v15 = vld [vmem:[#allocation2 + $0xb2] sm:$0xff] }
 0x1f3   :  { %v6960_v24 = vpop.permute.xlu1 %4942  ;;  %v6962_v28 = vpop.permute.xlu0 %4952  ;;  %v5331_v0 = vpack.i.bf16 %v1907_v15, %v7026_v43  ;;  %v1923_v54 = vld [vmem:[#allocation2 + $0xb3] sm:$0xff] }
 0x1f4   :  { %v4945_v48 = vunpack.i.h.bf16 %v6960_v24  ;;  %v4944_v4 = vunpack.i.l.bf16 %v6960_v24 }
 0x1f5   :  { %5202 = vrot.lane.b32.xlu0 %v5201_v38, %s5601_s24  ;;  %5262 = vrot.lane.b32.xlu1 %v5261_v1, %s5595_s14  ;;  %v5311_v1 = vpack.i.bf16 %v7026_v43, %v6973_v45  ;;  %v4954_v43 = vunpack.i.l.bf16 %v6962_v28 }
 0x1f6   :  { %v2859_v23 = vsel %vm2857_vm7, %v2842_v29, %v4945_v48  ;;  %v2858_v26 = vsel %vm2857_vm7, %v2841_v62, %v4944_v4  ;;  %v5336_v62 = vpack.i.bf16 %v1923_v54, %v6863_v47  ;;  %v4950_v29 = vunpack.i.h.bf16 %v6956_v41 }
 0x1f7   :  { %v6968_v3 = vpop.permute.xlu0 %4957  ;;  %v6970_v57 = vpop.permute.xlu1 %4962 }
 0x1f8   :  { %v4965_v16 = vunpack.i.h.bf16 %v6970_v57  ;;  %v4964_v10 = vunpack.i.l.bf16 %v6970_v57 }
 0x1f9   :  { %5207 = vrot.lane.b32.xlu0 %v5206_v27, %s5602_s25  ;;  %5267 = vrot.lane.b32.xlu1 %v5266_v52, %s5596_s20 }
 0x1fa   :  { %v2876_v57 = vsel %vm2874_vm8, %v2859_v23, %v4965_v16  ;;  %v2875_v27 = vsel %vm2874_vm8, %v2858_v26, %v4964_v10  ;;  %v5321_v10 = vpack.i.bf16 %v6874_v25, %v6994_v22  ;;  %v4955_v22 = vunpack.i.h.bf16 %v6962_v28  ;;  %v7112_v28 = vld [vmem:[#allocation2 + $0xbc] sm:$0xff] }
 0x1fb   :  { %v6977_v51 = vpop.permute.xlu0 %4967  ;;  %v6979_v42 = vpop.permute.xlu1 %4972  ;;  %v4960_v23 = vunpack.i.h.bf16 %v6968_v3  ;;  %v4959_v26 = vunpack.i.l.bf16 %v6968_v3 }
 0x1fc   :  { %v4970_v58 = vunpack.i.h.bf16 %v6977_v51  ;;  %v4969_v60 = vunpack.i.l.bf16 %v6977_v51  ;;  %v4974_v51 = vunpack.i.l.bf16 %v6979_v42 }
 0x1fd   :  { %5247 = vrot.lane.b32.xlu0 %v5266_v52, %s5589_s29  ;;  %5272 = vrot.lane.b32.xlu1 %v5271_v49, %s5597_s21  ;;  %v4975_v52 = vunpack.i.h.bf16 %v6979_v42  ;;  %v5316_v42 = vpack.i.bf16 %v6863_v47, %v6982_v6 }
 0x1fe   :  { %v2892_v45 = vsel %vm2891_vm9, %v2875_v27, %v4969_v60 }
 0x1ff   :  { %v6986_v30 = vpop.permute.xlu0 %4977  ;;  %v6988_v37 = vpop.permute.xlu1 %4987  ;;  %v2909_v5 = vsel %vm2908_vm10, %v2892_v45, %v4974_v51  ;;  %v5550_v51 = vld [vmem:[#allocation2 + $0x16] sm:$0xff] }
 0x200   :  { %v4980_v9 = vunpack.i.h.bf16 %v6986_v30  ;;  %v4979_v63 = vunpack.i.l.bf16 %v6986_v30 }
 0x201   :  { %5252 = vrot.lane.b32.xlu0 %v5271_v49, %s5590_s30  ;;  %5277 = vrot.lane.b32.xlu1 %v5276_v32, %s5598_s27  ;;  %v2893_v49 = vsel %vm2891_vm9, %v2876_v57, %v4970_v58 }
 0x202   :  { %v2910_v19 = vsel %vm2908_vm10, %v2893_v49, %v4975_v52  ;;  %v5551_v49 = vld [vmem:[#allocation2 + $0x21] sm:$0xff] }
 0x203   :  { %v7002_v33 = vpop.permute.xlu1 %4997  ;;  %v7004_v55 = vpop.permute.xlu0 %4982  ;;  %v2927_v6 = vsel %vm2925_vm11, %v2910_v19, %v4980_v9  ;;  %v2760_v9 = vsel %vm2756_vm2, %v5551_v49, %v4950_v29  ;;  %v7132_v19 = vld [vmem:[#allocation2 + $0xbd] sm:$0xff] }
 0x204   :  { %v4985_v47 = vunpack.i.h.bf16 %v7004_v55  ;;  %v4984_v57 = vunpack.i.l.bf16 %v7004_v55 }
 0x205   :  { %5257 = vrot.lane.b32.xlu0 %v5276_v32, %s5588_s2  ;;  %5302 = vrot.lane.b32.xlu1 %v5301_v56, %s5599_s23 }
 0x207   :  { %v5003_v2 = vpop.permute.xlu1 %5002  ;;  %v7022_v35 = vpop.permute.xlu0 %4992 }
 0x208   :  { %v5005_v61 = vunpack.i.h.bf16 %v5003_v2  ;;  %v5004_v44 = vunpack.i.l.bf16 %v5003_v2 }
 0x209   :  { %5307 = vrot.lane.b32.xlu1 %v5306_v17, %s5600_s3  ;;  %5282 = vrot.lane.b32.xlu0 %v5301_v56, %s5591_s12  ;;  %v2926_v56 = vsel %vm2925_vm11, %v2909_v5, %v4979_v63  ;;  %v2776_v63 = vsel %vm72_vm1, %v2760_v9, %v4955_v22 }
 0x20a   :  { %v2944_v20 = vsel %vm2942_vm12, %v2927_v6, %v5005_v61  ;;  %v2943_v50 = vsel %vm2942_vm12, %v2926_v56, %v5004_v44  ;;  %v7124_v61 = vpack.i.bf16 %v7112_v28, %v7058_v8  ;;  %v7142_v6 = vld [vmem:[#allocation2 + $0xbe] sm:$0xff] }
 0x20b   :  { %v5008_v24 = vpop.permute.xlu1 %5007  ;;  %v7038_v38 = vpop.permute.xlu0 %5022 }
 0x20c   :  { %v5010_v13 = vunpack.i.h.bf16 %v5008_v24  ;;  %v5009_v14 = vunpack.i.l.bf16 %v5008_v24  ;;  %v4949_v24 = vunpack.i.l.bf16 %v6956_v41 }
 0x20d   :  { %5312 = vrot.lane.b32.xlu1 %v5311_v1, %s5601_s24  ;;  %5287 = vrot.lane.b32.xlu0 %v5306_v17, %s5592_s17 }
 0x20e   :  { %v2961_v53 = vsel %vm2959_vm13, %v2944_v20, %v5010_v13  ;;  %v2960_v59 = vsel %vm2959_vm13, %v2943_v50, %v5009_v14  ;;  %v2759_v45 = vsel %vm2756_vm2, %v5550_v51, %v4949_v24  ;;  %v4994_v13 = vunpack.i.l.bf16 %v7022_v35 }
 0x20f   :  { %v5013_v7 = vpop.permute.xlu1 %5012  ;;  %v7054_v32 = vpop.permute.xlu0 %5027  ;;  %v2775_v3 = vsel %vm72_vm1, %v2759_v45, %v4954_v43 }
 0x210   :  { %v5015_v31 = vunpack.i.h.bf16 %v5013_v7  ;;  %v5014_v30 = vunpack.i.l.bf16 %v5013_v7  ;;  %v2792_v55 = vsel %vm2789_vm3, %v2775_v3, %v4959_v26  ;;  %v1893_v26 = vld [vmem:[#allocation2 + $0xc7] sm:$0xff] }
 0x211   :  { %5317 = vrot.lane.b32.xlu1 %v5316_v42, %s5602_s25  ;;  %5292 = vrot.lane.b32.xlu0 %v5311_v1, %s5593_s22  ;;  %v7096_v1 = vld [vmem:[#allocation2 + $0xbb] sm:$0xff]  ;;  %v2809_v7 = vsel %vm2806_vm4, %v2792_v55, %v4984_v57  ;;  %v5396_v55 = vpack.i.bf16 %v1893_v26, %v7112_v28 }
 0x212   :  { %v2977_v21 = vsel %vm2976_vm14, %v2960_v59, %v5014_v30  ;;  %v2978_v2 = vsel %vm2976_vm14, %v2961_v53, %v5015_v31  ;;  %v5356_v52 = vpack.i.bf16 %v7096_v1, %v6874_v25  ;;  %v2793_v25 = vsel %vm2789_vm3, %v2776_v63, %v4960_v23 }
 0x213   :  { %v5018_v39 = vpop.permute.xlu1 %5017  ;;  %v7068_v40 = vpop.permute.xlu0 %5032  ;;  %v2810_v44 = vsel %vm2806_vm4, %v2793_v25, %v4985_v47  ;;  %v4990_v31 = vunpack.i.h.bf16 %v6988_v37  ;;  %v4989_v30 = vunpack.i.l.bf16 %v6988_v37  ;;  %v5029_v37 = vunpack.i.l.bf16 %v7054_v32 }
 0x214   :  { %v5020_v17 = vunpack.i.h.bf16 %v5018_v39  ;;  %v5019_v18 = vunpack.i.l.bf16 %v5018_v39  ;;  %v5030_v39 = vunpack.i.h.bf16 %v7054_v32  ;;  %v5035_v59 = vunpack.i.h.bf16 %v7068_v40 }
 0x215   :  { %5297 = vrot.lane.b32.xlu0 %v5316_v42, %s5594_s26  ;;  %5327 = vrot.lane.b32.xlu1 %v5326_v36, %s5589_s29  ;;  %v4995_v42 = vunpack.i.h.bf16 %v7022_v35  ;;  %v2826_v8 = vsel %vm2823_vm5, %v2809_v7, %v4989_v30  ;;  %v2827_v56 = vsel %vm2823_vm5, %v2810_v44, %v4990_v31  ;;  %v5366_v35 = vpack.i.bf16 %v7132_v19, %v1907_v15 }
 0x216   :  { %v2994_v48 = vsel %vm2993_vm15, %v2977_v21, %v5019_v18  ;;  %v2995_v34 = vsel %vm2993_vm15, %v2978_v2, %v5020_v17  ;;  %v2843_v20 = vsel %vm2840_vm6, %v2826_v8, %v4994_v13  ;;  %v5000_v17 = vunpack.i.h.bf16 %v7002_v33 }
 0x217   :  { %4674 = vmatprep.mubr.f32.mxu0 %v2994_v48  ;;  %v7080_v4 = vpop.permute.xlu0 %5042  ;;  %v7082_v16 = vpop.permute.xlu1 %5037  ;;  %v2844_v50 = vsel %vm2840_vm6, %v2827_v56, %v4995_v42  ;;  %v4999_v18 = vunpack.i.l.bf16 %v7002_v33  ;;  %v5034_v15 = vunpack.i.l.bf16 %v7068_v40  ;;  %v5371_v32 = vpack.i.bf16 %v7142_v6, %v1923_v54 }
 0x218   :  { %4675 = vmatmul.mubr.f32.vlgmr.msra.gmra.mrb[124].mxu0 %v2995_v34  ;;  %v2861_v34 = vsel %vm2857_vm7, %v2844_v50, %v5000_v17  ;;  %v5401_v56 = vpack.i.bf16 %v6898_v46, %v7132_v19  ;;  %v1925_v50 = vld [vmem:[#allocation2 + $0xc9] sm:$0xff] }
 0x219   :  { %5322 = vrot.lane.b32.xlu0 %v5321_v10, %s5595_s14  ;;  %5332 = vrot.lane.b32.xlu1 %v5331_v0, %s5590_s30  ;;  %v2860_v48 = vsel %vm2857_vm7, %v2843_v20, %v4999_v18  ;;  %v2878_v40 = vsel %vm2874_vm8, %v2861_v34, %v5030_v39  ;;  %v5024_v20 = vunpack.i.l.bf16 %v7038_v38  ;;  %v5040_v39 = vunpack.i.h.bf16 %v7082_v16 }
 0x21a   :  { %v2895_v54 = vsel %vm2891_vm9, %v2878_v40, %v5035_v59  ;;  %v5421_v18 = vpack.i.bf16 %v1925_v50, %v7142_v6  ;;  %v7212_v59 = vld [vmem:[#allocation2 + $0xd2] sm:$0xff] }
 0x21b   :  { %v7089_v58 = vpop.permute.xlu0 %5047  ;;  %v7091_v60 = vpop.permute.xlu1 %5057 }
 0x21c   :  { %v5050_v21 = vunpack.i.h.bf16 %v7089_v58  ;;  %v5049_v2 = vunpack.i.l.bf16 %v7089_v58 }
 0x21d   :  { %5342 = vrot.lane.b32.xlu0 %v5326_v36, %s5596_s20  ;;  %5337 = vrot.lane.b32.xlu1 %v5336_v62, %s5588_s2 }
 0x21e   :  { %v2912_v47 = vsel %vm2908_vm10, %v2895_v54, %v5050_v21  ;;  %v5553_v21 = vld [vmem:[#allocation2 + $0x37] sm:$0xff] }
 0x21f   :  { %v7106_v27 = vpop.permute.xlu0 %5052  ;;  %v7108_v41 = vpop.permute.xlu1 %5062 }
 0x220   :  { %v5055_v33 = vunpack.i.h.bf16 %v7106_v27  ;;  %v5054_v10 = vunpack.i.l.bf16 %v7106_v27 }
 0x221   :  { %5347 = vrot.lane.b32.xlu0 %v5331_v0, %s5597_s21  ;;  %5357 = vrot.lane.b32.xlu1 %v5356_v52, %s5591_s12  ;;  %v2877_v0 = vsel %vm2874_vm8, %v2860_v48, %v5029_v37  ;;  %v5039_v37 = vunpack.i.l.bf16 %v7082_v16  ;;  %v7218_v48 = vld [vmem:[#allocation2 + $0xd4] sm:$0xff] }
 0x222   :  { %v2894_v22 = vsel %vm2891_vm9, %v2877_v0, %v5034_v15  ;;  %v2929_v45 = vsel %vm2925_vm11, %v2912_v47, %v5055_v33  ;;  %v5060_v33 = vunpack.i.h.bf16 %v7091_v60 }
 0x223   :  { %v5078_v14 = vpop.permute.xlu0 %5077  ;;  %v7130_v5 = vpop.permute.xlu1 %5067  ;;  %v2911_v57 = vsel %vm2908_vm10, %v2894_v22, %v5049_v2  ;;  %v5045_v2 = vunpack.i.h.bf16 %v7080_v4 }
 0x224   :  { %v5079_v58 = vunpack.i.l.bf16 %v5078_v14  ;;  %v2928_v51 = vsel %vm2925_vm11, %v2911_v57, %v5054_v10  ;;  %v5059_v10 = vunpack.i.l.bf16 %v7091_v60  ;;  %v5069_v22 = vunpack.i.l.bf16 %v7130_v5 }
 0x225   :  { %5352 = vrot.lane.b32.xlu0 %v5336_v62, %s5598_s27  ;;  %5362 = vrot.lane.b32.xlu1 %v7124_v61, %s5592_s17  ;;  %v5080_v62 = vunpack.i.h.bf16 %v5078_v14  ;;  %v7238_v60 = vpack.i.bf16 %v7218_v48, %v1925_v50 }
 0x226   :  { %v2945_v9 = vsel %vm2942_vm12, %v2928_v51, %v5079_v58  ;;  %v5064_v58 = vunpack.i.l.bf16 %v7108_v41 }
 0x227   :  { %v5083_v36 = vpop.permute.xlu0 %5082  ;;  %v7148_v53 = vpop.permute.xlu1 %5072  ;;  %v2946_v49 = vsel %vm2942_vm12, %v2929_v45, %v5080_v62  ;;  %v5065_v62 = vunpack.i.h.bf16 %v7108_v41 }
 0x228   :  { %v5085_v43 = vunpack.i.h.bf16 %v5083_v36  ;;  %v5084_v23 = vunpack.i.l.bf16 %v5083_v36 }
 0x229   :  { %5377 = vrot.lane.b32.xlu0 %v5356_v52, %s5599_s23  ;;  %5367 = vrot.lane.b32.xlu1 %v5366_v35, %s5593_s22 }
 0x22a   :  { %v2962_v7 = vsel %vm2959_vm13, %v2945_v9, %v5084_v23  ;;  %v2963_v42 = vsel %vm2959_vm13, %v2946_v49, %v5085_v43  ;;  %v5075_v23 = vunpack.i.h.bf16 %v7148_v53 }
 0x22b   :  { %v5088_v29 = vpop.permute.xlu0 %5087  ;;  %v7165_v24 = vpop.permute.xlu1 %5112 }
 0x22c   :  { %v5090_v27 = vunpack.i.h.bf16 %v5088_v29  ;;  %v5089_v52 = vunpack.i.l.bf16 %v5088_v29  ;;  %v5070_v29 = vunpack.i.h.bf16 %v7130_v5  ;;  %v5115_v57 = vunpack.i.h.bf16 %v7165_v24 }
 0x22d   :  { %5387 = vrot.lane.b32.xlu0 %v5366_v35, %s5601_s24  ;;  %5372 = vrot.lane.b32.xlu1 %v5371_v32, %s5594_s26  ;;  %v5025_v35 = vunpack.i.h.bf16 %v7038_v38  ;;  %v5552_v38 = vld [vmem:[#allocation2 + $0x2c] sm:$0xff] }
 0x22e   :  { %v2979_v13 = vsel %vm2976_vm14, %v2962_v7, %v5089_v52  ;;  %v2980_v14 = vsel %vm2976_vm14, %v2963_v42, %v5090_v27  ;;  %v2761_v15 = vsel %vm2756_vm2, %v5552_v38, %v5024_v20  ;;  %v5114_v27 = vunpack.i.l.bf16 %v7165_v24 }
 0x22f   :  { %v5093_v3 = vpop.permute.xlu0 %5092  ;;  %v7177_v63 = vpop.permute.xlu1 %5117  ;;  %v2762_v16 = vsel %vm2756_vm2, %v5553_v21, %v5025_v35  ;;  %v2777_v6 = vsel %vm72_vm1, %v2761_v15, %v5039_v37  ;;  %v1931_v37 = vld [vmem:[#allocation2 + $0xd3] sm:$0xff] }
 0x230   :  { %v5095_v25 = vunpack.i.h.bf16 %v5093_v3  ;;  %v5094_v44 = vunpack.i.l.bf16 %v5093_v3  ;;  %v2778_v34 = vsel %vm72_vm1, %v2762_v16, %v5040_v39  ;;  %v5120_v9 = vunpack.i.h.bf16 %v7177_v63 }
 0x231   :  { %5382 = vrot.lane.b32.xlu1 %v7124_v61, %s5600_s3  ;;  %5397 = vrot.lane.b32.xlu0 %v5396_v55, %s5589_s29  ;;  %v7195_v61 = vld [vmem:[#allocation2 + $0xc6] sm:$0xff]  ;;  %v2795_v41 = vsel %vm2789_vm3, %v2778_v34, %v5045_v2  ;;  %v5119_v3 = vunpack.i.l.bf16 %v7177_v63 }
 0x232   :  { %v2996_v31 = vsel %vm2993_vm15, %v2979_v13, %v5094_v44  ;;  %v2997_v30 = vsel %vm2993_vm15, %v2980_v14, %v5095_v25  ;;  %v5406_v19 = vpack.i.bf16 %v7195_v61, %v7096_v1  ;;  %v7220_v1 = vld [vmem:[#allocation2 + $0xd1] sm:$0xff]  ;;  %v2812_v5 = vsel %vm2806_vm4, %v2795_v41, %v5060_v33 }
 0x233   :  { %4677 = vmatprep.mubr.f32.mxu0 %v2996_v31  ;;  %v7189_v28 = vpop.permute.xlu0 %5097  ;;  %v7191_v8 = vpop.permute.xlu1 %5122  ;;  %v5431_v54 = vpack.i.bf16 %v7220_v1, %v7195_v61  ;;  %v2829_v49 = vsel %vm2823_vm5, %v2812_v5, %v5065_v62  ;;  %v1937_v5 = vld [vmem:[#allocation2 + $0xdd] sm:$0xff] }
 0x234   :  { %4678 = vmatmul.mubr.f32.gmra.mrb[126].mxu0 %v2997_v30  ;;  %v5125_v25 = vunpack.i.h.bf16 %v7191_v8  ;;  %v5124_v44 = vunpack.i.l.bf16 %v7191_v8 }
 0x235   :  { %5392 = vrot.lane.b32.xlu1 %v5371_v32, %s5602_s25  ;;  %5402 = vrot.lane.b32.xlu0 %v5401_v56, %s5590_s30  ;;  %v5044_v32 = vunpack.i.l.bf16 %v7080_v4  ;;  %v7231_v4 = vpack.i.bf16 %v7212_v59, %v1893_v26  ;;  %v5074_v26 = vunpack.i.l.bf16 %v7148_v53 }
 0x237   :  { %v7203_v36 = vpop.permute.xlu0 %5102  ;;  %v7205_v17 = vpop.permute.xlu1 %5127  ;;  %v2794_v43 = vsel %vm2789_vm3, %v2777_v6, %v5044_v32  ;;  %v5441_v6 = vpack.i.bf16 %v1931_v37, %v6898_v46 }
 0x238   :  { %v2811_v47 = vsel %vm2806_vm4, %v2794_v43, %v5059_v10  ;;  %v5130_v42 = vunpack.i.h.bf16 %v7205_v17  ;;  %v5129_v63 = vunpack.i.l.bf16 %v7205_v17 }
 0x239   :  { %5412 = vrot.lane.b32.xlu0 %v5396_v55, %s5596_s20  ;;  %5407 = vrot.lane.b32.xlu1 %v5406_v19, %s5595_s14  ;;  %v2828_v45 = vsel %vm2823_vm5, %v2811_v47, %v5064_v58  ;;  %v2846_v55 = vsel %vm2840_vm6, %v2829_v49, %v5070_v29  ;;  %v1935_v58 = vld [vmem:[#allocation2 + $0xdc] sm:$0xff] }
 0x23a   :  { %v2845_v53 = vsel %vm2840_vm6, %v2828_v45, %v5069_v22  ;;  %v2863_v7 = vsel %vm2857_vm7, %v2846_v55, %v5075_v23  ;;  %v1941_v49 = vld [vmem:[#allocation2 + $0xdf] sm:$0xff]  ;;  %v1943_v55 = vld [vmem:[#allocation2 + $0xe7] sm:$0xff] }
 0x23b   :  { %v7226_v40 = vpop.permute.xlu0 %5107  ;;  %v5138_v0 = vpop.permute.xlu1 %5137  ;;  %v2862_v24 = vsel %vm2857_vm7, %v2845_v53, %v5074_v26  ;;  %v2880_v13 = vsel %vm2874_vm8, %v2863_v7, %v5115_v57  ;;  %v5471_v26 = vpack.i.bf16 %v1935_v58, %v7220_v1  ;;  %v5476_v57 = vpack.i.bf16 %v1937_v5, %v7212_v59 }
 0x23c   :  { %v2879_v14 = vsel %vm2874_vm8, %v2862_v24, %v5114_v27  ;;  %v5140_v31 = vunpack.i.h.bf16 %v5138_v0  ;;  %v5139_v30 = vunpack.i.l.bf16 %v5138_v0  ;;  %v2897_v20 = vsel %vm2891_vm9, %v2880_v13, %v5120_v9  ;;  %v1939_v27 = vld [vmem:[#allocation2 + $0xde] sm:$0xff]  ;;  %v1947_v13 = vld [vmem:[#allocation2 + $0xe9] sm:$0xff] }
 0x23d   :  { %5417 = vrot.lane.b32.xlu1 %v5401_v56, %s5597_s21  ;;  %5422 = vrot.lane.b32.xlu0 %v5421_v18, %s5588_s2  ;;  %v2896_v35 = vsel %vm2891_vm9, %v2879_v14, %v5119_v3  ;;  %v2914_v17 = vsel %vm2908_vm10, %v2897_v20, %v5125_v25  ;;  %v5481_v45 = vpack.i.bf16 %v1939_v27, %v1931_v37  ;;  %v1949_v25 = vld [vmem:[#allocation2 + $0xea] sm:$0xff]  ;;  %v5104_v14 = vunpack.i.l.bf16 %v7203_v36 }
 0x23e   :  { %v2913_v19 = vsel %vm2908_vm10, %v2896_v35, %v5124_v44  ;;  %v2931_v21 = vsel %vm2925_vm11, %v2914_v17, %v5130_v42  ;;  %v5486_v3 = vpack.i.bf16 %v1941_v49, %v7218_v48  ;;  %v5506_v7 = vpack.i.bf16 %v1949_v25, %v1941_v49 }
 0x23f   :  { %v7250_v52 = vpop.permute.xlu0 %5132  ;;  %v5158_v51 = vpop.permute.xlu1 %5157  ;;  %v2930_v15 = vsel %vm2925_vm11, %v2913_v19, %v5129_v63  ;;  %v2948_v16 = vsel %vm2942_vm12, %v2931_v21, %v5140_v31  ;;  %v5100_v42 = vunpack.i.h.bf16 %v7189_v28  ;;  %v5099_v63 = vunpack.i.l.bf16 %v7189_v28 }
 0x240   :  { %v5160_v50 = vunpack.i.h.bf16 %v5158_v51  ;;  %v5159_v39 = vunpack.i.l.bf16 %v5158_v51  ;;  %v2947_v2 = vsel %vm2942_vm12, %v2930_v15, %v5139_v30  ;;  %v5105_v48 = vunpack.i.h.bf16 %v7203_v36  ;;  %v5555_v36 = vld [vmem:[#allocation2 + $0x4d] sm:$0xff] }
 0x241   :  { %5427 = vrot.lane.b32.xlu0 %v5421_v18, %s5598_s27  ;;  %5437 = vrot.lane.b32.xlu1 %v7231_v4, %s5592_s17  ;;  %v5110_v31 = vunpack.i.h.bf16 %v7226_v40  ;;  %v5109_v30 = vunpack.i.l.bf16 %v7226_v40  ;;  %v5134_v35 = vunpack.i.l.bf16 %v7250_v52  ;;  %v5501_v28 = vpack.i.bf16 %v1947_v13, %v1939_v27 }
 0x242   :  { %v2964_v0 = vsel %vm2959_vm13, %v2947_v2, %v5159_v39  ;;  %v2965_v62 = vsel %vm2959_vm13, %v2948_v16, %v5160_v50  ;;  %v5554_v39 = vld [vmem:[#allocation2 + $0x42] sm:$0xff]  ;;  %v2764_v19 = vsel %vm2756_vm2, %v5555_v36, %v5100_v42 }
 0x243   :  { %v5163_v8 = vpop.permute.xlu1 %5162  ;;  %v7269_v56 = vpop.permute.xlu0 %5142  ;;  %v2763_v37 = vsel %vm2756_vm2, %v5554_v39, %v5099_v63 }
 0x244   :  { %v5165_v18 = vunpack.i.h.bf16 %v5163_v8  ;;  %v5164_v38 = vunpack.i.l.bf16 %v5163_v8  ;;  %v5135_v8 = vunpack.i.h.bf16 %v7250_v52  ;;  %v5145_v17 = vunpack.i.h.bf16 %v7269_v56 }
 0x245   :  { %5447 = vrot.lane.b32.xlu1 %v7238_v60, %s5594_s26  ;;  %5432 = vrot.lane.b32.xlu0 %v5431_v54, %s5591_s12  ;;  %v2779_v40 = vsel %vm72_vm1, %v2763_v37, %v5104_v14 }
 0x246   :  { %v2981_v29 = vsel %vm2976_vm14, %v2964_v0, %v5164_v38  ;;  %v2982_v22 = vsel %vm2976_vm14, %v2965_v62, %v5165_v18  ;;  %v5144_v18 = vunpack.i.l.bf16 %v7269_v56  ;;  %v2780_v38 = vsel %vm72_vm1, %v2764_v19, %v5105_v48 }
 0x247   :  { %v5168_v32 = vpop.permute.xlu1 %5167  ;;  %v7282_v34 = vpop.permute.xlu0 %5147  ;;  %v2796_v21 = vsel %vm2789_vm3, %v2779_v40, %v5109_v30  ;;  %v2797_v16 = vsel %vm2789_vm3, %v2780_v38, %v5110_v31 }
 0x248   :  { %v5170_v33 = vunpack.i.h.bf16 %v5168_v32  ;;  %v5169_v10 = vunpack.i.l.bf16 %v5168_v32  ;;  %v5150_v52 = vunpack.i.h.bf16 %v7282_v34  ;;  %v5149_v15 = vunpack.i.l.bf16 %v7282_v34 }
 0x249   :  { %5452 = vrot.lane.b32.xlu1 %v5431_v54, %s5599_s23  ;;  %5442 = vrot.lane.b32.xlu0 %v5441_v6, %s5593_s22  ;;  %v2814_v56 = vsel %vm2806_vm4, %v2797_v16, %v5135_v8 }
 0x24a   :  { %v2998_v43 = vsel %vm2993_vm15, %v2981_v29, %v5169_v10  ;;  %v2999_v41 = vsel %vm2993_vm15, %v2982_v22, %v5170_v33  ;;  %v2831_v62 = vsel %vm2823_vm5, %v2814_v56, %v5145_v17 }
 0x24b   :  { %4680 = vmatprep.mubr.f32.mxu0 %v2998_v43  ;;  %v7293_v46 = vpop.permute.xlu0 %5152  ;;  %v7295_v23 = vpop.permute.xlu1 %5212 }
 0x24c   :  { %4681 = vmatmul.mubr.f32.gmra.mrb[128].mxu0 %v2999_v41  ;;  %v5155_v2 = vunpack.i.h.bf16 %v7293_v46  ;;  %v5154_v32 = vunpack.i.l.bf16 %v7293_v46  ;;  %v2848_v41 = vsel %vm2840_vm6, %v2831_v62, %v5150_v52 }
 0x24d   :  { %5457 = vrot.lane.b32.xlu1 %v7231_v4, %s5600_s3  ;;  %5472 = vrot.lane.b32.xlu0 %v5471_v26, %s5595_s14  ;;  %v1945_v4 = vld [vmem:[#allocation2 + $0xe8] sm:$0xff] }
 0x24e   :  { %v5496_v53 = vpack.i.bf16 %v1945_v4, %v1937_v5 }
 0x24f   :  { %v7301_v54 = vpop.permute.xlu0 %5172  ;;  %v7303_v47 = vpop.permute.xlu1 %5217 }
 0x250   :  { %v5175_v33 = vunpack.i.h.bf16 %v7301_v54  ;;  %v5174_v10 = vunpack.i.l.bf16 %v7301_v54  ;;  %v2865_v54 = vsel %vm2857_vm7, %v2848_v41, %v5155_v2  ;;  %v5220_v16 = vunpack.i.h.bf16 %v7303_v47 }
 0x251   :  { %5462 = vrot.lane.b32.xlu1 %v5441_v6, %s5601_s24  ;;  %5477 = vrot.lane.b32.xlu0 %v5476_v57, %s5596_s20  ;;  %v2813_v6 = vsel %vm2806_vm4, %v2796_v21, %v5134_v35  ;;  %v5214_v21 = vunpack.i.l.bf16 %v7295_v23  ;;  %v5219_v2 = vunpack.i.l.bf16 %v7303_v47 }
 0x253   :  { %v7308_v51 = vpop.permute.xlu0 %5177  ;;  %v7310_v1 = vpop.permute.xlu1 %5222 }
 0x254   :  { %v5180_v29 = vunpack.i.h.bf16 %v7308_v51  ;;  %v5179_v22 = vunpack.i.l.bf16 %v7308_v51  ;;  %v5224_v56 = vunpack.i.l.bf16 %v7310_v1 }
 0x255   :  { %5467 = vrot.lane.b32.xlu1 %v7238_v60, %s5602_s25  ;;  %5482 = vrot.lane.b32.xlu0 %v5481_v45, %s5597_s21  ;;  %v5491_v60 = vpack.i.bf16 %v1943_v55, %v1935_v58  ;;  %v2830_v58 = vsel %vm2823_vm5, %v2813_v6, %v5144_v18  ;;  %v2882_v45 = vsel %vm2874_vm8, %v2865_v54, %v5175_v33  ;;  %v1870_v6 = vld [vmem:[#allocation2 + $0x79] sm:$0xff] }
 0x256   :  { %v2847_v43 = vsel %vm2840_vm6, %v2830_v58, %v5149_v15  ;;  %v5215_v15 = vunpack.i.h.bf16 %v7295_v23  ;;  %v2765_v58 = vsel %vm2756_vm2, %v1870_v6, %v5214_v21 }
 0x257   :  { %v7315_v9 = vpop.permute.xlu0 %5182  ;;  %v7317_v59 = vpop.permute.xlu1 %5227  ;;  %v2864_v5 = vsel %vm2857_vm7, %v2847_v43, %v5154_v32  ;;  %v5225_v32 = vunpack.i.h.bf16 %v7310_v1 }
 0x258   :  { %v5185_v46 = vunpack.i.h.bf16 %v7315_v9  ;;  %v5184_v26 = vunpack.i.l.bf16 %v7315_v9  ;;  %v2881_v51 = vsel %vm2874_vm8, %v2864_v5, %v5174_v10  ;;  %v2899_v9 = vsel %vm2891_vm9, %v2882_v45, %v5180_v29 }
 0x259   :  { %5487 = vrot.lane.b32.xlu0 %v5486_v3, %s5598_s27  ;;  %5497 = vrot.lane.b32.xlu1 %v5496_v53, %s5600_s3  ;;  %v2898_v55 = vsel %vm2891_vm9, %v2881_v51, %v5179_v22  ;;  %v5230_v33 = vunpack.i.h.bf16 %v7317_v59  ;;  %v5229_v10 = vunpack.i.l.bf16 %v7317_v59  ;;  %v2766_v23 = vsel %vm2756_vm2, %v6937_v11, %v5215_v15 }
 0x25a   :  { %v2916_v42 = vsel %vm2908_vm10, %v2899_v9, %v5185_v46  ;;  %v2781_v22 = vsel %vm72_vm1, %v2765_v58, %v5219_v2  ;;  %v2782_v1 = vsel %vm72_vm1, %v2766_v23, %v5220_v16 }
 0x25b   :  { %v7322_v44 = vpop.permute.xlu0 %5187  ;;  %v7324_v24 = vpop.permute.xlu1 %5232  ;;  %v2798_v41 = vsel %vm2789_vm3, %v2781_v22, %v5224_v56  ;;  %v2799_v46 = vsel %vm2789_vm3, %v2782_v1, %v5225_v32 }
 0x25c   :  { %v5190_v57 = vunpack.i.h.bf16 %v7322_v44  ;;  %v5189_v27 = vunpack.i.l.bf16 %v7322_v44  ;;  %v5235_v29 = vunpack.i.h.bf16 %v7324_v24  ;;  %v5234_v47 = vunpack.i.l.bf16 %v7324_v24 }
 0x25d   :  { %5492 = vrot.lane.b32.xlu0 %v5491_v60, %s5599_s23  ;;  %5507 = vrot.lane.b32.xlu1 %v5506_v7, %s5602_s25  ;;  %v2915_v7 = vsel %vm2908_vm10, %v2898_v55, %v5184_v26  ;;  %v2816_v5 = vsel %vm2806_vm4, %v2799_v46, %v5230_v33  ;;  %v2815_v24 = vsel %vm2806_vm4, %v2798_v41, %v5229_v10 }
 0x25e   :  { %v2932_v13 = vsel %vm2925_vm11, %v2915_v7, %v5189_v27  ;;  %v2933_v48 = vsel %vm2925_vm11, %v2916_v42, %v5190_v57  ;;  %v2833_v51 = vsel %vm2823_vm5, %v2816_v5, %v5235_v29 }
 0x25f   :  { %v5193_v20 = vpop.permute.xlu0 %5192  ;;  %v7336_v50 = vpop.permute.xlu1 %5237 }
 0x260   :  { %v5195_v49 = vunpack.i.h.bf16 %v5193_v20  ;;  %v5194_v4 = vunpack.i.l.bf16 %v5193_v20  ;;  %v5240_v43 = vunpack.i.h.bf16 %v7336_v50  ;;  %v5239_v59 = vunpack.i.l.bf16 %v7336_v50 }
 0x261   :  { %5502 = vrot.lane.b32.xlu0 %v5501_v28, %s5601_s24  ;;  %v2832_v50 = vsel %vm2823_vm5, %v2815_v24, %v5234_v47 }
 0x262   :  { %v2950_v14 = vsel %vm2942_vm12, %v2933_v48, %v5195_v49  ;;  %v2949_v31 = vsel %vm2942_vm12, %v2932_v13, %v5194_v4 }
 0x263   :  { %v5198_v0 = vpop.permute.xlu0 %5197  ;;  %v7355_v34 = vpop.permute.xlu1 %5242 }
 0x264   :  { %v5200_v25 = vunpack.i.h.bf16 %v5198_v0  ;;  %v5199_v60 = vunpack.i.l.bf16 %v5198_v0  ;;  %v5245_v26 = vunpack.i.h.bf16 %v7355_v34  ;;  %v5244_v11 = vunpack.i.l.bf16 %v7355_v34 }
 0x265   :  { %v2850_v34 = vsel %vm2840_vm6, %v2833_v51, %v5240_v43 }
 0x266   :  { %v2966_v28 = vsel %vm2959_vm13, %v2949_v31, %v5199_v60  ;;  %v2967_v39 = vsel %vm2959_vm13, %v2950_v14, %v5200_v25 }
 0x267   :  { %v5203_v3 = vpop.permute.xlu0 %5202  ;;  %v7371_v53 = vpop.permute.xlu1 %5262 }
 0x268   :  { %v5205_v44 = vunpack.i.h.bf16 %v5203_v3  ;;  %v5204_v63 = vunpack.i.l.bf16 %v5203_v3  ;;  %v5265_v54 = vunpack.i.h.bf16 %v7371_v53  ;;  %v5264_v57 = vunpack.i.l.bf16 %v7371_v53 }
 0x269   :  { %v2849_v3 = vsel %vm2840_vm6, %v2832_v50, %v5239_v59  ;;  %v2867_v53 = vsel %vm2857_vm7, %v2850_v34, %v5245_v26  ;;  %v5556_v50 = vld [vmem:[#allocation2 + $0x8f] sm:$0xff] }
 0x26a   :  { %v2983_v37 = vsel %vm2976_vm14, %v2966_v28, %v5204_v63  ;;  %v2984_v36 = vsel %vm2976_vm14, %v2967_v39, %v5205_v44  ;;  %v2866_v25 = vsel %vm2857_vm7, %v2849_v3, %v5244_v11  ;;  %v2884_v42 = vsel %vm2874_vm8, %v2867_v53, %v5265_v54 }
 0x26b   :  { %v5208_v30 = vpop.permute.xlu0 %5207  ;;  %v7381_v8 = vpop.permute.xlu1 %5267  ;;  %v2883_v44 = vsel %vm2874_vm8, %v2866_v25, %v5264_v57 }
 0x26c   :  { %v5210_v35 = vunpack.i.h.bf16 %v5208_v30  ;;  %v5209_v20 = vunpack.i.l.bf16 %v5208_v30  ;;  %v5270_v49 = vunpack.i.h.bf16 %v7381_v8  ;;  %v5269_v4 = vunpack.i.l.bf16 %v7381_v8 }
 0x26e   :  { %v3000_v19 = vsel %vm2993_vm15, %v2983_v37, %v5209_v20  ;;  %v3001_v17 = vsel %vm2993_vm15, %v2984_v36, %v5210_v35  ;;  %v2900_v31 = vsel %vm2891_vm9, %v2883_v44, %v5269_v4  ;;  %v2901_v30 = vsel %vm2891_vm9, %v2884_v42, %v5270_v49  ;;  %v5557_v49 = vld [vmem:[#allocation2 + $0x9a] sm:$0xff] }
 0x26f   :  { %4683 = vmatprep.mubr.f32.mxu0 %v3000_v19  ;;  %v7389_v18 = vpop.permute.xlu0 %5247  ;;  %v5273_v40 = vpop.permute.xlu1 %5272 }
 0x270   :  { %4684 = vmatmul.mubr.f32.gmra.mrb[130].mxu0 %v3001_v17  ;;  %v5275_v55 = vunpack.i.h.bf16 %v5273_v40  ;;  %v5274_v9 = vunpack.i.l.bf16 %v5273_v40  ;;  %v5250_v59 = vunpack.i.h.bf16 %v7389_v18  ;;  %v5249_v41 = vunpack.i.l.bf16 %v7389_v18 }
 0x272   :  { %v2917_v20 = vsel %vm2908_vm10, %v2900_v31, %v5274_v9  ;;  %v2918_v28 = vsel %vm2908_vm10, %v2901_v30, %v5275_v55  ;;  %v2767_v51 = vsel %vm2756_vm2, %v5556_v50, %v5249_v41  ;;  %v2768_v18 = vsel %vm2756_vm2, %v5557_v49, %v5250_v59 }
 0x273   :  { %v7391_v38 = vpop.permute.xlu0 %5252  ;;  %v5278_v52 = vpop.permute.xlu1 %5277 }
 0x274   :  { %v5280_v60 = vunpack.i.h.bf16 %v5278_v52  ;;  %v5279_v7 = vunpack.i.l.bf16 %v5278_v52  ;;  %v5255_v46 = vunpack.i.h.bf16 %v7391_v38  ;;  %v5254_v26 = vunpack.i.l.bf16 %v7391_v38 }
 0x276   :  { %v2934_v36 = vsel %vm2925_vm11, %v2917_v20, %v5279_v7  ;;  %v2935_v19 = vsel %vm2925_vm11, %v2918_v28, %v5280_v60  ;;  %v2783_v34 = vsel %vm72_vm1, %v2767_v51, %v5254_v26  ;;  %v2784_v3 = vsel %vm72_vm1, %v2768_v18, %v5255_v46 }
 0x277   :  { %v7401_v0 = vpop.permute.xlu0 %5257  ;;  %v5303_v62 = vpop.permute.xlu1 %5302 }
 0x278   :  { %v5305_v63 = vunpack.i.h.bf16 %v5303_v62  ;;  %v5304_v13 = vunpack.i.l.bf16 %v5303_v62  ;;  %v5260_v24 = vunpack.i.h.bf16 %v7401_v0  ;;  %v5259_v54 = vunpack.i.l.bf16 %v7401_v0 }
 0x27a   :  { %v2952_v17 = vsel %vm2942_vm12, %v2935_v19, %v5305_v63  ;;  %v2951_v40 = vsel %vm2942_vm12, %v2934_v36, %v5304_v13  ;;  %v2801_v53 = vsel %vm2789_vm3, %v2784_v3, %v5260_v24 }
 0x27b   :  { %v5308_v27 = vpop.permute.xlu1 %5307  ;;  %v7420_v45 = vpop.permute.xlu0 %5282 }
 0x27c   :  { %v5310_v8 = vunpack.i.h.bf16 %v5308_v27  ;;  %v5309_v35 = vunpack.i.l.bf16 %v5308_v27  ;;  %v5285_v57 = vunpack.i.h.bf16 %v7420_v45  ;;  %v5284_v27 = vunpack.i.l.bf16 %v7420_v45 }
 0x27d   :  { %v2800_v45 = vsel %vm2789_vm3, %v2783_v34, %v5259_v54 }
 0x27e   :  { %v2968_v2 = vsel %vm2959_vm13, %v2951_v40, %v5309_v35  ;;  %v2969_v32 = vsel %vm2959_vm13, %v2952_v17, %v5310_v8  ;;  %v2818_v42 = vsel %vm2806_vm4, %v2801_v53, %v5285_v57  ;;  %v2817_v44 = vsel %vm2806_vm4, %v2800_v45, %v5284_v27 }
 0x27f   :  { %v5313_v48 = vpop.permute.xlu1 %5312  ;;  %v7432_v14 = vpop.permute.xlu0 %5287 }
 0x280   :  { %v5315_v39 = vunpack.i.h.bf16 %v5313_v48  ;;  %v5314_v37 = vunpack.i.l.bf16 %v5313_v48  ;;  %v5290_v4 = vunpack.i.h.bf16 %v7432_v14  ;;  %v5289_v38 = vunpack.i.l.bf16 %v7432_v14 }
 0x282   :  { %v2985_v56 = vsel %vm2976_vm14, %v2968_v2, %v5314_v37  ;;  %v2986_v6 = vsel %vm2976_vm14, %v2969_v32, %v5315_v39  ;;  %v2834_v48 = vsel %vm2823_vm5, %v2817_v44, %v5289_v38  ;;  %v2835_v14 = vsel %vm2823_vm5, %v2818_v42, %v5290_v4 }
 0x283   :  { %v5318_v52 = vpop.permute.xlu1 %5317  ;;  %v5293_v15 = vpop.permute.xlu0 %5292 }
 0x284   :  { %v5320_v21 = vunpack.i.h.bf16 %v5318_v52  ;;  %v5319_v16 = vunpack.i.l.bf16 %v5318_v52  ;;  %v5295_v55 = vunpack.i.h.bf16 %v5293_v15  ;;  %v5294_v0 = vunpack.i.l.bf16 %v5293_v15 }
 0x286   :  { %v3002_v33 = vsel %vm2993_vm15, %v2985_v56, %v5319_v16  ;;  %v3003_v10 = vsel %vm2993_vm15, %v2986_v6, %v5320_v21  ;;  %v2851_v8 = vsel %vm2840_vm6, %v2834_v48, %v5294_v0  ;;  %v2852_v35 = vsel %vm2840_vm6, %v2835_v14, %v5295_v55  ;;  %v5558_v48 = vld [vmem:[#allocation2 + $0xb0] sm:$0xff] }
 0x287   :  { %4686 = vmatprep.mubr.f32.mxu0 %v3002_v33  ;;  %v5298_v62 = vpop.permute.xlu0 %5297  ;;  %v7448_v58 = vpop.permute.xlu1 %5327 }
 0x288   :  { %4687 = vmatmul.mubr.f32.gmra.mrb[132].mxu0 %v3003_v10  ;;  %v5300_v60 = vunpack.i.h.bf16 %v5298_v62  ;;  %v5299_v7 = vunpack.i.l.bf16 %v5298_v62  ;;  %v5330_v0 = vunpack.i.h.bf16 %v7448_v58 }
 0x28a   :  { %v2868_v36 = vsel %vm2857_vm7, %v2851_v8, %v5299_v7  ;;  %v2869_v19 = vsel %vm2857_vm7, %v2852_v35, %v5300_v60  ;;  %v2770_v14 = vsel %vm2756_vm2, %v5558_v48, %v5330_v0 }
 0x28b   :  { %v5323_v23 = vpop.permute.xlu0 %5322  ;;  %v7450_v29 = vpop.permute.xlu1 %5332 }
 0x28c   :  { %v5325_v63 = vunpack.i.h.bf16 %v5323_v23  ;;  %v5324_v13 = vunpack.i.l.bf16 %v5323_v23  ;;  %v5335_v45 = vunpack.i.h.bf16 %v7450_v29  ;;  %v5334_v53 = vunpack.i.l.bf16 %v7450_v29 }
 0x28e   :  { %v2886_v52 = vsel %vm2874_vm8, %v2869_v19, %v5325_v63  ;;  %v2885_v15 = vsel %vm2874_vm8, %v2868_v36, %v5324_v13  ;;  %v2786_v8 = vsel %vm72_vm1, %v2770_v14, %v5335_v45 }
 0x28f   :  { %v5343_v47 = vpop.permute.xlu0 %5342  ;;  %v7452_v22 = vpop.permute.xlu1 %5337 }
 0x290   :  { %v5345_v31 = vunpack.i.h.bf16 %v5343_v47  ;;  %v5344_v30 = vunpack.i.l.bf16 %v5343_v47  ;;  %v5340_v60 = vunpack.i.h.bf16 %v7452_v22  ;;  %v5339_v7 = vunpack.i.l.bf16 %v7452_v22 }
 0x292   :  { %v2903_v2 = vsel %vm2891_vm9, %v2886_v52, %v5345_v31  ;;  %v2902_v32 = vsel %vm2891_vm9, %v2885_v15, %v5344_v30 }
 0x293   :  { %v5348_v1 = vpop.permute.xlu0 %5347  ;;  %v7454_v43 = vpop.permute.xlu1 %5357 }
 0x294   :  { %v5350_v20 = vunpack.i.h.bf16 %v5348_v1  ;;  %v5349_v28 = vunpack.i.l.bf16 %v5348_v1  ;;  %v5360_v63 = vunpack.i.h.bf16 %v7454_v43  ;;  %v5359_v13 = vunpack.i.l.bf16 %v7454_v43 }
 0x296   :  { %v2919_v56 = vsel %vm2908_vm10, %v2902_v32, %v5349_v28  ;;  %v2920_v6 = vsel %vm2908_vm10, %v2903_v2, %v5350_v20  ;;  %v2803_v28 = vsel %vm2789_vm3, %v2786_v8, %v5340_v60 }
 0x297   :  { %v5353_v11 = vpop.permute.xlu0 %5352  ;;  %v7460_v5 = vpop.permute.xlu1 %5362 }
 0x298   :  { %v5355_v17 = vunpack.i.h.bf16 %v5353_v11  ;;  %v5354_v40 = vunpack.i.l.bf16 %v5353_v11  ;;  %v5365_v29 = vunpack.i.h.bf16 %v7460_v5  ;;  %v5364_v30 = vunpack.i.l.bf16 %v7460_v5 }
 0x299   :  { %v2820_v5 = vsel %vm2806_vm4, %v2803_v28, %v5360_v63 }
 0x29a   :  { %v2936_v62 = vsel %vm2925_vm11, %v2919_v56, %v5354_v40  ;;  %v2937_v23 = vsel %vm2925_vm11, %v2920_v6, %v5355_v17  ;;  %v2837_v15 = vsel %vm2823_vm5, %v2820_v5, %v5365_v29 }
 0x29b   :  { %v5378_v9 = vpop.permute.xlu0 %5377  ;;  %v7472_v25 = vpop.permute.xlu1 %5367 }
 0x29c   :  { %v5380_v21 = vunpack.i.h.bf16 %v5378_v9  ;;  %v5379_v16 = vunpack.i.l.bf16 %v5378_v9  ;;  %v5329_v9 = vunpack.i.l.bf16 %v7448_v58  ;;  %v5559_v58 = vld [vmem:[#allocation2 + $0xa5] sm:$0xff]  ;;  %v5370_v35 = vunpack.i.h.bf16 %v7472_v25 }
 0x29d   :  { %v5369_v20 = vunpack.i.l.bf16 %v7472_v25 }
 0x29e   :  { %v2954_v59 = vsel %vm2942_vm12, %v2937_v23, %v5380_v21  ;;  %v2953_v41 = vsel %vm2942_vm12, %v2936_v62, %v5379_v16  ;;  %v2769_v31 = vsel %vm2756_vm2, %v5559_v58, %v5329_v9  ;;  %v2854_v2 = vsel %vm2840_vm6, %v2837_v15, %v5370_v35 }
 0x29f   :  { %v5388_v39 = vpop.permute.xlu0 %5387  ;;  %v7482_v37 = vpop.permute.xlu1 %5372  ;;  %v2785_v22 = vsel %vm72_vm1, %v2769_v31, %v5334_v53 }
 0x2a0   :  { %v5390_v11 = vunpack.i.h.bf16 %v5388_v39  ;;  %v5389_v24 = vunpack.i.l.bf16 %v5388_v39  ;;  %v2802_v43 = vsel %vm2789_vm3, %v2785_v22, %v5339_v7  ;;  %v5375_v39 = vunpack.i.h.bf16 %v7482_v37 }
 0x2a1   :  { %v5374_v36 = vunpack.i.l.bf16 %v7482_v37  ;;  %v2819_v40 = vsel %vm2806_vm4, %v2802_v43, %v5359_v13 }
 0x2a2   :  { %v2836_v52 = vsel %vm2823_vm5, %v2819_v40, %v5364_v30  ;;  %v2871_v37 = vsel %vm2857_vm7, %v2854_v2, %v5375_v39 }
 0x2a3   :  { %v5383_v33 = vpop.permute.xlu1 %5382  ;;  %v7492_v10 = vpop.permute.xlu0 %5397  ;;  %v2853_v16 = vsel %vm2840_vm6, %v2836_v52, %v5369_v20 }
 0x2a4   :  { %v5385_v47 = vunpack.i.h.bf16 %v5383_v33  ;;  %v5384_v1 = vunpack.i.l.bf16 %v5383_v33  ;;  %v2870_v32 = vsel %vm2857_vm7, %v2853_v16, %v5374_v36  ;;  %v5400_v56 = vunpack.i.h.bf16 %v7492_v10 }
 0x2a5   :  { %v5399_v6 = vunpack.i.l.bf16 %v7492_v10 }
 0x2a6   :  { %v2970_v46 = vsel %vm2959_vm13, %v2953_v41, %v5384_v1  ;;  %v2971_v26 = vsel %vm2959_vm13, %v2954_v59, %v5385_v47 }
 0x2a7   :  { %v5393_v54 = vpop.permute.xlu1 %5392  ;;  %v7500_v57 = vpop.permute.xlu0 %5402  ;;  %v2987_v51 = vsel %vm2976_vm14, %v2970_v46, %v5389_v24  ;;  %v2988_v49 = vsel %vm2976_vm14, %v2971_v26, %v5390_v11 }
 0x2a8   :  { %v5395_v27 = vunpack.i.h.bf16 %v5393_v54  ;;  %v5394_v50 = vunpack.i.l.bf16 %v5393_v54  ;;  %v5405_v23 = vunpack.i.h.bf16 %v7500_v57  ;;  %v5404_v47 = vunpack.i.l.bf16 %v7500_v57  ;;  %v5560_v54 = vld [vmem:[#allocation2 + $0xbb] sm:$0xff] }
 0x2a9   :  { %v2772_v57 = vsel %vm2756_vm2, %v7195_v61, %v5400_v56 }
 0x2aa   :  { %v3004_v18 = vsel %vm2993_vm15, %v2987_v51, %v5394_v50  ;;  %v3005_v4 = vsel %vm2993_vm15, %v2988_v49, %v5395_v27  ;;  %v2771_v27 = vsel %vm2756_vm2, %v5560_v54, %v5399_v6  ;;  %vm3310_vm2 = vcmask 1040384  }
 0x2ab   :  { %4689 = vmatprep.mubr.f32.mxu0 %v3004_v18  ;;  %v7506_v38 = vpop.permute.xlu0 %5412  ;;  %v5408_v34 = vpop.permute.xlu1 %5407 }
 0x2ac   :  { %4690 = vmatmul.mubr.f32.gmra.mrb[134].mxu0 %v3005_v4  ;;  %v5410_v25 = vunpack.i.h.bf16 %v5408_v34  ;;  %v5409_v21 = vunpack.i.l.bf16 %v5408_v34  ;;  %v5415_v1 = vunpack.i.h.bf16 %v7506_v38  ;;  %v5414_v59 = vunpack.i.l.bf16 %v7506_v38 }
 0x2ad   :  { %v2787_v34 = vsel %vm72_vm1, %v2771_v27, %v5404_v47 }
 0x2ae   :  { %v2888_v41 = vsel %vm2874_vm8, %v2871_v37, %v5410_v25  ;;  %v2887_v46 = vsel %vm2874_vm8, %v2870_v32, %v5409_v21 }
 0x2af   :  { %v7508_v3 = vpop.permute.xlu1 %5417  ;;  %v7510_v55 = vpop.permute.xlu0 %5422  ;;  %v2904_v49 = vsel %vm2891_vm9, %v2887_v46, %v5414_v59  ;;  %v2905_v18 = vsel %vm2891_vm9, %v2888_v41, %v5415_v1 }
 0x2b0   :  { %v5420_v26 = vunpack.i.h.bf16 %v7508_v3  ;;  %v5419_v11 = vunpack.i.l.bf16 %v7508_v3  ;;  %v5425_v10 = vunpack.i.h.bf16 %v7510_v55  ;;  %v5424_v24 = vunpack.i.l.bf16 %v7510_v55 }
 0x2b1   :  { %v2788_v3 = vsel %vm72_vm1, %v2772_v57, %v5405_v23 }
 0x2b2   :  { %v2921_v55 = vsel %vm2908_vm10, %v2904_v49, %v5419_v11  ;;  %v2922_v0 = vsel %vm2908_vm10, %v2905_v18, %v5420_v26  ;;  %v2805_v9 = vsel %vm2789_vm3, %v2788_v3, %v5425_v10  ;;  %v2804_v61 = vsel %vm2789_vm3, %v2787_v34, %v5424_v24 }
 0x2b3   :  { %v7518_v42 = vpop.permute.xlu0 %5427  ;;  %v7520_v44 = vpop.permute.xlu1 %5437 }
 0x2b4   :  { %v5430_v45 = vunpack.i.h.bf16 %v7518_v42  ;;  %v5429_v53 = vunpack.i.l.bf16 %v7518_v42  ;;  %v5440_v60 = vunpack.i.h.bf16 %v7520_v44  ;;  %v5439_v7 = vunpack.i.l.bf16 %v7520_v44 }
 0x2b6   :  { %v2939_v42 = vsel %vm2925_vm11, %v2922_v0, %v5430_v45  ;;  %v2938_v43 = vsel %vm2925_vm11, %v2921_v55, %v5429_v53 }
 0x2b7   :  { %v7536_v19 = vpop.permute.xlu1 %5447  ;;  %v5433_v17 = vpop.permute.xlu0 %5432 }
 0x2b8   :  { %v5435_v4 = vunpack.i.h.bf16 %v5433_v17  ;;  %v5434_v38 = vunpack.i.l.bf16 %v5433_v17  ;;  %v5449_v23 = vunpack.i.l.bf16 %v7536_v19 }
 0x2ba   :  { %v2822_v58 = vsel %vm2806_vm4, %v2805_v9, %v5435_v4  ;;  %v2821_v31 = vsel %vm2806_vm4, %v2804_v61, %v5434_v38 }
 0x2bb   :  { %v5453_v33 = vpop.permute.xlu1 %5452  ;;  %v5443_v62 = vpop.permute.xlu0 %5442  ;;  %v2838_v39 = vsel %vm2823_vm5, %v2821_v31, %v5439_v7  ;;  %v2839_v36 = vsel %vm2823_vm5, %v2822_v58, %v5440_v60 }
 0x2bc   :  { %v5455_v63 = vunpack.i.h.bf16 %v5453_v33  ;;  %v5454_v13 = vunpack.i.l.bf16 %v5453_v33  ;;  %v5445_v22 = vunpack.i.h.bf16 %v5443_v62  ;;  %v5444_v8 = vunpack.i.l.bf16 %v5443_v62 }
 0x2bd   :  { %v5450_v62 = vunpack.i.h.bf16 %v7536_v19 }
 0x2be   :  { %v2956_v44 = vsel %vm2942_vm12, %v2939_v42, %v5455_v63  ;;  %v2955_v28 = vsel %vm2942_vm12, %v2938_v43, %v5454_v13  ;;  %v2855_v21 = vsel %vm2840_vm6, %v2838_v39, %v5444_v8  ;;  %v2856_v16 = vsel %vm2840_vm6, %v2839_v36, %v5445_v22  ;;  %v7618_v8 = vld [vmem:[%s7907_s4] ss:$0 sm:$0xff] }
 0x2bf   :  { %v5458_v50 = vpop.permute.xlu1 %5457  ;;  %v7561_v51 = vpop.permute.xlu0 %5472  ;;  %v2872_v11 = vsel %vm2857_vm7, %v2855_v21, %v5449_v23  ;;  %v2873_v10 = vsel %vm2857_vm7, %v2856_v16, %v5450_v62  ;;  %v7992_v22 = vmov 0.0  }
 0x2c0   :  { %v5460_v29 = vunpack.i.h.bf16 %v5458_v50  ;;  %v5459_v30 = vunpack.i.l.bf16 %v5458_v50  ;;  %v5475_v37 = vunpack.i.h.bf16 %v7561_v51  ;;  %v5474_v56 = vunpack.i.l.bf16 %v7561_v51 }
 0x2c2   :  { %v2972_v15 = vsel %vm2959_vm13, %v2955_v28, %v5459_v30  ;;  %v2973_v25 = vsel %vm2959_vm13, %v2956_v44, %v5460_v29  ;;  %v2890_v27 = vsel %vm2874_vm8, %v2873_v10, %v5475_v37  ;;  %v2889_v57 = vsel %vm2874_vm8, %v2872_v11, %v5474_v56 }
 0x2c3   :  { %v5463_v48 = vpop.permute.xlu1 %5462  ;;  %v5478_v14 = vpop.permute.xlu0 %5477 }
 0x2c4   :  { %v5465_v35 = vunpack.i.h.bf16 %v5463_v48  ;;  %v5464_v20 = vunpack.i.l.bf16 %v5463_v48  ;;  %v5480_v47 = vunpack.i.h.bf16 %v5478_v14  ;;  %v5479_v1 = vunpack.i.l.bf16 %v5478_v14 }
 0x2c6   :  { %v2989_v2 = vsel %vm2976_vm14, %v2972_v15, %v5464_v20  ;;  %v2990_v32 = vsel %vm2976_vm14, %v2973_v25, %v5465_v35  ;;  %v2906_v19 = vsel %vm2891_vm9, %v2889_v57, %v5479_v1  ;;  %v2907_v50 = vsel %vm2891_vm9, %v2890_v27, %v5480_v47 }
 0x2c7   :  { %v5468_v17 = vpop.permute.xlu1 %5467  ;;  %v5483_v5 = vpop.permute.xlu0 %5482 }
 0x2c8   :  { %v5470_v40 = vunpack.i.h.bf16 %v5468_v17  ;;  %v5469_v52 = vunpack.i.l.bf16 %v5468_v17  ;;  %v5485_v41 = vunpack.i.h.bf16 %v5483_v5  ;;  %v5484_v46 = vunpack.i.l.bf16 %v5483_v5 }
 0x2ca   :  { %v3006_v6 = vsel %vm2993_vm15, %v2989_v2, %v5469_v52  ;;  %v3007_v33 = vsel %vm2993_vm15, %v2990_v32, %v5470_v40  ;;  %v2923_v49 = vsel %vm2908_vm10, %v2906_v19, %v5484_v46  ;;  %v2924_v18 = vsel %vm2908_vm10, %v2907_v50, %v5485_v41 }
 0x2cb   :  { %4692 = vmatprep.mubr.f32.mxu0 %v3006_v6  ;;  %v5488_v59 = vpop.permute.xlu0 %5487  ;;  %v5498_v26 = vpop.permute.xlu1 %5497 }
 0x2cc   :  { %4693 = vmatmul.mubr.f32.gmra.mrb[136].mxu0 %v3007_v33  ;;  %v5490_v24 = vunpack.i.h.bf16 %v5488_v59  ;;  %v5489_v54 = vunpack.i.l.bf16 %v5488_v59  ;;  %v5500_v61 = vunpack.i.h.bf16 %v5498_v26  ;;  %v5499_v45 = vunpack.i.l.bf16 %v5498_v26 }
 0x2ce   :  { %v2940_v34 = vsel %vm2925_vm11, %v2923_v49, %v5489_v54  ;;  %v2941_v3 = vsel %vm2925_vm11, %v2924_v18, %v5490_v24 }
 0x2cf   :  { %v5493_v51 = vpop.permute.xlu0 %5492  ;;  %v5508_v9 = vpop.permute.xlu1 %5507 }
 0x2d0   :  { %v5495_v4 = vunpack.i.h.bf16 %v5493_v51  ;;  %v5494_v38 = vunpack.i.l.bf16 %v5493_v51  ;;  %v5510_v63 = vunpack.i.h.bf16 %v5508_v9  ;;  %v5509_v13 = vunpack.i.l.bf16 %v5508_v9 }
 0x2d2   :  { %v2958_v55 = vsel %vm2942_vm12, %v2941_v3, %v5495_v4  ;;  %v2957_v0 = vsel %vm2942_vm12, %v2940_v34, %v5494_v38  ;;  %v3488_v38 = vld [vmem:[%s7908_s5 + $0x80] sm:$0xff]  ;;  %v3489_v34 = vld [vmem:[%s7908_s5 + $0x88] sm:$0xff] }
 0x2d3   :  { %v5503_v53 = vpop.permute.xlu0 %5502  ;;  %v2974_v48 = vsel %vm2959_vm13, %v2957_v0, %v5499_v45  ;;  %v2975_v14 = vsel %vm2959_vm13, %v2958_v55, %v5500_v61  ;;  %v4812_v55 = vpack.c.bf16 %v3489_v34, %v3488_v38  ;;  %v3472_v61 = vld [vmem:[%s7908_s5] sm:$0xff]  ;;  %v3473_v45 = vld [vmem:[%s7908_s5 + $0x8] sm:$0xff] }
 0x2d4   :  { %v5505_v60 = vunpack.i.h.bf16 %v5503_v53  ;;  %v5504_v7 = vunpack.i.l.bf16 %v5503_v53  ;;  %v4814_v53 = vpack.c.bf16 %v3473_v45, %v3472_v61 }
 0x2d5   :  { %4813 = vmatprep.subr.bf16.mxu1 %v4812_v55 }
 0x2d6   :  { %v2991_v58 = vsel %vm2976_vm14, %v2974_v48, %v5504_v7  ;;  %v2992_v31 = vsel %vm2976_vm14, %v2975_v14, %v5505_v60  ;;  %4815 = vmatpush3.bf16.msra.mxu1 %v4814_v53 }
 0x2d7   :  { %v3008_v29 = vsel %vm2993_vm15, %v2991_v58, %v5509_v13  ;;  %v3009_v30 = vsel %vm2993_vm15, %v2992_v31, %v5510_v63  ;;  %v3490_v58 = vld [vmem:[%s7908_s5 + $0x90] sm:$0xff]  ;;  %v3491_v31 = vld [vmem:[%s7908_s5 + $0x98] sm:$0xff] }
 0x2d8   :  { %4695 = vmatprep.mubr.f32.mxu0 %v3008_v29  ;;  %v3474_v29 = vld [vmem:[%s7908_s5 + $0x10] sm:$0xff] }
 0x2d9   :  { %4696 = vmatmul.mubr.f32.gmra.mrb[138].mxu0 %v3009_v30  ;;  %v4816_v30 = vpack.c.bf16 %v3491_v31, %v3490_v58 }
 0x2da   :  { %4730 = vmatprep.mubr.msk.f32.mxu0 %vm5586_vm0, %v7992_v22 }
 0x2db   :  { %4817 = vmatprep.subr.bf16.mxu1 %v4816_v30 }
 0x2eb   :  { %v4676_v35 = vpop.f32.mrb[124].mxu0 }
 0x2ec   :  { %v3105_v20 = vadd.f32 %v4676_v35, %v7618_v8  ;;  %v3099_v42 = vpop.f32.mrb[125].mxu0  ;;  %v3475_v35 = vld [vmem:[%s7908_s5 + $0x18] sm:$0xff] }
 0x2ed   :  { %v3100_v43 = vadd.f32 %v7618_v8, %v3099_v42  ;;  %v3493_v42 = vld [vmem:[%s7908_s5 + $0xa8] sm:$0xff] }
 0x2ee   :  { %v3179_v44 = vmax.f32 %v3105_v20, 0.0  ;;  %v3492_v20 = vld [vmem:[%s7908_s5 + $0xa0] sm:$0xff] }
 0x2ef   :  { %v3178_v28 = vmax.f32 %v3100_v43, 0.0 }
 0x2f0   :  { %3195 = vst [vmem:[#allocation3 + $0x8] sm:$0xff] %v3179_v44  ;;  %v4818_v44 = vpack.c.bf16 %v3475_v35, %v3474_v29 }
 0x2f1   :  { %3194 = vst [vmem:[#allocation3] sm:$0xff] %v3178_v28  ;;  %v4820_v28 = vpack.c.bf16 %v3493_v42, %v3492_v20 }
 0x2f2   :  { %4819 = vmatpush3.bf16.msra.mxu1 %v4818_v44 }
 0x2f3   :  { %4821 = vmatprep.subr.bf16.mxu1 %v4820_v28 }
 0x2f7   :  { %v3214_v39 = vld [vmem:[#allocation3 + $0x8] ss:$2 sm:$0xf]  ;;  %v3216_v36 = vld [vmem:[#allocation3 + $0x9] ss:$2 sm:$0xf] }
 0x2f8   :  { %v3218_v17 = vmax.f32 %v3214_v39, %v3216_v36  ;;  %v3210_v5 = vld [vmem:[#allocation3] ss:$2 sm:$0xf]  ;;  %v3212_v40 = vld [vmem:[#allocation3 + $0x1] ss:$2 sm:$0xf] }
 0x2f9   :  { %v3217_v52 = vmax.f32 %v3210_v5, %v3212_v40  ;;  %v3476_v39 = vld [vmem:[%s7908_s5 + $0x20] sm:$0xff]  ;;  %v3477_v36 = vld [vmem:[%s7908_s5 + $0x28] sm:$0xff]  ;;  %v3495_v5 = vld [vmem:[%s7908_s5 + $0xb8] sm:$0xff] }
 0x2fa   :  { %v4822_v40 = vpack.c.bf16 %v3477_v36, %v3476_v39 }
 0x2fb   :  { %v3219_v15 = vmax.f32 %v3217_v52, %v3218_v17  ;;  %v3494_v17 = vld [vmem:[%s7908_s5 + $0xb0] sm:$0xff] }
 0x2fc   :  { %v4824_v52 = vpack.c.bf16 %v3495_v5, %v3494_v17  ;;  %4823 = vmatpush3.bf16.msra.mxu1 %v4822_v40 }
 0x2fd   :  { %3220 = vst [vmem:[#allocation4] sm:$0xf] %v3219_v15  ;;  %v3478_v15 = vld [vmem:[%s7908_s5 + $0x30] sm:$0xff] }
 0x2fe   :  { %4825 = vmatprep.subr.bf16.mxu1 %v4824_v52 }
 0x307   :  { %v4679_v25 = vpop.f32.mrb[126].mxu0 }
 0x308   :  { %v3115_v21 = vadd.f32 %v4679_v25, %v7618_v8  ;;  %v3109_v16 = vpop.f32.mrb[127].mxu0  ;;  %v3479_v25 = vld [vmem:[%s7908_s5 + $0x38] sm:$0xff] }
 0x309   :  { %v3110_v2 = vadd.f32 %v7618_v8, %v3109_v16  ;;  %v3497_v16 = vld [vmem:[%s7908_s5 + $0xc8] sm:$0xff] }
 0x30a   :  { %v3181_v32 = vmax.f32 %v3115_v21, 0.0  ;;  %v3496_v21 = vld [vmem:[%s7908_s5 + $0xc0] sm:$0xff] }
 0x30b   :  { %v3180_v37 = vmax.f32 %v3110_v2, 0.0  ;;  %v4826_v2 = vpack.c.bf16 %v3479_v25, %v3478_v15 }
 0x30c   :  { %3197 = vst [vmem:[#allocation3 + $0x18] sm:$0xff] %v3181_v32  ;;  %v4828_v32 = vpack.c.bf16 %v3497_v16, %v3496_v21 }
 0x30d   :  { %3196 = vst [vmem:[#allocation3 + $0x10] sm:$0xff] %v3180_v37  ;;  %v3480_v37 = vld [vmem:[%s7908_s5 + $0x40] sm:$0xff]  ;;  %4827 = vmatpush3.bf16.msra.mxu1 %v4826_v2 }
 0x30e   :  { %4829 = vmatprep.subr.bf16.mxu1 %v4828_v32 }
 0x313   :  { %v3226_v56 = vld [vmem:[#allocation3 + $0x18] ss:$2 sm:$0xf]  ;;  %v3228_v6 = vld [vmem:[#allocation3 + $0x19] ss:$2 sm:$0xf] }
 0x314   :  { %v3230_v33 = vmax.f32 %v3226_v56, %v3228_v6  ;;  %v3222_v62 = vld [vmem:[#allocation3 + $0x10] ss:$2 sm:$0xf]  ;;  %v3224_v23 = vld [vmem:[#allocation3 + $0x11] ss:$2 sm:$0xf] }
 0x315   :  { %v3229_v47 = vmax.f32 %v3222_v62, %v3224_v23  ;;  %v3481_v56 = vld [vmem:[%s7908_s5 + $0x48] sm:$0xff]  ;;  %v3499_v62 = vld [vmem:[%s7908_s5 + $0xd8] sm:$0xff] }
 0x317   :  { %v3231_v1 = vmax.f32 %v3229_v47, %v3230_v33  ;;  %v3498_v33 = vld [vmem:[%s7908_s5 + $0xd0] sm:$0xff] }
 0x319   :  { %3232 = vst [vmem:[#allocation4 + $0x4] sm:$0xf] %v3231_v1 }
 0x31f   :  { %v4682_v59 = vpop.f32.mrb[128].mxu0 }
 0x320   :  { %v3125_v41 = vadd.f32 %v4682_v59, %v7618_v8  ;;  %v3119_v46 = vpop.f32.mrb[129].mxu0  ;;  %v4830_v59 = vpack.c.bf16 %v3481_v56, %v3480_v37 }
 0x321   :  { %v3120_v26 = vadd.f32 %v7618_v8, %v3119_v46  ;;  %v4832_v46 = vpack.c.bf16 %v3499_v62, %v3498_v33 }
 0x322   :  { %v3183_v11 = vmax.f32 %v3125_v41, 0.0  ;;  %4831 = vmatpush3.bf16.msra.mxu1 %v4830_v59 }
 0x323   :  { %v3182_v10 = vmax.f32 %v3120_v26, 0.0  ;;  %v3482_v26 = vld [vmem:[%s7908_s5 + $0x50] sm:$0xff]  ;;  %4833 = vmatprep.subr.bf16.mxu1 %v4832_v46 }
 0x324   :  { %3199 = vst [vmem:[#allocation3 + $0x28] sm:$0xff] %v3183_v11  ;;  %v3483_v11 = vld [vmem:[%s7908_s5 + $0x58] sm:$0xff] }
 0x325   :  { %3198 = vst [vmem:[#allocation3 + $0x20] sm:$0xff] %v3182_v10 }
 0x32b   :  { %v3238_v24 = vld [vmem:[#allocation3 + $0x28] ss:$2 sm:$0xf]  ;;  %v3240_v54 = vld [vmem:[#allocation3 + $0x29] ss:$2 sm:$0xf] }
 0x32c   :  { %v3242_v27 = vmax.f32 %v3238_v24, %v3240_v54  ;;  %v3234_v57 = vld [vmem:[#allocation3 + $0x20] ss:$2 sm:$0xf]  ;;  %v3236_v19 = vld [vmem:[#allocation3 + $0x21] ss:$2 sm:$0xf] }
 0x32d   :  { %v3241_v50 = vmax.f32 %v3234_v57, %v3236_v19  ;;  %v3500_v24 = vld [vmem:[%s7908_s5 + $0xe0] sm:$0xff]  ;;  %v3501_v54 = vld [vmem:[%s7908_s5 + $0xe8] sm:$0xff] }
 0x32e   :  { %v4836_v57 = vpack.c.bf16 %v3501_v54, %v3500_v24  ;;  %v3484_v19 = vld [vmem:[%s7908_s5 + $0x60] sm:$0xff] }
 0x32f   :  { %v3243_v51 = vmax.f32 %v3241_v50, %v3242_v27  ;;  %v4834_v27 = vpack.c.bf16 %v3483_v11, %v3482_v26  ;;  %v3485_v50 = vld [vmem:[%s7908_s5 + $0x68] sm:$0xff] }
 0x331   :  { %3244 = vst [vmem:[#allocation4 + $0x8] sm:$0xf] %v3243_v51  ;;  %4835 = vmatpush3.bf16.msra.mxu1 %v4834_v27  ;;  %v4838_v51 = vpack.c.bf16 %v3485_v50, %v3484_v19  ;;  %v3502_v50 = vld [vmem:[%s7908_s5 + $0xf0] sm:$0xff] }
 0x332   :  { %4837 = vmatprep.subr.bf16.mxu1 %v4836_v57 }
 0x335   :  { %4839 = vmatpush3.bf16.msra.mxu1 %v4838_v51 }
 0x338   :  { %v3366_v11 = vld [vmem:[#allocation4 + $0xa] sm:$0x1]  ;;  %v3360_v27 = vld [vmem:[#allocation4 + $0x9] sm:$0x1] }
 0x343   :  { %v4685_v49 = vpop.f32.mrb[130].mxu0 }
 0x344   :  { %v3135_v18 = vadd.f32 %v4685_v49, %v7618_v8  ;;  %v3129_v4 = vpop.f32.mrb[131].mxu0 }
 0x345   :  { %v3130_v3 = vadd.f32 %v7618_v8, %v3129_v4 }
 0x346   :  { %v3185_v0 = vmax.f32 %v3135_v18, 0.0 }
 0x347   :  { %v3184_v9 = vmax.f32 %v3130_v3, 0.0 }
 0x348   :  { %3201 = vst [vmem:[#allocation3 + $0x38] sm:$0xff] %v3185_v0 }
 0x349   :  { %3200 = vst [vmem:[#allocation3 + $0x30] sm:$0xff] %v3184_v9 }
 0x34f   :  { %v3250_v60 = vld [vmem:[#allocation3 + $0x38] ss:$2 sm:$0xf]  ;;  %v3252_v7 = vld [vmem:[#allocation3 + $0x39] ss:$2 sm:$0xf] }
 0x350   :  { %v3254_v63 = vmax.f32 %v3250_v60, %v3252_v7  ;;  %v3246_v13 = vld [vmem:[#allocation3 + $0x30] ss:$2 sm:$0xf]  ;;  %v3248_v48 = vld [vmem:[#allocation3 + $0x31] ss:$2 sm:$0xf] }
 0x351   :  { %v3253_v14 = vmax.f32 %v3246_v13, %v3248_v48 }
 0x353   :  { %v3255_v43 = vmax.f32 %v3253_v14, %v3254_v63 }
 0x355   :  { %3256 = vst [vmem:[#allocation4 + $0xc] sm:$0xf] %v3255_v43 }
 0x35b   :  { %v4688_v6 = vpop.f32.mrb[132].mxu0 }
 0x35c   :  { %v3145_v23 = vadd.f32 %v4688_v6, %v7618_v8  ;;  %v3139_v47 = vpop.f32.mrb[133].mxu0 }
 0x35d   :  { %v3140_v1 = vadd.f32 %v7618_v8, %v3139_v47 }
 0x35e   :  { %v3187_v41 = vmax.f32 %v3145_v23, 0.0 }
 0x35f   :  { %v3186_v10 = vmax.f32 %v3140_v1, 0.0 }
 0x360   :  { %3203 = vst [vmem:[#allocation3 + $0x48] sm:$0xff] %v3187_v41  ;;  %v3318_v41 = vld [vmem:[#allocation4 + $0x2] sm:$0x1] }
 0x361   :  { %3202 = vst [vmem:[#allocation3 + $0x40] sm:$0xff] %v3186_v10  ;;  %v3312_v10 = vld [vmem:[#allocation4 + $0x1] sm:$0x1] }
 0x367   :  { %v3262_v49 = vld [vmem:[#allocation3 + $0x48] ss:$2 sm:$0xf]  ;;  %v3264_v18 = vld [vmem:[#allocation3 + $0x49] ss:$2 sm:$0xf] }
 0x368   :  { %v3266_v4 = vmax.f32 %v3262_v49, %v3264_v18  ;;  %v3258_v38 = vld [vmem:[#allocation3 + $0x40] ss:$2 sm:$0xf]  ;;  %v3260_v34 = vld [vmem:[#allocation3 + $0x41] ss:$2 sm:$0xf] }
 0x369   :  { %v3265_v3 = vmax.f32 %v3258_v38, %v3260_v34  ;;  %v3503_v18 = vld [vmem:[%s7908_s5 + $0xf8] sm:$0xff] }
 0x36a   :  { %v3487_v38 = vld [vmem:[%s7908_s5 + $0x78] sm:$0xff] }
 0x36b   :  { %v3267_v55 = vmax.f32 %v3265_v3, %v3266_v4  ;;  %v3486_v4 = vld [vmem:[%s7908_s5 + $0x70] sm:$0xff] }
 0x36d   :  { %3268 = vst [vmem:[#allocation4 + $0x10] sm:$0xf] %v3267_v55 }
 0x374   :  { %v3319_v32 = vld [vmem:[#allocation4 + $0x12] sm:$0x1]  ;;  %v3313_v37 = vld [vmem:[#allocation4 + $0x11] sm:$0x1]  ;;  %v3325_v33 = vld [vmem:[#allocation4 + $0x13] sm:$0x1] }
 0x375   :  { %v3321_v56 = vrot.slane %v3319_v32, 7  ;;  %v3315_v6 = vrot.slane %v3313_v37, 7  ;;  %v3327_v49 = vrot.slane %v3325_v33, 7  ;;  %v3582_v32 = vld [vmem:[%s7910_s7 + $0x8] sm:$0xff]  ;;  %v3583_v37 = vld [vmem:[%s7910_s7 + $0x10] sm:$0xff] }
 0x377   :  { %v3323_v51 = vsel %vm3310_vm2, %v3318_v41, %v3321_v56  ;;  %v3317_v55 = vsel %vm3310_vm2, %v3312_v10, %v3315_v6  ;;  %v3396_v41 = vld [vmem:[#allocation4 + $0xf] sm:$0x1]  ;;  %v3348_v10 = vld [vmem:[#allocation4 + $0x7] sm:$0x1] }
 0x37f   :  { %v4691_v0 = vpop.f32.mrb[134].mxu0 }
 0x380   :  { %v3155_v9 = vadd.f32 %v4691_v0, %v7618_v8  ;;  %v3149_v61 = vpop.f32.mrb[135].mxu0 }
 0x381   :  { %v3150_v45 = vadd.f32 %v7618_v8, %v3149_v61 }
 0x382   :  { %v3189_v53 = vmax.f32 %v3155_v9, 0.0 }
 0x383   :  { %v3188_v60 = vmax.f32 %v3150_v45, 0.0  ;;  %v3372_v45 = vld [vmem:[#allocation4 + $0xb] sm:$0x1] }
 0x384   :  { %3205 = vst [vmem:[#allocation3 + $0x58] sm:$0xff] %v3189_v53 }
 0x385   :  { %3204 = vst [vmem:[#allocation3 + $0x50] sm:$0xff] %v3188_v60  ;;  %v4840_v60 = vpack.c.bf16 %v3503_v18, %v3502_v50  ;;  %v3588_v18 = vld [vmem:[%s7910_s7 + $0x38] sm:$0xff] }
 0x387   :  { %4841 = vmatprep.subr.bf16.mxu1 %v4840_v60 }
 0x38b   :  { %v3274_v7 = vld [vmem:[#allocation3 + $0x58] ss:$2 sm:$0xf]  ;;  %v3276_v63 = vld [vmem:[#allocation3 + $0x59] ss:$2 sm:$0xf] }
 0x38c   :  { %v3278_v13 = vmax.f32 %v3274_v7, %v3276_v63  ;;  %v3270_v48 = vld [vmem:[#allocation3 + $0x50] ss:$2 sm:$0xf]  ;;  %v3272_v14 = vld [vmem:[#allocation3 + $0x51] ss:$2 sm:$0xf]  ;;  %v4842_v7 = vpack.c.bf16 %v3487_v38, %v3486_v4 }
 0x38d   :  { %v3277_v58 = vmax.f32 %v3270_v48, %v3272_v14  ;;  %v3324_v63 = vld [vmem:[#allocation4 + $0x3] sm:$0x1]  ;;  %v3589_v38 = vld [vmem:[%s7910_s7 + $0x40] sm:$0xff] }
 0x38e   :  { %4843 = vmatpush3.bf16.msra.mxu1 %v4842_v7  ;;  %v3306_v7 = vld [vmem:[#allocation4 + $0x10] sm:$0x1] }
 0x38f   :  { %v3279_v31 = vmax.f32 %v3277_v58, %v3278_v13  ;;  %v3329_v13 = vsel %vm3310_vm2, %v3324_v63, %v3327_v49  ;;  %4868 = vmatprep.subr.bf16.mxu1 %v7965_v12  ;;  %v3587_v49 = vld [vmem:[%s7910_s7 + $0x30] sm:$0xff] }
 0x390   :  { %v4854_v4 = vpack.c.bf16 %v3588_v18, %v3587_v49  ;;  %v3679_v18 = vld [vmem:[%s7912_s9 + $0x20] sm:$0xff] }
 0x391   :  { %3280 = vst [vmem:[#allocation4 + $0x14] sm:$0xf] %v3279_v31 }
 0x398   :  { %v3331_v48 = vld [vmem:[#allocation4 + $0x14] sm:$0x1]  ;;  %v3337_v58 = vld [vmem:[#allocation4 + $0x15] sm:$0x1] }
 0x399   :  { %v3333_v31 = vrot.slane %v3331_v48, 7 }
 0x39f   :  { %v4694_v29 = vpop.f32.mrb[136].mxu0 }
 0x3a0   :  { %v3165_v30 = vadd.f32 %v4694_v29, %v7618_v8  ;;  %v3159_v35 = vpop.f32.mrb[137].mxu0  ;;  %v3330_v29 = vld [vmem:[#allocation4 + $0x4] sm:$0x1] }
 0x3a1   :  { %v3160_v20 = vadd.f32 %v7618_v8, %v3159_v35  ;;  %v3343_v35 = vld [vmem:[#allocation4 + $0x16] sm:$0x1] }
 0x3a2   :  { %v3191_v42 = vmax.f32 %v3165_v30, 0.0  ;;  %v3339_v30 = vrot.slane %v3337_v58, 7 }
 0x3a3   :  { %v3190_v43 = vmax.f32 %v3160_v20, 0.0  ;;  %v3349_v20 = vld [vmem:[#allocation4 + $0x17] sm:$0x1] }
 0x3a4   :  { %3207 = vst [vmem:[#allocation3 + $0x68] sm:$0xff] %v3191_v42  ;;  %v3378_v42 = vld [vmem:[#allocation4 + $0xc] sm:$0x1] }
 0x3a5   :  { %3206 = vst [vmem:[#allocation3 + $0x60] sm:$0xff] %v3190_v43 }
 0x3ab   :  { %v3286_v44 = vld [vmem:[#allocation3 + $0x68] ss:$2 sm:$0xf]  ;;  %v3288_v28 = vld [vmem:[#allocation3 + $0x69] ss:$2 sm:$0xf] }
 0x3ac   :  { %v3290_v39 = vmax.f32 %v3286_v44, %v3288_v28  ;;  %v3282_v36 = vld [vmem:[#allocation3 + $0x60] ss:$2 sm:$0xf]  ;;  %v3284_v17 = vld [vmem:[#allocation3 + $0x61] ss:$2 sm:$0xf] }
 0x3ad   :  { %v3289_v5 = vmax.f32 %v3282_v36, %v3284_v17  ;;  %v4697_v40 = vpop.f32.mrb[138].mxu0  ;;  %v3336_v44 = vld [vmem:[#allocation4 + $0x5] sm:$0x1]  ;;  %v3384_v28 = vld [vmem:[#allocation4 + $0xd] sm:$0x1] }
 0x3ae   :  { %v3175_v52 = vadd.f32 %v4697_v40, %v7618_v8  ;;  %v3169_v15 = vpop.f32.mrb[139].mxu0  ;;  %v3341_v6 = vsel %vm3310_vm2, %v3336_v44, %v3339_v30  ;;  %v3354_v30 = vld [vmem:[#allocation4 + $0x8] sm:$0x1] }
 0x3af   :  { %v3291_v25 = vmax.f32 %v3289_v5, %v3290_v39  ;;  %v3170_v21 = vadd.f32 %v7618_v8, %v3169_v15  ;;  %v3335_v15 = vsel %vm3310_vm2, %v3330_v29, %v3333_v31 }
 0x3b0   :  { %v3193_v16 = vmax.f32 %v3175_v52, 0.0 }
 0x3b1   :  { %3292 = vst [vmem:[#allocation4 + $0x18] sm:$0xf] %v3291_v25  ;;  %v3192_v2 = vmax.f32 %v3170_v21, 0.0  ;;  %v3345_v25 = vrot.slane %v3343_v35, 7  ;;  %v3351_v21 = vrot.slane %v3349_v20, 7 }
 0x3b2   :  { %3209 = vst [vmem:[#allocation3 + $0x78] sm:$0xff] %v3193_v16  ;;  %v3305_v35 = vld [vmem:[#allocation4] sm:$0x1] }
 0x3b3   :  { %3208 = vst [vmem:[#allocation3 + $0x70] sm:$0xff] %v3192_v2  ;;  %v3581_v2 = vld [vmem:[%s7910_s7] sm:$0xff] }
 0x3b8   :  { %v3367_v62 = vld [vmem:[#allocation4 + $0x1a] sm:$0x1]  ;;  %v3361_v23 = vld [vmem:[#allocation4 + $0x19] sm:$0x1]  ;;  %v3373_v47 = vld [vmem:[#allocation4 + $0x1b] sm:$0x1] }
 0x3b9   :  { %v3298_v1 = vld [vmem:[#allocation3 + $0x78] ss:$2 sm:$0xf]  ;;  %v3300_v59 = vld [vmem:[#allocation3 + $0x79] ss:$2 sm:$0xf] }
 0x3ba   :  { %v3302_v46 = vmax.f32 %v3298_v1, %v3300_v59  ;;  %v3294_v26 = vld [vmem:[#allocation3 + $0x70] ss:$2 sm:$0xf]  ;;  %v3296_v8 = vld [vmem:[#allocation3 + $0x71] ss:$2 sm:$0xf] }
 0x3bb   :  { %v3301_v24 = vmax.f32 %v3294_v26, %v3296_v8  ;;  %v3369_v54 = vrot.slane %v3367_v62, 7  ;;  %v3363_v57 = vrot.slane %v3361_v23, 7  ;;  %v3375_v19 = vrot.slane %v3373_v47, 7  ;;  %v3584_v23 = vld [vmem:[%s7910_s7 + $0x18] sm:$0xff]  ;;  %v3390_v59 = vld [vmem:[#allocation4 + $0xe] sm:$0x1] }
 0x3bc   :  { %v4845_v62 = vpack.c.bf16 %v3582_v32, %v3581_v2  ;;  %v3355_v63 = vld [vmem:[#allocation4 + $0x18] sm:$0x1] }
 0x3bd   :  { %v3303_v34 = vmax.f32 %v3301_v24, %v3302_v46  ;;  %v3371_v3 = vsel %vm3310_vm2, %v3366_v11, %v3369_v54  ;;  %v3365_v0 = vsel %vm3310_vm2, %v3360_v27, %v3363_v57  ;;  %v3377_v53 = vsel %vm3310_vm2, %v3372_v45, %v3375_v19  ;;  %v3342_v46 = vld [vmem:[#allocation4 + $0x6] sm:$0x1]  ;;  %v3585_v24 = vld [vmem:[%s7910_s7 + $0x20] sm:$0xff]  ;;  %v3586_v54 = vld [vmem:[%s7910_s7 + $0x28] sm:$0xff] }
 0x3be   :  { %v5516_v9 = vpack.i.bf16 %v3323_v51, %v3371_v3  ;;  %v5511_v61 = vpack.i.bf16 %v3317_v55, %v3365_v0  ;;  %v5521_v14 = vpack.i.bf16 %v3329_v13, %v3377_v53  ;;  %4846 = vmatpush3.bf16.msra.mxu0 %v4845_v62  ;;  %v4848_v11 = vpack.c.bf16 %v3584_v23, %v3583_v37  ;;  %v3591_v55 = vld [vmem:[%s7910_s7 + $0x50] sm:$0xff]  ;;  %v3592_v0 = vld [vmem:[%s7910_s7 + $0x58] sm:$0xff]  ;;  %v3594_v45 = vld [vmem:[%s7910_s7 + $0x68] sm:$0xff] }
 0x3bf   :  { %3304 = vst [vmem:[#allocation4 + $0x1c] sm:$0xf] %v3303_v34  ;;  %v3347_v27 = vsel %vm3310_vm2, %v3342_v46, %v3345_v25  ;;  %v3353_v57 = vsel %vm3310_vm2, %v3348_v10, %v3351_v21  ;;  %4847 = vmatprep.subr.bf16.mxu0 %v7965_v12  ;;  %v4851_v51 = vpack.c.bf16 %v3586_v54, %v3585_v24  ;;  %v3590_v34 = vld [vmem:[%s7910_s7 + $0x48] sm:$0xff]  ;;  %v3308_v13 = vrot.slane %v3306_v7, 7  ;;  %v3595_v24 = vld [vmem:[%s7910_s7 + $0x70] sm:$0xff]  ;;  %v3596_v54 = vld [vmem:[%s7910_s7 + $0x78] sm:$0xff] }
 0x3c0   :  { %5517 = vrot.lane.b32.xlu1 %v5516_v9, %s5591_s12  ;;  %5512 = vrot.lane.b32.xlu0 %v5511_v61, %s5590_s30  ;;  %v4857_v3 = vpack.c.bf16 %v3590_v34, %v3589_v38  ;;  %v4860_v9 = vpack.c.bf16 %v3592_v0, %v3591_v55  ;;  %v3593_v61 = vld [vmem:[%s7910_s7 + $0x60] sm:$0xff]  ;;  %v3357_v48 = vrot.slane %v3355_v63, 7  ;;  %v3681_v34 = vld [vmem:[%s7912_s9 + $0x30] sm:$0xff] }
 0x3c1   :  { %v4863_v53 = vpack.c.bf16 %v3594_v45, %v3593_v61  ;;  %v3311_v44 = vsel %vm3310_vm2, %v3305_v35, %v3308_v13  ;;  %v3683_v0 = vld [vmem:[%s7912_s9 + $0x40] sm:$0xff]  ;;  %v3685_v45 = vld [vmem:[%s7912_s9 + $0x50] sm:$0xff]  ;;  %v3688_v63 = vld [vmem:[%s7912_s9 + $0x68] sm:$0xff] }
 0x3c2   :  { %4849 = vmatpush3.bf16.msra.mxu0 %v4848_v11  ;;  %v3687_v7 = vld [vmem:[%s7912_s9 + $0x60] sm:$0xff]  ;;  %v3690_v35 = vld [vmem:[%s7912_s9 + $0x78] sm:$0xff] }
 0x3c3   :  { %4850 = vmatprep.subr.bf16.mxu0 %v7965_v12  ;;  %v4887_v13 = vpack.c.bf16 %v3688_v63, %v3687_v7 }
 0x3c4   :  { %5522 = vrot.lane.b32.xlu0 %v5521_v14, %s5593_s22 }
 0x3c6   :  { %v3379_v43 = vld [vmem:[#allocation4 + $0x1c] sm:$0x1]  ;;  %v3385_v39 = vld [vmem:[#allocation4 + $0x1d] sm:$0x1]  ;;  %v3391_v36 = vld [vmem:[#allocation4 + $0x1e] sm:$0x1]  ;;  %4852 = vmatpush3.bf16.msra.mxu0 %v4851_v51 }
 0x3c7   :  { %v3381_v17 = vrot.slane %v3379_v43, 7  ;;  %v3387_v5 = vrot.slane %v3385_v39, 7  ;;  %v3393_v40 = vrot.slane %v3391_v36, 7  ;;  %v3397_v52 = vld [vmem:[#allocation4 + $0x1f] sm:$0x1]  ;;  %4853 = vmatprep.subr.bf16.mxu0 %v7965_v12  ;;  %v3359_v43 = vsel %vm3310_vm2, %v3354_v30, %v3357_v48  ;;  %v3678_v51 = vld [vmem:[%s7912_s9 + $0x18] sm:$0xff] }
 0x3c8   :  { %v3399_v16 = vrot.slane %v3397_v52, 7  ;;  %v3689_v30 = vld [vmem:[%s7912_s9 + $0x70] sm:$0xff] }
 0x3c9   :  { %v3383_v56 = vsel %vm3310_vm2, %v3378_v42, %v3381_v17  ;;  %v3389_v33 = vsel %vm3310_vm2, %v3384_v28, %v3387_v5  ;;  %v3395_v26 = vsel %vm3310_vm2, %v3390_v59, %v3393_v40 }
 0x3ca   :  { %v5526_v47 = vpack.i.bf16 %v3335_v15, %v3383_v56  ;;  %v5531_v1 = vpack.i.bf16 %v3341_v6, %v3389_v33  ;;  %v3401_v8 = vsel %vm3310_vm2, %v3396_v41, %v3399_v16  ;;  %v5536_v19 = vpack.i.bf16 %v3347_v27, %v3395_v26  ;;  %4855 = vmatpush3.bf16.msra.mxu0 %v4854_v4  ;;  %v3680_v4 = vld [vmem:[%s7912_s9 + $0x28] sm:$0xff] }
 0x3cb   :  { %v5541_v50 = vpack.i.bf16 %v3353_v57, %v3401_v8  ;;  %4856 = vmatprep.subr.bf16.mxu0 %v7965_v12  ;;  %v4866_v27 = vpack.c.bf16 %v3596_v54, %v3595_v24  ;;  %v3675_v57 = vld [vmem:[%s7912_s9] sm:$0xff]  ;;  %v4875_v38 = vpack.c.bf16 %v3680_v4, %v3679_v18 }
 0x3cc   :  { %5527 = vrot.lane.b32.xlu1 %v5526_v47, %s5595_s14  ;;  %5532 = vrot.lane.b32.xlu0 %v5531_v1, %s5597_s21 }
 0x3ce   :  { %4858 = vmatpush3.bf16.msra.mxu0 %v4857_v3  ;;  %v3682_v3 = vld [vmem:[%s7912_s9 + $0x38] sm:$0xff] }
 0x3cf   :  { %4859 = vmatprep.subr.bf16.mxu0 %v7965_v12  ;;  %v4878_v55 = vpack.c.bf16 %v3682_v3, %v3681_v34 }
 0x3d0   :  { %5537 = vrot.lane.b32.xlu1 %v5536_v19, %s5599_s23  ;;  %5542 = vrot.lane.b32.xlu0 %v5541_v50, %s5601_s24  ;;  %v3676_v19 = vld [vmem:[%s7912_s9 + $0x8] sm:$0xff] }
 0x3d1   :  { %v4869_v50 = vpack.c.bf16 %v3676_v19, %v3675_v57 }
 0x3d2   :  { %4861 = vmatpush3.bf16.msra.mxu0 %v4860_v9  ;;  %v3684_v9 = vld [vmem:[%s7912_s9 + $0x48] sm:$0xff] }
 0x3d3   :  { %4862 = vmatprep.subr.bf16.mxu0 %v7965_v12  ;;  %v4881_v61 = vpack.c.bf16 %v3684_v9, %v3683_v0 }
 0x3d6   :  { %4864 = vmatpush3.bf16.msra.mxu0 %v4863_v53  ;;  %v3686_v53 = vld [vmem:[%s7912_s9 + $0x58] sm:$0xff] }
 0x3d7   :  { %4865 = vmatprep.subr.bf16.mxu0 %v7965_v12 }
 0x3da   :  { %4867 = vmatpush3.bf16.msra.mxu0 %v4866_v27 }
 0x432   :  { %v5513_v60 = vpop.permute.xlu0 %5512  ;;  %v5518_v14 = vpop.permute.xlu1 %5517 }
 0x433   :  { %v5515_v58 = vunpack.i.h.bf16 %v5513_v60  ;;  %v5514_v31 = vunpack.i.l.bf16 %v5513_v60  ;;  %v5520_v20 = vunpack.i.h.bf16 %v5518_v14  ;;  %v5519_v42 = vunpack.i.l.bf16 %v5518_v14  ;;  %v4018_v14 = vld [vmem:[%s7909_s6] ss:$0 sm:$0xff] }
 0x434   :  { %v4884_v60 = vpack.c.bf16 %v3686_v53, %v3685_v45 }
 0x435   :  { %v3458_v28 = vsel %vm72_vm1, %v3311_v44, %v5515_v58  ;;  %v3465_v39 = vsel %vm72_vm1, %v3359_v43, %v5514_v31  ;;  %vm3772_vm1 = vcmask 1041408  }
 0x436   :  { %v5523_v29 = vpop.permute.xlu0 %5522  ;;  %v3459_v52 = vsel %vm2806_vm4, %v3458_v28, %v5520_v20  ;;  %v3466_v15 = vsel %vm2806_vm4, %v3465_v39, %v5519_v42  ;;  %v4890_v20 = vpack.c.bf16 %v3690_v35, %v3689_v30  ;;  %v3768_v39 = vlaneseq }
 0x437   :  { %v5525_v36 = vunpack.i.h.bf16 %v5523_v29  ;;  %v5524_v17 = vunpack.i.l.bf16 %v5523_v29 }
 0x439   :  { %v3460_v16 = vsel %vm2840_vm6, %v3459_v52, %v5525_v36  ;;  %v3467_v2 = vsel %vm2840_vm6, %v3466_v15, %v5524_v17  ;;  %v3769_v36 = vand.u32 127, %v3768_v39  ;;  %v4020_v17 = vld [vmem:[%s7913_s10] ss:$0 sm:$0xff] }
 0x43e   :  { %v5528_v5 = vpop.permute.xlu1 %5527  ;;  %v5533_v40 = vpop.permute.xlu0 %5532 }
 0x43f   :  { %v5530_v25 = vunpack.i.h.bf16 %v5528_v5  ;;  %v5529_v21 = vunpack.i.l.bf16 %v5528_v5  ;;  %v5535_v32 = vunpack.i.h.bf16 %v5533_v40  ;;  %v5534_v37 = vunpack.i.l.bf16 %v5533_v40 }
 0x441   :  { %v3461_v56 = vsel %vm2874_vm8, %v3460_v16, %v5530_v25  ;;  %v3468_v6 = vsel %vm2874_vm8, %v3467_v2, %v5529_v21 }
 0x442   :  { %v5538_v33 = vpop.permute.xlu1 %5537  ;;  %v5543_v62 = vpop.permute.xlu0 %5542  ;;  %v3462_v41 = vsel %vm2908_vm10, %v3461_v56, %v5535_v32  ;;  %v3469_v46 = vsel %vm2908_vm10, %v3468_v6, %v5534_v37 }
 0x443   :  { %v5540_v23 = vunpack.i.h.bf16 %v5538_v33  ;;  %v5539_v47 = vunpack.i.l.bf16 %v5538_v33  ;;  %v5545_v1 = vunpack.i.h.bf16 %v5543_v62  ;;  %v5544_v59 = vunpack.i.l.bf16 %v5543_v62 }
 0x445   :  { %v3463_v26 = vsel %vm2942_vm12, %v3462_v41, %v5540_v23  ;;  %v3470_v8 = vsel %vm2942_vm12, %v3469_v46, %v5539_v47 }
 0x446   :  { %v3471_v11 = vsel %vm2976_vm14, %v3470_v8, %v5544_v59  ;;  %v3464_v10 = vsel %vm2976_vm14, %v3463_v26, %v5545_v1 }
 0x447   :  { %3575 = vmatprep.mubr.f32.mxu1 %v3471_v11 }
 0x448   :  { %3576 = vmatmul.mubr.f32.vlgmr.msra.gmra.mrb[124].mxu1 %v3464_v10 }
 0x449   :  { %4765 = vmatprep.mubr.msk.f32.mxu1 %vm5586_vm0, %v7992_v22  ;;  %v3677_v22 = vld [vmem:[%s7912_s9 + $0x10] sm:$0xff]  ;;  %4870 = vmatpush3.bf16.msra.mxu1 %v4869_v50  ;;  %vm3770_vm0 = vcmp.lt.s32.totalorder %v3769_v36, 10 }
 0x44a   :  { %v4872_v49 = vpack.c.bf16 %v3678_v51, %v3677_v22  ;;  %4871 = vmatprep.subr.bf16.mxu1 %v7965_v12 }
 0x44d   :  { %4873 = vmatpush3.bf16.msra.mxu1 %v4872_v49 }
 0x44e   :  { %4874 = vmatprep.subr.bf16.mxu1 %v7965_v12 }
 0x451   :  { %4876 = vmatpush3.bf16.msra.mxu1 %v4875_v38 }
 0x452   :  { %4877 = vmatprep.subr.bf16.mxu1 %v7965_v12 }
 0x455   :  { %4879 = vmatpush3.bf16.msra.mxu1 %v4878_v55 }
 0x456   :  { %4880 = vmatprep.subr.bf16.mxu1 %v7965_v12 }
 0x459   :  { %4882 = vmatpush3.bf16.msra.mxu1 %v4881_v61 }
 0x45a   :  { %4883 = vmatprep.subr.bf16.mxu1 %v7965_v12 }
 0x45d   :  { %4885 = vmatpush3.bf16.msra.mxu1 %v4884_v60 }
 0x45e   :  { %4886 = vmatprep.subr.bf16.mxu1 %v7965_v12 }
 0x461   :  { %4888 = vmatpush3.bf16.msra.mxu1 %v4887_v13 }
 0x462   :  { %4889 = vmatprep.subr.bf16.mxu1 %v7965_v12  ;;  %v4019_v12 = vld [vmem:[%s7911_s8] ss:$0 sm:$0xff]  ;;  %s5603_s8 = smov [#allocation5]  }
 0x463   :  { %s3791_s9 = sshll.u32 %s5603_s8, 4  ;;  %s3792_s9 = int_to_ptr.vmem [resolvable:$true] %s3791_s9 }
 0x464   :  { %s5561_s10 = scalar_lea.vmem %s3792_s9, 32  ;;  %p5566_p1 = scmp.lt.s32.totalorder %s3792_s9, %s3792_s9 }
 0x465   :  { %4891 = vmatpush3.bf16.msra.mxu1 %v4890_v20  ;;  %p5562_p0 = scmp.ne.s32.totalorder %s3792_s9, %s5561_s10  ;;  %p5567_p2 = scmp.lt.s32.totalorder %s5561_s10, %s5561_s10 }
 0x467   :  { %p5568_p3 = por %p5567_p2, %p5566_p1 }
 0x469   :  { %p5569_p4 = pnand %p5568_p3, %p5562_p0 }
 0x51b   :  { %v4217_v48 = vpop.f32.mrb[124].mxu1 }
 0x51c   :  { %v4218_v58 = vpop.f32.mrb[125].mxu1 }
 0x51d   :  { %v4219_v31 = vadd.f32 %v4218_v58, %v4217_v48 }
 0x51f   :  { %v3578_v29 = vadd.f32 %v4219_v31, %v4018_v14 }
 0x521   :  { %4731 = vmatmul.mubr.f32.vlgmr.msra.gmra.mrb[140].mxu0 %v3578_v29 }
 0x5f4   :  { %v3670_v42 = vpop.f32.mrb[140].mxu0 }
 0x5f5   :  { %v3671_v43 = vadd.f32 %v4019_v12, %v3670_v42  ;;  %v4732_v44 = vpop.f32.mrb[141].mxu0 }
 0x5f7   :  { %v3674_v28 = vmax.f32 %v3671_v43, 0.0 }
 0x5f9   :  { %4766 = vmatmul.mubr.f32.vlgmr.msra.gmra.mrb[126].mxu1 %v3674_v28 }
 0x6cc   :  { %v3764_v5 = vpop.f32.mrb[126].mxu1 }
 0x6cd   :  { %v3765_v40 = vadd.f32 %v4020_v17, %v3764_v5  ;;  %v4767_v52 = vpop.f32.mrb[127].mxu1 }
 0x6cf   :  { %v3771_v15 = vsel %vm3770_vm0, %v3765_v40, -1e+30 }
 0x6d0   :  { %v3773_v25 = vsel %vm3772_vm1, %v3771_v15, -inf }
 0x6d1   :  { %3774 = vmax.xlane.f32.xlu1 %v3773_v25 }
 0x75e   :  { %v3775_v21 = vpop.xlane.xlu1 %3774 }
 0x75f   :  { %v3776_v16 = vsub.f32 %v3771_v15, %v3775_v21 }
 0x761   :  { %v3777_v2 = vmul.f32 1.442695, %v3776_v16 }
 0x763   :  { %5546 = vpow2.f32 %v3777_v2 }
 0x76d   :  { %v5547_v32 = vpop.eup %5546 }
 0x76e   :  { %v3779_v37 = vsel %vm3772_vm1, %v5547_v32, 0.0 }
 0x76f   :  { %3780 = vadd.xlane.f32.xlu0 %v3779_v37 }
 0x7fc   :  { %v3781_v56 = vpop.xlane.xlu0 %3780 }
 0x7fd   :  { %5548 = vrcp.f32 %v3781_v56 }
 0x807   :  { %v5549_v6 = vpop.eup %5548 }
 0x808   :  { %v3783_v33 = vmul.f32 %v5549_v6, %v5547_v32 }
 0x80a   :  { %3784 = vst [vmem:[#allocation5] sm:$0x3] %v3783_v33 }
 0x80b   :  { %5572 = shalt.err (!%p5569_p4)
}
 0x80c   :  { %s5573_s24 = scalar_lea.hbm %s7914_s11, 32 }
 0x80d   :  { %p5574_p5 = scmp.ne.s32.totalorder %s7914_s11, %s5573_s24  ;;  %p5577_p6 = scmp.lt.u32.totalorder %s5573_s24, %s7914_s11 }
 0x80f   :  { %p5579_p7 = pnand %p5577_p6, %p5574_p5 }
 0x811   :  { %5582 = shalt.err (!%p5579_p7)
}
 0x812   :  { %3794 = dma.vmem_to_hbm [thread:$0]  %s3792_s9, 32, %s7914_s11, [#allocation6]  }
 0x813   :  { %5583 = dma.done.wait [#allocation6], 32  }
 0x814   :  { %5584 = vsyncadd [#allocation6], 4294967264 }
 0x815   :  { %3798 = vsyncpa [#allocation6], 1 }

</bundles_post_ra>
